<compile_context>
chip_gen: v5e
topology: v5e:2x2
jax: 0.10.0
libtpu: 0.0.40
codegen_flags: <defaults>
</compile_context>

<pallas_src>
import math

import jax
import jax.numpy as jnp
from jax import lax
from jax.experimental import pallas as pl
from jax.experimental.pallas import tpu as pltpu

F32 = jnp.float32
# Set to jnp.bfloat16 on v6e / v7x for ~2x MXU throughput on the conv/res
# matmuls (f32 accumulation is kept either way).  Default f32 preserves the
# PyTorch reference numerics.
MATMUL_DTYPE = jnp.float32


def _layer_norm(z, g, b):
    mu = jnp.mean(z, axis=-1, keepdims=True)
    var = jnp.mean(jnp.square(z - mu), axis=-1, keepdims=True)
    return (z - mu) * lax.rsqrt(var + 1e-5) * g + b


# ---------------------------------------------------------------------------
# Kernel 1: conv1x1 + maxpool2 stack (7 layers) + two residual blocks.
# Gridded over row chunks; pooling done in-register via even/odd strided reads.
# ---------------------------------------------------------------------------
def _make_conv_res_kernel(chunk):
    half0 = chunk // 2

    def kernel(x_ref,
               cw1, cb1, cw2, cb2, cw3, cb3, cw4, cb4, cw5, cb5, cw6, cb6,
               cw7, cb7, r1m, r1v, r2m, r2v, o_ref, stage):

        def conv_pool(even, odd, w_ref, b_ref):
            # maxpool2(conv1x1(x)) == max(x_even @ W, x_odd @ W) + b (conv is affine)
            w = w_ref[...].astype(MATMUL_DTYPE)
            ye = jnp.dot(even.astype(MATMUL_DTYPE), w, preferred_element_type=F32)
            yo = jnp.dot(odd.astype(MATMUL_DTYPE), w, preferred_element_type=F32)
            return jnp.maximum(ye, yo) + b_ref[...]

        # layer 1: strided even/odd reads directly from the streamed input block
        h = conv_pool(x_ref[pl.ds(0, half0, stride=2), :],
                      x_ref[pl.ds(1, half0, stride=2), :], cw1, cb1)
        rows = half0
        # layers 2..7: stage the pooled activation once, read even/odd strided
        for w_ref, b_ref in ((cw2, cb2), (cw3, cb3), (cw4, cb4),
                             (cw5, cb5), (cw6, cb6), (cw7, cb7)):
            cin = w_ref.shape[0]
            stage[0:rows, 0:cin] = h
            half = rows // 2
            h = conv_pool(stage[pl.ds(0, half, stride=2), 0:cin],
                          stage[pl.ds(1, half, stride=2), 0:cin], w_ref, b_ref)
            rows = half                                  # ends at (chunk//128, 64)

        # two residual blocks (BatchNorm folded, eval mode)
        def res_block(z, mats_ref, vecs_ref):
            s1, t1, ba = vecs_ref[0], vecs_ref[1], vecs_ref[2]
            s2, t2, bb = vecs_ref[3], vecs_ref[4], vecs_ref[5]
            wa = mats_ref[0].astype(MATMUL_DTYPE)
            wb = mats_ref[1].astype(MATMUL_DTYPE)
            r = jnp.maximum(z * s1 + t1, 0.0)
            r = jnp.dot(r.astype(MATMUL_DTYPE), wa, preferred_element_type=F32) + ba
            r = jnp.maximum(r * s2 + t2, 0.0)
            r = jnp.dot(r.astype(MATMUL_DTYPE), wb, preferred_element_type=F32) + bb
            return r + z

        h = res_block(h, r1m, r1v)
        h = res_block(h, r2m, r2v)
        o_ref[...] = h

    return kernel


# ---------------------------------------------------------------------------
# Kernel 2: LSTM1 -> conv12+BN5 -> transformer half-block x2 -> LSTM2 -> LSTM3.
# ---------------------------------------------------------------------------
def _make_tail_kernel(B, Lf):
    NROWS = B * Lf

    def kernel(feat_ref,
               l1_wih, l1_whh, l1_b,
               c12_w, c12_b,
               t1m, t1v, t2m, t2v,
               l2_wih, l2_whh, l2_b,
               l3_wih, l3_whh, l3_b,
               o_ref,
               xproj_scr, seq_scr, qkv_scr):

        def lstm_pass(z, wih_ref, whh_ref, b_ref, dst_ref):
            """nn.LSTM over the original batch axis (T=B, N=Lf); gates [i|f|g|o]."""
            H = whh_ref.shape[0]
            # hoisted input projection: one big matmul off the serial recurrence
            xproj_scr[0:NROWS, 0:4 * H] = (
                jnp.dot(z, wih_ref[...], preferred_element_type=F32) + b_ref[...])
            whh = whh_ref[...]

            def step(t, carry):
                hs, cs = carry
                off = pl.multiple_of(t * Lf, 8)
                g = (xproj_scr[pl.ds(off, Lf), 0:4 * H]
                     + jnp.dot(hs, whh, preferred_element_type=F32))
                i_f = jax.nn.sigmoid(g[:, 0:2 * H])      # i and f in one slab
                gg = jnp.tanh(g[:, 2 * H:3 * H])
                og = jax.nn.sigmoid(g[:, 3 * H:4 * H])
                cs = i_f[:, H:2 * H] * cs + i_f[:, 0:H] * gg
                hs = og * jnp.tanh(cs)
                dst_ref[pl.ds(off, Lf), 0:H] = hs
                return hs, cs

            zero = jnp.zeros((Lf, H), F32)
            lax.fori_loop(0, B, step, (zero, zero))
            return dst_ref[0:NROWS, 0:H]

        def half_block(z, mats_ref, vecs_ref):
            """SDPA + residual + LN, then FF + residual + LN."""
            wq, wk, wv, wo, wf = (mats_ref[i] for i in range(5))
            bq, bk, bv, bo = (vecs_ref[i] for i in range(4))
            g1, t1, bf, g2, t2 = (vecs_ref[i] for i in range(4, 9))
            # batched projections over the whole (NROWS, 16) slab
            qkv_scr[0:NROWS, 0:16] = jnp.dot(z, wq, preferred_element_type=F32) + bq
            qkv_scr[0:NROWS, 16:32] = jnp.dot(z, wk, preferred_element_type=F32) + bk
            qkv_scr[0:NROWS, 32:48] = jnp.dot(z, wv, preferred_element_type=F32) + bv
            scale = 1.0 / math.sqrt(16.0)

            def attend(b, carry):                        # per-batch (Lf x Lf) SDPA
                off = pl.multiple_of(b * Lf, 8)
                qb = qkv_scr[pl.ds(off, Lf), 0:16]
                kb = qkv_scr[pl.ds(off, Lf), 16:32]
                vb = qkv_scr[pl.ds(off, Lf), 32:48]
                s = jnp.einsum('qd,kd->qk', qb, kb,
                               preferred_element_type=F32) * scale
                m = jnp.max(s, axis=-1, keepdims=True)
                e = jnp.exp(s - m)
                p_attn = e * pl.reciprocal(jnp.sum(e, axis=-1, keepdims=True),
                                           approx=True)
                qkv_scr[pl.ds(off, Lf), 48:64] = jnp.dot(
                    p_attn, vb, preferred_element_type=F32)
                return carry

            lax.fori_loop(0, B, attend, 0)
            ctx = qkv_scr[0:NROWS, 48:64]
            attn = jnp.dot(ctx, wo, preferred_element_type=F32) + bo
            y = _layer_norm(attn + z, g1, t1)
            ff = jnp.dot(y, wf, preferred_element_type=F32) + bf
            return _layer_norm(ff + y, g2, t2)

        h = feat_ref[...]                                   # (NROWS, 64)
        h = lstm_pass(h, l1_wih, l1_whh, l1_b, seq_scr)     # (NROWS, 32)
        h = jnp.dot(h, c12_w[...], preferred_element_type=F32) + c12_b[...]
        h = half_block(h, t1m, t1v)
        h = half_block(h, t2m, t2v)
        h = lstm_pass(h, l2_wih, l2_whh, l2_b, seq_scr)     # (NROWS, 16)
        lstm_pass(h, l3_wih, l3_whh, l3_b, o_ref)           # writes directly to o_ref

    return kernel


# ---------------------------------------------------------------------------
# Parameter initialization (deterministic, synthetic).
# ---------------------------------------------------------------------------
def init_params(seed=42):
    kit = iter(jax.random.split(jax.random.PRNGKey(seed), 256))

    def nk():
        return next(kit)

    def linear_w(cin, cout):
        bound = 1.0 / math.sqrt(cin)
        return jax.random.uniform(nk(), (cin, cout), F32, -bound, bound)

    def linear_b(cin, cout):
        bound = 1.0 / math.sqrt(cin)
        return jax.random.uniform(nk(), (1, cout), F32, -bound, bound)

    def bn_fold(c):
        gamma = jax.random.uniform(nk(), (1, c), F32, 0.8, 1.2)
        beta = jax.random.uniform(nk(), (1, c), F32, -0.1, 0.1)
        mean = jax.random.uniform(nk(), (1, c), F32, -0.1, 0.1)
        var = jax.random.uniform(nk(), (1, c), F32, 0.5, 1.5)
        scale = gamma / jnp.sqrt(var + 1e-5)
        return scale, beta - mean * scale

    def lstm_p(cin, h):
        # gates packed along the last axis in PyTorch order [i | f | g | o]
        bound = 1.0 / math.sqrt(h)
        wih = jax.random.uniform(nk(), (cin, 4 * h), F32, -bound, bound)
        whh = jax.random.uniform(nk(), (h, 4 * h), F32, -bound, bound)
        b_ih = jax.random.uniform(nk(), (1, 4 * h), F32, -bound, bound)
        b_hh = jax.random.uniform(nk(), (1, 4 * h), F32, -bound, bound)
        return wih, whh, b_ih + b_hh

    p = {}
    conv_dims = [(3, 8), (8, 16), (16, 16), (16, 32), (32, 32), (32, 64), (64, 64)]
    p['conv_pool'] = [(linear_w(ci, co), linear_b(ci, co)) for ci, co in conv_dims]

    def resblock_p():
        s1, t1 = bn_fold(64)
        wa, ba = linear_w(64, 64), linear_b(64, 64)
        s2, t2 = bn_fold(64)
        wb, bb = linear_w(64, 64), linear_b(64, 64)
        return jnp.stack([wa, wb]), jnp.stack([s1, t1, ba, s2, t2, bb])

    p['res1'] = resblock_p()
    p['res2'] = resblock_p()

    p['lstm1'] = lstm_p(64, 32)          # "bidirectional_1" is nn.LSTM(64, 32)

    w12, b12 = linear_w(32, 16), linear_b(32, 16)
    s5, t5 = bn_fold(16)
    p['conv12'] = (w12 * s5, b12 * s5 + t5)     # conv1d_12 with BN5 folded

    def block_p():
        mats = jnp.stack([linear_w(16, 16) for _ in range(5)])
        bq, bk, bv, bo = (linear_b(16, 16) for _ in range(4))
        bf = linear_b(16, 16)
        g1 = jnp.ones((1, 16), F32); t1 = jnp.zeros((1, 16), F32)
        g2 = jnp.ones((1, 16), F32); t2 = jnp.zeros((1, 16), F32)
        return mats, jnp.stack([bq, bk, bv, bo, g1, t1, bf, g2, t2])

    p['blk1'] = block_p()
    p['blk2'] = block_p()

    p['lstm2'] = lstm_p(16, 16)
    p['lstm3'] = lstm_p(16, 16)
    return p


# ---------------------------------------------------------------------------
# Full forward pass (conv/res stack gridded call + fused tail call).
# ---------------------------------------------------------------------------
def _pick_chunk(L):
    for c in (8192, 4096, 2048, 1024):
        if L % c == 0:
            return c
    raise ValueError("sequence length L must be a multiple of 1024")


def _const_spec(a):
    nd = a.ndim
    return pl.BlockSpec(a.shape, lambda i: (0,) * nd)


def eq_transformer_encoder(x, p):
    """x: (B, L, 3) channels-last; L must be a multiple of 1024."""
    B, L, cin = x.shape
    Lf = L // 128
    CHUNK = _pick_chunk(L)
    nchunks = (B * L) // CHUNK
    CIN_PAD = 8                                      # pad 3 -> 8 input channels

    # ---- kernel 1: conv1x1+maxpool stack + residual blocks (row-chunk grid) ---
    x_flat = jnp.pad(x.reshape(B * L, cin), ((0, 0), (0, CIN_PAD - cin)))
    w1, b1 = p['conv_pool'][0]
    w1 = jnp.pad(w1, ((0, CIN_PAD - cin), (0, 0)))   # zero rows for padded channels
    conv_args = [w1, b1]
    for w, b in p['conv_pool'][1:]:
        conv_args += [w, b]
    conv_args += [p['res1'][0], p['res1'][1], p['res2'][0], p['res2'][1]]

    in_specs = [pl.BlockSpec((CHUNK, CIN_PAD), lambda i: (i, 0))]
    in_specs += [_const_spec(a) for a in conv_args]

    # VMEM budget from the actual tile/scratch sizes (lane-padded to 128) + margin.
    vmem1 = 4 * (2 * CHUNK * 128 + (CHUNK // 2) * 128
                 + 2 * (CHUNK // 128) * 128) * 2 + (4 << 20)

    feat = pl.pallas_call(
        _make_conv_res_kernel(CHUNK),
        out_shape=jax.ShapeDtypeStruct((B * Lf, 64), F32),
        grid=(nchunks,),
        in_specs=in_specs,
        out_specs=pl.BlockSpec((CHUNK // 128, 64), lambda i: (i, 0)),
        scratch_shapes=[pltpu.VMEM((CHUNK // 2, 64), F32)],
        compiler_params=pltpu.CompilerParams(
            dimension_semantics=("parallel",),
            vmem_limit_bytes=int(vmem1)),
    )(x_flat, *conv_args)

    # ---- kernel 2: LSTM1 + conv12/BN5 + transformer x2 + LSTM2 + LSTM3 --------
    tail_args = (list(p['lstm1']) + list(p['conv12'])
                 + [p['blk1'][0], p['blk1'][1], p['blk2'][0], p['blk2'][1]]
                 + list(p['lstm2']) + list(p['lstm3']))
    rows = B * Lf
    vmem2 = 4 * (5 * rows * 128) * 2 + (2 << 20)

    out = pl.pallas_call(
        _make_tail_kernel(B, Lf),
        out_shape=jax.ShapeDtypeStruct((rows, 16), F32),
        scratch_shapes=[
            pltpu.VMEM((rows, 128), F32),   # LSTM input-projection staging (4H <= 128)
            pltpu.VMEM((rows, 32), F32),    # LSTM hidden-sequence staging
            pltpu.VMEM((rows, 64), F32),    # attention q|k|v|ctx staging
        ],
        compiler_params=pltpu.CompilerParams(vmem_limit_bytes=int(vmem2)),
    )(feat, *tail_args)
    return out.reshape(B, Lf, 16)


if __name__ == "__main__":
    params = init_params(42)
    key = jax.random.PRNGKey(0)
    B, C, L = 2, 3, 1024                                 # L divisible by 2**7 and 1024
    x_ncl = jax.random.normal(key, (B, C, L), F32)       # PyTorch NCL input
    x = jnp.transpose(x_ncl, (0, 2, 1))                  # channels-last (B, L, C)

    out = jax.jit(eq_transformer_encoder)(x, params)
    out = jax.block_until_ready(out)
    assert out.shape == (B, L // 128, 16), out.shape
    assert bool(jnp.all(jnp.isfinite(out)))
    print("KERNEL_OK")
</pallas_src>

<mosaic_0001>
module attributes {stable_mosaic.version = 11 : i64} {
  func.func @kernel(%arg0: i32, %arg1: memref<1024x8xf32, #tpu.memory_space<vmem>>, %arg2: memref<8x8xf32, #tpu.memory_space<vmem>>, %arg3: memref<1x8xf32, #tpu.memory_space<vmem>>, %arg4: memref<8x16xf32, #tpu.memory_space<vmem>>, %arg5: memref<1x16xf32, #tpu.memory_space<vmem>>, %arg6: memref<16x16xf32, #tpu.memory_space<vmem>>, %arg7: memref<1x16xf32, #tpu.memory_space<vmem>>, %arg8: memref<16x32xf32, #tpu.memory_space<vmem>>, %arg9: memref<1x32xf32, #tpu.memory_space<vmem>>, %arg10: memref<32x32xf32, #tpu.memory_space<vmem>>, %arg11: memref<1x32xf32, #tpu.memory_space<vmem>>, %arg12: memref<32x64xf32, #tpu.memory_space<vmem>>, %arg13: memref<1x64xf32, #tpu.memory_space<vmem>>, %arg14: memref<64x64xf32, #tpu.memory_space<vmem>>, %arg15: memref<1x64xf32, #tpu.memory_space<vmem>>, %arg16: memref<2x64x64xf32, #tpu.memory_space<vmem>>, %arg17: memref<6x1x64xf32, #tpu.memory_space<vmem>>, %arg18: memref<2x64x64xf32, #tpu.memory_space<vmem>>, %arg19: memref<6x1x64xf32, #tpu.memory_space<vmem>>, %arg20: memref<8x64xf32, #tpu.memory_space<vmem>>, %arg21: memref<512x64xf32, #tpu.memory_space<vmem>>) attributes {dimension_semantics = [#tpu.dimension_semantics<parallel>], iteration_bounds = array<i64: 2>, scalar_prefetch = 0 : i64, scratch_operands = 1 : i64, tpu.core_type = #tpu.core_type<tc>, window_params = [{transform_indices = @transform_0, window_bounds = array<i64: 1024, 8>}, {pipeline_mode = #tpu.pipeline_mode<synchronous>, transform_indices = @transform_1, window_bounds = array<i64: 8, 8>}, {pipeline_mode = #tpu.pipeline_mode<synchronous>, transform_indices = @transform_2, window_bounds = array<i64: 1, 8>}, {pipeline_mode = #tpu.pipeline_mode<synchronous>, transform_indices = @transform_3, window_bounds = array<i64: 8, 16>}, {pipeline_mode = #tpu.pipeline_mode<synchronous>, transform_indices = @transform_4, window_bounds = array<i64: 1, 16>}, {pipeline_mode = #tpu.pipeline_mode<synchronous>, transform_indices = @transform_5, window_bounds = array<i64: 16, 16>}, {pipeline_mode = #tpu.pipeline_mode<synchronous>, transform_indices = @transform_6, window_bounds = array<i64: 1, 16>}, {pipeline_mode = #tpu.pipeline_mode<synchronous>, transform_indices = @transform_7, window_bounds = array<i64: 16, 32>}, {pipeline_mode = #tpu.pipeline_mode<synchronous>, transform_indices = @transform_8, window_bounds = array<i64: 1, 32>}, {pipeline_mode = #tpu.pipeline_mode<synchronous>, transform_indices = @transform_9, window_bounds = array<i64: 32, 32>}, {pipeline_mode = #tpu.pipeline_mode<synchronous>, transform_indices = @transform_10, window_bounds = array<i64: 1, 32>}, {pipeline_mode = #tpu.pipeline_mode<synchronous>, transform_indices = @transform_11, window_bounds = array<i64: 32, 64>}, {pipeline_mode = #tpu.pipeline_mode<synchronous>, transform_indices = @transform_12, window_bounds = array<i64: 1, 64>}, {pipeline_mode = #tpu.pipeline_mode<synchronous>, transform_indices = @transform_13, window_bounds = array<i64: 64, 64>}, {pipeline_mode = #tpu.pipeline_mode<synchronous>, transform_indices = @transform_14, window_bounds = array<i64: 1, 64>}, {pipeline_mode = #tpu.pipeline_mode<synchronous>, transform_indices = @transform_15, window_bounds = array<i64: 2, 64, 64>}, {pipeline_mode = #tpu.pipeline_mode<synchronous>, transform_indices = @transform_16, window_bounds = array<i64: 6, 1, 64>}, {pipeline_mode = #tpu.pipeline_mode<synchronous>, transform_indices = @transform_17, window_bounds = array<i64: 2, 64, 64>}, {pipeline_mode = #tpu.pipeline_mode<synchronous>, transform_indices = @transform_18, window_bounds = array<i64: 6, 1, 64>}, {transform_indices = @transform_19, window_bounds = array<i64: 8, 64>}]} {
    %c0 = arith.constant 0 : index
    %c0_0 = arith.constant 0 : index
    %0 = tpu.strided_load %arg1[%c0, %c0_0] {strides = array<i32: 2, 1>} : memref<1024x8xf32, #tpu.memory_space<vmem>>, vector<512x8xf32>
    %c1 = arith.constant 1 : index
    %c0_1 = arith.constant 0 : index
    %1 = tpu.strided_load %arg1[%c1, %c0_1] {strides = array<i32: 2, 1>} : memref<1024x8xf32, #tpu.memory_space<vmem>>, vector<512x8xf32>
    %c0_2 = arith.constant 0 : index
    %c0_3 = arith.constant 0 : index
    %2 = vector.load %arg2[%c0_2, %c0_3] : memref<8x8xf32, #tpu.memory_space<vmem>>, vector<8x8xf32>
    %cst = arith.constant dense<0.000000e+00> : vector<512x8xf32>
    %3 = tpu.matmul %0, %2, %cst {dimension_numbers = #tpu.dot_dimension_numbers<[1], [0], [0], [1], [0, 0, 1, 1], [], []>} : vector<512x8xf32>, vector<8x8xf32>, vector<512x8xf32> -> vector<512x8xf32>
    %cst_4 = arith.constant dense<0.000000e+00> : vector<512x8xf32>
    %4 = tpu.matmul %1, %2, %cst_4 {dimension_numbers = #tpu.dot_dimension_numbers<[1], [0], [0], [1], [0, 0, 1, 1], [], []>} : vector<512x8xf32>, vector<8x8xf32>, vector<512x8xf32> -> vector<512x8xf32>
    %5 = arith.maximumf %3, %4 : vector<512x8xf32>
    %c0_5 = arith.constant 0 : index
    %c0_6 = arith.constant 0 : index
    %6 = vector.load %arg3[%c0_5, %c0_6] : memref<1x8xf32, #tpu.memory_space<vmem>>, vector<1x8xf32>
    %7 = vector.broadcast %6 : vector<1x8xf32> to vector<512x8xf32>
    %8 = arith.addf %5, %7 : vector<512x8xf32>
    %c0_7 = arith.constant 0 : index
    %c0_8 = arith.constant 0 : index
    %9 = vector.load %arg21[%c0_7, %c0_8] : memref<512x64xf32, #tpu.memory_space<vmem>>, vector<512x8xf32>
    tpu.vector_store %arg21[%c0_7, %c0_8], %8 {strides = array<i32>} : memref<512x64xf32, #tpu.memory_space<vmem>>, vector<512x8xf32>,
    %c0_9 = arith.constant 0 : index
    %c0_10 = arith.constant 0 : index
    %10 = tpu.strided_load %arg21[%c0_9, %c0_10] {strides = array<i32: 2, 1>} : memref<512x64xf32, #tpu.memory_space<vmem>>, vector<256x8xf32>
    %c1_11 = arith.constant 1 : index
    %c0_12 = arith.constant 0 : index
    %11 = tpu.strided_load %arg21[%c1_11, %c0_12] {strides = array<i32: 2, 1>} : memref<512x64xf32, #tpu.memory_space<vmem>>, vector<256x8xf32>
    %c0_13 = arith.constant 0 : index
    %c0_14 = arith.constant 0 : index
    %12 = vector.load %arg4[%c0_13, %c0_14] : memref<8x16xf32, #tpu.memory_space<vmem>>, vector<8x16xf32>
    %cst_15 = arith.constant dense<0.000000e+00> : vector<256x16xf32>
    %13 = tpu.matmul %10, %12, %cst_15 {dimension_numbers = #tpu.dot_dimension_numbers<[1], [0], [0], [1], [0, 0, 1, 1], [], []>} : vector<256x8xf32>, vector<8x16xf32>, vector<256x16xf32> -> vector<256x16xf32>
    %cst_16 = arith.constant dense<0.000000e+00> : vector<256x16xf32>
    %14 = tpu.matmul %11, %12, %cst_16 {dimension_numbers = #tpu.dot_dimension_numbers<[1], [0], [0], [1], [0, 0, 1, 1], [], []>} : vector<256x8xf32>, vector<8x16xf32>, vector<256x16xf32> -> vector<256x16xf32>
    %15 = arith.maximumf %13, %14 : vector<256x16xf32>
    %c0_17 = arith.constant 0 : index
    %c0_18 = arith.constant 0 : index
    %16 = vector.load %arg5[%c0_17, %c0_18] : memref<1x16xf32, #tpu.memory_space<vmem>>, vector<1x16xf32>
    %17 = vector.broadcast %16 : vector<1x16xf32> to vector<256x16xf32>
    %18 = arith.addf %15, %17 : vector<256x16xf32>
    %c0_19 = arith.constant 0 : index
    %c0_20 = arith.constant 0 : index
    %19 = vector.load %arg21[%c0_19, %c0_20] : memref<512x64xf32, #tpu.memory_space<vmem>>, vector<256x16xf32>
    tpu.vector_store %arg21[%c0_19, %c0_20], %18 {strides = array<i32>} : memref<512x64xf32, #tpu.memory_space<vmem>>, vector<256x16xf32>,
    %c0_21 = arith.constant 0 : index
    %c0_22 = arith.constant 0 : index
    %20 = tpu.strided_load %arg21[%c0_21, %c0_22] {strides = array<i32: 2, 1>} : memref<512x64xf32, #tpu.memory_space<vmem>>, vector<128x16xf32>
    %c1_23 = arith.constant 1 : index
    %c0_24 = arith.constant 0 : index
    %21 = tpu.strided_load %arg21[%c1_23, %c0_24] {strides = array<i32: 2, 1>} : memref<512x64xf32, #tpu.memory_space<vmem>>, vector<128x16xf32>
    %c0_25 = arith.constant 0 : index
    %c0_26 = arith.constant 0 : index
    %22 = vector.load %arg6[%c0_25, %c0_26] : memref<16x16xf32, #tpu.memory_space<vmem>>, vector<16x16xf32>
    %cst_27 = arith.constant dense<0.000000e+00> : vector<128x16xf32>
    %23 = tpu.matmul %20, %22, %cst_27 {dimension_numbers = #tpu.dot_dimension_numbers<[1], [0], [0], [1], [0, 0, 1, 1], [], []>} : vector<128x16xf32>, vector<16x16xf32>, vector<128x16xf32> -> vector<128x16xf32>
    %cst_28 = arith.constant dense<0.000000e+00> : vector<128x16xf32>
    %24 = tpu.matmul %21, %22, %cst_28 {dimension_numbers = #tpu.dot_dimension_numbers<[1], [0], [0], [1], [0, 0, 1, 1], [], []>} : vector<128x16xf32>, vector<16x16xf32>, vector<128x16xf32> -> vector<128x16xf32>
    %25 = arith.maximumf %23, %24 : vector<128x16xf32>
    %c0_29 = arith.constant 0 : index
    %c0_30 = arith.constant 0 : index
    %26 = vector.load %arg7[%c0_29, %c0_30] : memref<1x16xf32, #tpu.memory_space<vmem>>, vector<1x16xf32>
    %27 = vector.broadcast %26 : vector<1x16xf32> to vector<128x16xf32>
    %28 = arith.addf %25, %27 : vector<128x16xf32>
    %c0_31 = arith.constant 0 : index
    %c0_32 = arith.constant 0 : index
    %29 = vector.load %arg21[%c0_31, %c0_32] : memref<512x64xf32, #tpu.memory_space<vmem>>, vector<128x16xf32>
    tpu.vector_store %arg21[%c0_31, %c0_32], %28 {strides = array<i32>} : memref<512x64xf32, #tpu.memory_space<vmem>>, vector<128x16xf32>,
    %c0_33 = arith.constant 0 : index
    %c0_34 = arith.constant 0 : index
    %30 = tpu.strided_load %arg21[%c0_33, %c0_34] {strides = array<i32: 2, 1>} : memref<512x64xf32, #tpu.memory_space<vmem>>, vector<64x16xf32>
    %c1_35 = arith.constant 1 : index
    %c0_36 = arith.constant 0 : index
    %31 = tpu.strided_load %arg21[%c1_35, %c0_36] {strides = array<i32: 2, 1>} : memref<512x64xf32, #tpu.memory_space<vmem>>, vector<64x16xf32>
    %c0_37 = arith.constant 0 : index
    %c0_38 = arith.constant 0 : index
    %32 = vector.load %arg8[%c0_37, %c0_38] : memref<16x32xf32, #tpu.memory_space<vmem>>, vector<16x32xf32>
    %cst_39 = arith.constant dense<0.000000e+00> : vector<64x32xf32>
    %33 = tpu.matmul %30, %32, %cst_39 {dimension_numbers = #tpu.dot_dimension_numbers<[1], [0], [0], [1], [0, 0, 1, 1], [], []>} : vector<64x16xf32>, vector<16x32xf32>, vector<64x32xf32> -> vector<64x32xf32>
    %cst_40 = arith.constant dense<0.000000e+00> : vector<64x32xf32>
    %34 = tpu.matmul %31, %32, %cst_40 {dimension_numbers = #tpu.dot_dimension_numbers<[1], [0], [0], [1], [0, 0, 1, 1], [], []>} : vector<64x16xf32>, vector<16x32xf32>, vector<64x32xf32> -> vector<64x32xf32>
    %35 = arith.maximumf %33, %34 : vector<64x32xf32>
    %c0_41 = arith.constant 0 : index
    %c0_42 = arith.constant 0 : index
    %36 = vector.load %arg9[%c0_41, %c0_42] : memref<1x32xf32, #tpu.memory_space<vmem>>, vector<1x32xf32>
    %37 = vector.broadcast %36 : vector<1x32xf32> to vector<64x32xf32>
    %38 = arith.addf %35, %37 : vector<64x32xf32>
    %c0_43 = arith.constant 0 : index
    %c0_44 = arith.constant 0 : index
    %39 = vector.load %arg21[%c0_43, %c0_44] : memref<512x64xf32, #tpu.memory_space<vmem>>, vector<64x32xf32>
    tpu.vector_store %arg21[%c0_43, %c0_44], %38 {strides = array<i32>} : memref<512x64xf32, #tpu.memory_space<vmem>>, vector<64x32xf32>,
    %c0_45 = arith.constant 0 : index
    %c0_46 = arith.constant 0 : index
    %40 = tpu.strided_load %arg21[%c0_45, %c0_46] {strides = array<i32: 2, 1>} : memref<512x64xf32, #tpu.memory_space<vmem>>, vector<32x32xf32>
    %c1_47 = arith.constant 1 : index
    %c0_48 = arith.constant 0 : index
    %41 = tpu.strided_load %arg21[%c1_47, %c0_48] {strides = array<i32: 2, 1>} : memref<512x64xf32, #tpu.memory_space<vmem>>, vector<32x32xf32>
    %c0_49 = arith.constant 0 : index
    %c0_50 = arith.constant 0 : index
    %42 = vector.load %arg10[%c0_49, %c0_50] : memref<32x32xf32, #tpu.memory_space<vmem>>, vector<32x32xf32>
    %cst_51 = arith.constant dense<0.000000e+00> : vector<32x32xf32>
    %43 = tpu.matmul %40, %42, %cst_51 {dimension_numbers = #tpu.dot_dimension_numbers<[1], [0], [0], [1], [0, 0, 1, 1], [], []>} : vector<32x32xf32>, vector<32x32xf32>, vector<32x32xf32> -> vector<32x32xf32>
    %cst_52 = arith.constant dense<0.000000e+00> : vector<32x32xf32>
    %44 = tpu.matmul %41, %42, %cst_52 {dimension_numbers = #tpu.dot_dimension_numbers<[1], [0], [0], [1], [0, 0, 1, 1], [], []>} : vector<32x32xf32>, vector<32x32xf32>, vector<32x32xf32> -> vector<32x32xf32>
    %45 = arith.maximumf %43, %44 : vector<32x32xf32>
    %c0_53 = arith.constant 0 : index
    %c0_54 = arith.constant 0 : index
    %46 = vector.load %arg11[%c0_53, %c0_54] : memref<1x32xf32, #tpu.memory_space<vmem>>, vector<1x32xf32>
    %47 = vector.broadcast %46 : vector<1x32xf32> to vector<32x32xf32>
    %48 = arith.addf %45, %47 : vector<32x32xf32>
    %c0_55 = arith.constant 0 : index
    %c0_56 = arith.constant 0 : index
    %49 = vector.load %arg21[%c0_55, %c0_56] : memref<512x64xf32, #tpu.memory_space<vmem>>, vector<32x32xf32>
    tpu.vector_store %arg21[%c0_55, %c0_56], %48 {strides = array<i32>} : memref<512x64xf32, #tpu.memory_space<vmem>>, vector<32x32xf32>,
    %c0_57 = arith.constant 0 : index
    %c0_58 = arith.constant 0 : index
    %50 = tpu.strided_load %arg21[%c0_57, %c0_58] {strides = array<i32: 2, 1>} : memref<512x64xf32, #tpu.memory_space<vmem>>, vector<16x32xf32>
    %c1_59 = arith.constant 1 : index
    %c0_60 = arith.constant 0 : index
    %51 = tpu.strided_load %arg21[%c1_59, %c0_60] {strides = array<i32: 2, 1>} : memref<512x64xf32, #tpu.memory_space<vmem>>, vector<16x32xf32>
    %c0_61 = arith.constant 0 : index
    %c0_62 = arith.constant 0 : index
    %52 = vector.load %arg12[%c0_61, %c0_62] : memref<32x64xf32, #tpu.memory_space<vmem>>, vector<32x64xf32>
    %cst_63 = arith.constant dense<0.000000e+00> : vector<16x64xf32>
    %53 = tpu.matmul %50, %52, %cst_63 {dimension_numbers = #tpu.dot_dimension_numbers<[1], [0], [0], [1], [0, 0, 1, 1], [], []>} : vector<16x32xf32>, vector<32x64xf32>, vector<16x64xf32> -> vector<16x64xf32>
    %cst_64 = arith.constant dense<0.000000e+00> : vector<16x64xf32>
    %54 = tpu.matmul %51, %52, %cst_64 {dimension_numbers = #tpu.dot_dimension_numbers<[1], [0], [0], [1], [0, 0, 1, 1], [], []>} : vector<16x32xf32>, vector<32x64xf32>, vector<16x64xf32> -> vector<16x64xf32>
    %55 = arith.maximumf %53, %54 : vector<16x64xf32>
    %c0_65 = arith.constant 0 : index
    %c0_66 = arith.constant 0 : index
    %56 = vector.load %arg13[%c0_65, %c0_66] : memref<1x64xf32, #tpu.memory_space<vmem>>, vector<1x64xf32>
    %57 = vector.broadcast %56 : vector<1x64xf32> to vector<16x64xf32>
    %58 = arith.addf %55, %57 : vector<16x64xf32>
    %c0_67 = arith.constant 0 : index
    %c0_68 = arith.constant 0 : index
    %59 = vector.load %arg21[%c0_67, %c0_68] : memref<512x64xf32, #tpu.memory_space<vmem>>, vector<16x64xf32>
    tpu.vector_store %arg21[%c0_67, %c0_68], %58 {strides = array<i32>} : memref<512x64xf32, #tpu.memory_space<vmem>>, vector<16x64xf32>,
    %c0_69 = arith.constant 0 : index
    %c0_70 = arith.constant 0 : index
    %60 = tpu.strided_load %arg21[%c0_69, %c0_70] {strides = array<i32: 2, 1>} : memref<512x64xf32, #tpu.memory_space<vmem>>, vector<8x64xf32>
    %c1_71 = arith.constant 1 : index
    %c0_72 = arith.constant 0 : index
    %61 = tpu.strided_load %arg21[%c1_71, %c0_72] {strides = array<i32: 2, 1>} : memref<512x64xf32, #tpu.memory_space<vmem>>, vector<8x64xf32>
    %c0_73 = arith.constant 0 : index
    %c0_74 = arith.constant 0 : index
    %62 = vector.load %arg14[%c0_73, %c0_74] : memref<64x64xf32, #tpu.memory_space<vmem>>, vector<64x64xf32>
    %cst_75 = arith.constant dense<0.000000e+00> : vector<8x64xf32>
    %63 = tpu.matmul %60, %62, %cst_75 {dimension_numbers = #tpu.dot_dimension_numbers<[1], [0], [0], [1], [0, 0, 1, 1], [], []>} : vector<8x64xf32>, vector<64x64xf32>, vector<8x64xf32> -> vector<8x64xf32>
    %cst_76 = arith.constant dense<0.000000e+00> : vector<8x64xf32>
    %64 = tpu.matmul %61, %62, %cst_76 {dimension_numbers = #tpu.dot_dimension_numbers<[1], [0], [0], [1], [0, 0, 1, 1], [], []>} : vector<8x64xf32>, vector<64x64xf32>, vector<8x64xf32> -> vector<8x64xf32>
    %65 = arith.maximumf %63, %64 : vector<8x64xf32>
    %c0_77 = arith.constant 0 : index
    %c0_78 = arith.constant 0 : index
    %66 = vector.load %arg15[%c0_77, %c0_78] : memref<1x64xf32, #tpu.memory_space<vmem>>, vector<1x64xf32>
    %67 = vector.broadcast %66 : vector<1x64xf32> to vector<8x64xf32>
    %68 = arith.addf %65, %67 : vector<8x64xf32>
    %c0_79 = arith.constant 0 : index
    %c0_80 = arith.constant 0 : index
    %c0_81 = arith.constant 0 : index
    %69 = vector.load %arg17[%c0_79, %c0_80, %c0_81] : memref<6x1x64xf32, #tpu.memory_space<vmem>>, vector<1x1x64xf32>
    %70 = vector.shape_cast %69 : vector<1x1x64xf32> to vector<1x64xf32>
    %c1_82 = arith.constant 1 : index
    %c0_83 = arith.constant 0 : index
    %c0_84 = arith.constant 0 : index
    %71 = vector.load %arg17[%c1_82, %c0_83, %c0_84] : memref<6x1x64xf32, #tpu.memory_space<vmem>>, vector<1x1x64xf32>
    %72 = vector.shape_cast %71 : vector<1x1x64xf32> to vector<1x64xf32>
    %c2 = arith.constant 2 : index
    %c0_85 = arith.constant 0 : index
    %c0_86 = arith.constant 0 : index
    %73 = vector.load %arg17[%c2, %c0_85, %c0_86] : memref<6x1x64xf32, #tpu.memory_space<vmem>>, vector<1x1x64xf32>
    %74 = vector.shape_cast %73 : vector<1x1x64xf32> to vector<1x64xf32>
    %c3 = arith.constant 3 : index
    %c0_87 = arith.constant 0 : index
    %c0_88 = arith.constant 0 : index
    %75 = vector.load %arg17[%c3, %c0_87, %c0_88] : memref<6x1x64xf32, #tpu.memory_space<vmem>>, vector<1x1x64xf32>
    %76 = vector.shape_cast %75 : vector<1x1x64xf32> to vector<1x64xf32>
    %c4 = arith.constant 4 : index
    %c0_89 = arith.constant 0 : index
    %c0_90 = arith.constant 0 : index
    %77 = vector.load %arg17[%c4, %c0_89, %c0_90] : memref<6x1x64xf32, #tpu.memory_space<vmem>>, vector<1x1x64xf32>
    %78 = vector.shape_cast %77 : vector<1x1x64xf32> to vector<1x64xf32>
    %c5 = arith.constant 5 : index
    %c0_91 = arith.constant 0 : index
    %c0_92 = arith.constant 0 : index
    %79 = vector.load %arg17[%c5, %c0_91, %c0_92] : memref<6x1x64xf32, #tpu.memory_space<vmem>>, vector<1x1x64xf32>
    %80 = vector.shape_cast %79 : vector<1x1x64xf32> to vector<1x64xf32>
    %c0_93 = arith.constant 0 : index
    %c0_94 = arith.constant 0 : index
    %c0_95 = arith.constant 0 : index
    %81 = vector.load %arg16[%c0_93, %c0_94, %c0_95] : memref<2x64x64xf32, #tpu.memory_space<vmem>>, vector<1x64x64xf32>
    %82 = vector.shape_cast %81 : vector<1x64x64xf32> to vector<64x64xf32>
    %c1_96 = arith.constant 1 : index
    %c0_97 = arith.constant 0 : index
    %c0_98 = arith.constant 0 : index
    %83 = vector.load %arg16[%c1_96, %c0_97, %c0_98] : memref<2x64x64xf32, #tpu.memory_space<vmem>>, vector<1x64x64xf32>
    %84 = vector.shape_cast %83 : vector<1x64x64xf32> to vector<64x64xf32>
    %85 = vector.broadcast %70 : vector<1x64xf32> to vector<8x64xf32>
    %86 = arith.mulf %68, %85 : vector<8x64xf32>
    %87 = vector.broadcast %72 : vector<1x64xf32> to vector<8x64xf32>
    %88 = arith.addf %86, %87 : vector<8x64xf32>
    %cst_99 = arith.constant 0.000000e+00 : f32
    %89 = vector.broadcast %cst_99 : f32 to vector<8x64xf32>
    %90 = arith.maximumf %88, %89 : vector<8x64xf32>
    %cst_100 = arith.constant dense<0.000000e+00> : vector<8x64xf32>
    %91 = tpu.matmul %90, %82, %cst_100 {dimension_numbers = #tpu.dot_dimension_numbers<[1], [0], [0], [1], [0, 0, 1, 1], [], []>} : vector<8x64xf32>, vector<64x64xf32>, vector<8x64xf32> -> vector<8x64xf32>
    %92 = vector.broadcast %74 : vector<1x64xf32> to vector<8x64xf32>
    %93 = arith.addf %91, %92 : vector<8x64xf32>
    %94 = vector.broadcast %76 : vector<1x64xf32> to vector<8x64xf32>
    %95 = arith.mulf %93, %94 : vector<8x64xf32>
    %96 = vector.broadcast %78 : vector<1x64xf32> to vector<8x64xf32>
    %97 = arith.addf %95, %96 : vector<8x64xf32>
    %cst_101 = arith.constant 0.000000e+00 : f32
    %98 = vector.broadcast %cst_101 : f32 to vector<8x64xf32>
    %99 = arith.maximumf %97, %98 : vector<8x64xf32>
    %cst_102 = arith.constant dense<0.000000e+00> : vector<8x64xf32>
    %100 = tpu.matmul %99, %84, %cst_102 {dimension_numbers = #tpu.dot_dimension_numbers<[1], [0], [0], [1], [0, 0, 1, 1], [], []>} : vector<8x64xf32>, vector<64x64xf32>, vector<8x64xf32> -> vector<8x64xf32>
    %101 = vector.broadcast %80 : vector<1x64xf32> to vector<8x64xf32>
    %102 = arith.addf %100, %101 : vector<8x64xf32>
    %103 = arith.addf %102, %68 : vector<8x64xf32>
    %c0_103 = arith.constant 0 : index
    %c0_104 = arith.constant 0 : index
    %c0_105 = arith.constant 0 : index
    %104 = vector.load %arg19[%c0_103, %c0_104, %c0_105] : memref<6x1x64xf32, #tpu.memory_space<vmem>>, vector<1x1x64xf32>
    %105 = vector.shape_cast %104 : vector<1x1x64xf32> to vector<1x64xf32>
    %c1_106 = arith.constant 1 : index
    %c0_107 = arith.constant 0 : index
    %c0_108 = arith.constant 0 : index
    %106 = vector.load %arg19[%c1_106, %c0_107, %c0_108] : memref<6x1x64xf32, #tpu.memory_space<vmem>>, vector<1x1x64xf32>
    %107 = vector.shape_cast %106 : vector<1x1x64xf32> to vector<1x64xf32>
    %c2_109 = arith.constant 2 : index
    %c0_110 = arith.constant 0 : index
    %c0_111 = arith.constant 0 : index
    %108 = vector.load %arg19[%c2_109, %c0_110, %c0_111] : memref<6x1x64xf32, #tpu.memory_space<vmem>>, vector<1x1x64xf32>
    %109 = vector.shape_cast %108 : vector<1x1x64xf32> to vector<1x64xf32>
    %c3_112 = arith.constant 3 : index
    %c0_113 = arith.constant 0 : index
    %c0_114 = arith.constant 0 : index
    %110 = vector.load %arg19[%c3_112, %c0_113, %c0_114] : memref<6x1x64xf32, #tpu.memory_space<vmem>>, vector<1x1x64xf32>
    %111 = vector.shape_cast %110 : vector<1x1x64xf32> to vector<1x64xf32>
    %c4_115 = arith.constant 4 : index
    %c0_116 = arith.constant 0 : index
    %c0_117 = arith.constant 0 : index
    %112 = vector.load %arg19[%c4_115, %c0_116, %c0_117] : memref<6x1x64xf32, #tpu.memory_space<vmem>>, vector<1x1x64xf32>
    %113 = vector.shape_cast %112 : vector<1x1x64xf32> to vector<1x64xf32>
    %c5_118 = arith.constant 5 : index
    %c0_119 = arith.constant 0 : index
    %c0_120 = arith.constant 0 : index
    %114 = vector.load %arg19[%c5_118, %c0_119, %c0_120] : memref<6x1x64xf32, #tpu.memory_space<vmem>>, vector<1x1x64xf32>
    %115 = vector.shape_cast %114 : vector<1x1x64xf32> to vector<1x64xf32>
    %c0_121 = arith.constant 0 : index
    %c0_122 = arith.constant 0 : index
    %c0_123 = arith.constant 0 : index
    %116 = vector.load %arg18[%c0_121, %c0_122, %c0_123] : memref<2x64x64xf32, #tpu.memory_space<vmem>>, vector<1x64x64xf32>
    %117 = vector.shape_cast %116 : vector<1x64x64xf32> to vector<64x64xf32>
    %c1_124 = arith.constant 1 : index
    %c0_125 = arith.constant 0 : index
    %c0_126 = arith.constant 0 : index
    %118 = vector.load %arg18[%c1_124, %c0_125, %c0_126] : memref<2x64x64xf32, #tpu.memory_space<vmem>>, vector<1x64x64xf32>
    %119 = vector.shape_cast %118 : vector<1x64x64xf32> to vector<64x64xf32>
    %120 = vector.broadcast %105 : vector<1x64xf32> to vector<8x64xf32>
    %121 = arith.mulf %103, %120 : vector<8x64xf32>
    %122 = vector.broadcast %107 : vector<1x64xf32> to vector<8x64xf32>
    %123 = arith.addf %121, %122 : vector<8x64xf32>
    %cst_127 = arith.constant 0.000000e+00 : f32
    %124 = vector.broadcast %cst_127 : f32 to vector<8x64xf32>
    %125 = arith.maximumf %123, %124 : vector<8x64xf32>
    %cst_128 = arith.constant dense<0.000000e+00> : vector<8x64xf32>
    %126 = tpu.matmul %125, %117, %cst_128 {dimension_numbers = #tpu.dot_dimension_numbers<[1], [0], [0], [1], [0, 0, 1, 1], [], []>} : vector<8x64xf32>, vector<64x64xf32>, vector<8x64xf32> -> vector<8x64xf32>
    %127 = vector.broadcast %109 : vector<1x64xf32> to vector<8x64xf32>
    %128 = arith.addf %126, %127 : vector<8x64xf32>
    %129 = vector.broadcast %111 : vector<1x64xf32> to vector<8x64xf32>
    %130 = arith.mulf %128, %129 : vector<8x64xf32>
    %131 = vector.broadcast %113 : vector<1x64xf32> to vector<8x64xf32>
    %132 = arith.addf %130, %131 : vector<8x64xf32>
    %cst_129 = arith.constant 0.000000e+00 : f32
    %133 = vector.broadcast %cst_129 : f32 to vector<8x64xf32>
    %134 = arith.maximumf %132, %133 : vector<8x64xf32>
    %cst_130 = arith.constant dense<0.000000e+00> : vector<8x64xf32>
    %135 = tpu.matmul %134, %119, %cst_130 {dimension_numbers = #tpu.dot_dimension_numbers<[1], [0], [0], [1], [0, 0, 1, 1], [], []>} : vector<8x64xf32>, vector<64x64xf32>, vector<8x64xf32> -> vector<8x64xf32>
    %136 = vector.broadcast %115 : vector<1x64xf32> to vector<8x64xf32>
    %137 = arith.addf %135, %136 : vector<8x64xf32>
    %138 = arith.addf %137, %103 : vector<8x64xf32>
    %c0_131 = arith.constant 0 : index
    %c0_132 = arith.constant 0 : index
    %139 = vector.load %arg20[%c0_131, %c0_132] : memref<8x64xf32, #tpu.memory_space<vmem>>, vector<8x64xf32>
    tpu.vector_store %arg20[%c0_131, %c0_132], %138 {strides = array<i32>} : memref<8x64xf32, #tpu.memory_space<vmem>>, vector<8x64xf32>,
    return
  }
  func.func @transform_0(%arg0: i32) -> (i32, i32) {
    %c0_i32 = arith.constant 0 : i32
    %c0_i32_0 = arith.constant 0 : i32
    return %arg0, %c0_i32 : i32, i32
  }
  func.func @transform_1(%arg0: i32) -> (i32, i32) {
    %c0_i32 = arith.constant 0 : i32
    %c0_i32_0 = arith.constant 0 : i32
    %c0_i32_1 = arith.constant 0 : i32
    return %c0_i32, %c0_i32_0 : i32, i32
  }
  func.func @transform_2(%arg0: i32) -> (i32, i32) {
    %c0_i32 = arith.constant 0 : i32
    %c0_i32_0 = arith.constant 0 : i32
    %c0_i32_1 = arith.constant 0 : i32
    return %c0_i32, %c0_i32_0 : i32, i32
  }
  func.func @transform_3(%arg0: i32) -> (i32, i32) {
    %c0_i32 = arith.constant 0 : i32
    %c0_i32_0 = arith.constant 0 : i32
    %c0_i32_1 = arith.constant 0 : i32
    return %c0_i32, %c0_i32_0 : i32, i32
  }
  func.func @transform_4(%arg0: i32) -> (i32, i32) {
    %c0_i32 = arith.constant 0 : i32
    %c0_i32_0 = arith.constant 0 : i32
    %c0_i32_1 = arith.constant 0 : i32
    return %c0_i32, %c0_i32_0 : i32, i32
  }
  func.func @transform_5(%arg0: i32) -> (i32, i32) {
    %c0_i32 = arith.constant 0 : i32
    %c0_i32_0 = arith.constant 0 : i32
    %c0_i32_1 = arith.constant 0 : i32
    return %c0_i32, %c0_i32_0 : i32, i32
  }
  func.func @transform_6(%arg0: i32) -> (i32, i32) {
    %c0_i32 = arith.constant 0 : i32
    %c0_i32_0 = arith.constant 0 : i32
    %c0_i32_1 = arith.constant 0 : i32
    return %c0_i32, %c0_i32_0 : i32, i32
  }
  func.func @transform_7(%arg0: i32) -> (i32, i32) {
    %c0_i32 = arith.constant 0 : i32
    %c0_i32_0 = arith.constant 0 : i32
    %c0_i32_1 = arith.constant 0 : i32
    return %c0_i32, %c0_i32_0 : i32, i32
  }
  func.func @transform_8(%arg0: i32) -> (i32, i32) {
    %c0_i32 = arith.constant 0 : i32
    %c0_i32_0 = arith.constant 0 : i32
    %c0_i32_1 = arith.constant 0 : i32
    return %c0_i32, %c0_i32_0 : i32, i32
  }
  func.func @transform_9(%arg0: i32) -> (i32, i32) {
    %c0_i32 = arith.constant 0 : i32
    %c0_i32_0 = arith.constant 0 : i32
    %c0_i32_1 = arith.constant 0 : i32
    return %c0_i32, %c0_i32_0 : i32, i32
  }
  func.func @transform_10(%arg0: i32) -> (i32, i32) {
    %c0_i32 = arith.constant 0 : i32
    %c0_i32_0 = arith.constant 0 : i32
    %c0_i32_1 = arith.constant 0 : i32
    return %c0_i32, %c0_i32_0 : i32, i32
  }
  func.func @transform_11(%arg0: i32) -> (i32, i32) {
    %c0_i32 = arith.constant 0 : i32
    %c0_i32_0 = arith.constant 0 : i32
    %c0_i32_1 = arith.constant 0 : i32
    return %c0_i32, %c0_i32_0 : i32, i32
  }
  func.func @transform_12(%arg0: i32) -> (i32, i32) {
    %c0_i32 = arith.constant 0 : i32
    %c0_i32_0 = arith.constant 0 : i32
    %c0_i32_1 = arith.constant 0 : i32
    return %c0_i32, %c0_i32_0 : i32, i32
  }
  func.func @transform_13(%arg0: i32) -> (i32, i32) {
    %c0_i32 = arith.constant 0 : i32
    %c0_i32_0 = arith.constant 0 : i32
    %c0_i32_1 = arith.constant 0 : i32
    return %c0_i32, %c0_i32_0 : i32, i32
  }
  func.func @transform_14(%arg0: i32) -> (i32, i32) {
    %c0_i32 = arith.constant 0 : i32
    %c0_i32_0 = arith.constant 0 : i32
    %c0_i32_1 = arith.constant 0 : i32
    return %c0_i32, %c0_i32_0 : i32, i32
  }
  func.func @transform_15(%arg0: i32) -> (i32, i32, i32) {
    %c0_i32 = arith.constant 0 : i32
    %c0_i32_0 = arith.constant 0 : i32
    %c0_i32_1 = arith.constant 0 : i32
    %c0_i32_2 = arith.constant 0 : i32
    return %c0_i32, %c0_i32_0, %c0_i32_1 : i32, i32, i32
  }
  func.func @transform_16(%arg0: i32) -> (i32, i32, i32) {
    %c0_i32 = arith.constant 0 : i32
    %c0_i32_0 = arith.constant 0 : i32
    %c0_i32_1 = arith.constant 0 : i32
    %c0_i32_2 = arith.constant 0 : i32
    return %c0_i32, %c0_i32_0, %c0_i32_1 : i32, i32, i32
  }
  func.func @transform_17(%arg0: i32) -> (i32, i32, i32) {
    %c0_i32 = arith.constant 0 : i32
    %c0_i32_0 = arith.constant 0 : i32
    %c0_i32_1 = arith.constant 0 : i32
    %c0_i32_2 = arith.constant 0 : i32
    return %c0_i32, %c0_i32_0, %c0_i32_1 : i32, i32, i32
  }
  func.func @transform_18(%arg0: i32) -> (i32, i32, i32) {
    %c0_i32 = arith.constant 0 : i32
    %c0_i32_0 = arith.constant 0 : i32
    %c0_i32_1 = arith.constant 0 : i32
    %c0_i32_2 = arith.constant 0 : i32
    return %c0_i32, %c0_i32_0, %c0_i32_1 : i32, i32, i32
  }
  func.func @transform_19(%arg0: i32) -> (i32, i32) {
    %c0_i32 = arith.constant 0 : i32
    %c0_i32_0 = arith.constant 0 : i32
    return %arg0, %c0_i32 : i32, i32
  }
}

module attributes {stable_mosaic.version = 11 : i64} {
  func.func @kernel(%arg0: memref<16x64xf32, #tpu.memory_space<vmem>>, %arg1: memref<64x128xf32, #tpu.memory_space<vmem>>, %arg2: memref<32x128xf32, #tpu.memory_space<vmem>>, %arg3: memref<1x128xf32, #tpu.memory_space<vmem>>, %arg4: memref<32x16xf32, #tpu.memory_space<vmem>>, %arg5: memref<1x16xf32, #tpu.memory_space<vmem>>, %arg6: memref<5x16x16xf32, #tpu.memory_space<vmem>>, %arg7: memref<9x1x16xf32, #tpu.memory_space<vmem>>, %arg8: memref<5x16x16xf32, #tpu.memory_space<vmem>>, %arg9: memref<9x1x16xf32, #tpu.memory_space<vmem>>, %arg10: memref<16x64xf32, #tpu.memory_space<vmem>>, %arg11: memref<16x64xf32, #tpu.memory_space<vmem>>, %arg12: memref<1x64xf32, #tpu.memory_space<vmem>>, %arg13: memref<16x64xf32, #tpu.memory_space<vmem>>, %arg14: memref<16x64xf32, #tpu.memory_space<vmem>>, %arg15: memref<1x64xf32, #tpu.memory_space<vmem>>, %arg16: memref<16x16xf32, #tpu.memory_space<vmem>>, %arg17: memref<16x128xf32, #tpu.memory_space<vmem>>, %arg18: memref<16x32xf32, #tpu.memory_space<vmem>>, %arg19: memref<16x64xf32, #tpu.memory_space<vmem>>) attributes {dimension_semantics = [], scalar_prefetch = 0 : i64, scratch_operands = 3 : i64, tpu.core_type = #tpu.core_type<tc>} {
    %c0 = arith.constant 0 : index
    %c0_0 = arith.constant 0 : index
    %0 = vector.load %arg0[%c0, %c0_0] : memref<16x64xf32, #tpu.memory_space<vmem>>, vector<16x64xf32>
    %c0_1 = arith.constant 0 : index
    %c0_2 = arith.constant 0 : index
    %1 = vector.load %arg1[%c0_1, %c0_2] : memref<64x128xf32, #tpu.memory_space<vmem>>, vector<64x128xf32>
    %cst = arith.constant dense<0.000000e+00> : vector<16x128xf32>
    %2 = tpu.matmul %0, %1, %cst {dimension_numbers = #tpu.dot_dimension_numbers<[1], [0], [0], [1], [0, 0, 1, 1], [], []>} : vector<16x64xf32>, vector<64x128xf32>, vector<16x128xf32> -> vector<16x128xf32>
    %c0_3 = arith.constant 0 : index
    %c0_4 = arith.constant 0 : index
    %3 = vector.load %arg3[%c0_3, %c0_4] : memref<1x128xf32, #tpu.memory_space<vmem>>, vector<1x128xf32>
    %4 = vector.broadcast %3 : vector<1x128xf32> to vector<16x128xf32>
    %5 = arith.addf %2, %4 : vector<16x128xf32>
    %c0_5 = arith.constant 0 : index
    %c0_6 = arith.constant 0 : index
    %6 = vector.load %arg17[%c0_5, %c0_6] : memref<16x128xf32, #tpu.memory_space<vmem>>, vector<16x128xf32>
    tpu.vector_store %arg17[%c0_5, %c0_6], %5 {strides = array<i32>} : memref<16x128xf32, #tpu.memory_space<vmem>>, vector<16x128xf32>,
    %c0_7 = arith.constant 0 : index
    %c0_8 = arith.constant 0 : index
    %7 = vector.load %arg2[%c0_7, %c0_8] : memref<32x128xf32, #tpu.memory_space<vmem>>, vector<32x128xf32>
    %cst_9 = arith.constant 0.000000e+00 : f32
    %8 = vector.broadcast %cst_9 : f32 to vector<8x32xf32>
    %c0_i32 = arith.constant 0 : i32
    %c2_i32 = arith.constant 2 : i32
    %9 = arith.addi %c0_i32, %c2_i32 : i32
    %c1_i32 = arith.constant 1 : i32
    %10:2 = scf.for %arg20 = %c0_i32 to %9 step %c1_i32 iter_args(%arg21 = %8, %arg22 = %8) -> (vector<8x32xf32>, vector<8x32xf32>)  : i32 {
      %c8_i32 = arith.constant 8 : i32
      %226 = arith.muli %arg20, %c8_i32 : i32
      %227 = tpu.assume_multiple %226, 8 : i32
      %228 = arith.index_cast %227 : i32 to index
      %c0_175 = arith.constant 0 : index
      %229 = vector.load %arg17[%228, %c0_175] : memref<16x128xf32, #tpu.memory_space<vmem>>, vector<8x128xf32>
      %cst_176 = arith.constant dense<0.000000e+00> : vector<8x128xf32>
      %230 = tpu.matmul %arg21, %7, %cst_176 {dimension_numbers = #tpu.dot_dimension_numbers<[1], [0], [0], [1], [0, 0, 1, 1], [], []>} : vector<8x32xf32>, vector<32x128xf32>, vector<8x128xf32> -> vector<8x128xf32>
      %231 = arith.addf %229, %230 : vector<8x128xf32>
      %232 = vector.extract_strided_slice %231 {offsets = [0, 0], sizes = [8, 64], strides = [1, 1]} : vector<8x128xf32> to vector<8x64xf32>
      %233 = arith.negf %232 : vector<8x64xf32>
      %234 = math.exp %233 : vector<8x64xf32>
      %cst_177 = arith.constant 1.000000e+00 : f32
      %235 = vector.broadcast %cst_177 : f32 to vector<8x64xf32>
      %236 = arith.addf %235, %234 : vector<8x64xf32>
      %237 = arith.divf %235, %236 : vector<8x64xf32>
      %238 = vector.extract_strided_slice %231 {offsets = [0, 64], sizes = [8, 32], strides = [1, 1]} : vector<8x128xf32> to vector<8x32xf32>
      %239 = math.tanh %238 : vector<8x32xf32>
      %240 = vector.extract_strided_slice %231 {offsets = [0, 96], sizes = [8, 32], strides = [1, 1]} : vector<8x128xf32> to vector<8x32xf32>
      %241 = arith.negf %240 : vector<8x32xf32>
      %242 = math.exp %241 : vector<8x32xf32>
      %cst_178 = arith.constant 1.000000e+00 : f32
      %243 = vector.broadcast %cst_178 : f32 to vector<8x32xf32>
      %244 = arith.addf %243, %242 : vector<8x32xf32>
      %245 = arith.divf %243, %244 : vector<8x32xf32>
      %246 = vector.extract_strided_slice %237 {offsets = [0, 32], sizes = [8, 32], strides = [1, 1]} : vector<8x64xf32> to vector<8x32xf32>
      %247 = arith.mulf %246, %arg22 : vector<8x32xf32>
      %248 = vector.extract_strided_slice %237 {offsets = [0, 0], sizes = [8, 32], strides = [1, 1]} : vector<8x64xf32> to vector<8x32xf32>
      %249 = arith.mulf %248, %239 : vector<8x32xf32>
      %250 = arith.addf %247, %249 : vector<8x32xf32>
      %251 = math.tanh %250 : vector<8x32xf32>
      %252 = arith.mulf %245, %251 : vector<8x32xf32>
      %253 = arith.index_cast %227 : i32 to index
      %c0_179 = arith.constant 0 : index
      %254 = vector.load %arg18[%253, %c0_179] : memref<16x32xf32, #tpu.memory_space<vmem>>, vector<8x32xf32>
      tpu.vector_store %arg18[%253, %c0_179], %252 {strides = array<i32>} : memref<16x32xf32, #tpu.memory_space<vmem>>, vector<8x32xf32>,
      scf.yield %252, %250 : vector<8x32xf32>, vector<8x32xf32>
    }
    %c2_i32_10 = arith.constant 2 : i32
    %c0_11 = arith.constant 0 : index
    %c0_12 = arith.constant 0 : index
    %11 = vector.load %arg18[%c0_11, %c0_12] : memref<16x32xf32, #tpu.memory_space<vmem>>, vector<16x32xf32>
    %c0_13 = arith.constant 0 : index
    %c0_14 = arith.constant 0 : index
    %12 = vector.load %arg4[%c0_13, %c0_14] : memref<32x16xf32, #tpu.memory_space<vmem>>, vector<32x16xf32>
    %cst_15 = arith.constant dense<0.000000e+00> : vector<16x16xf32>
    %13 = tpu.matmul %11, %12, %cst_15 {dimension_numbers = #tpu.dot_dimension_numbers<[1], [0], [0], [1], [0, 0, 1, 1], [], []>} : vector<16x32xf32>, vector<32x16xf32>, vector<16x16xf32> -> vector<16x16xf32>
    %c0_16 = arith.constant 0 : index
    %c0_17 = arith.constant 0 : index
    %14 = vector.load %arg5[%c0_16, %c0_17] : memref<1x16xf32, #tpu.memory_space<vmem>>, vector<1x16xf32>
    %15 = vector.broadcast %14 : vector<1x16xf32> to vector<16x16xf32>
    %16 = arith.addf %13, %15 : vector<16x16xf32>
    %c0_18 = arith.constant 0 : index
    %c0_19 = arith.constant 0 : index
    %c0_20 = arith.constant 0 : index
    %17 = vector.load %arg6[%c0_18, %c0_19, %c0_20] : memref<5x16x16xf32, #tpu.memory_space<vmem>>, vector<1x16x16xf32>
    %18 = vector.shape_cast %17 : vector<1x16x16xf32> to vector<16x16xf32>
    %c1 = arith.constant 1 : index
    %c0_21 = arith.constant 0 : index
    %c0_22 = arith.constant 0 : index
    %19 = vector.load %arg6[%c1, %c0_21, %c0_22] : memref<5x16x16xf32, #tpu.memory_space<vmem>>, vector<1x16x16xf32>
    %20 = vector.shape_cast %19 : vector<1x16x16xf32> to vector<16x16xf32>
    %c2 = arith.constant 2 : index
    %c0_23 = arith.constant 0 : index
    %c0_24 = arith.constant 0 : index
    %21 = vector.load %arg6[%c2, %c0_23, %c0_24] : memref<5x16x16xf32, #tpu.memory_space<vmem>>, vector<1x16x16xf32>
    %22 = vector.shape_cast %21 : vector<1x16x16xf32> to vector<16x16xf32>
    %c3 = arith.constant 3 : index
    %c0_25 = arith.constant 0 : index
    %c0_26 = arith.constant 0 : index
    %23 = vector.load %arg6[%c3, %c0_25, %c0_26] : memref<5x16x16xf32, #tpu.memory_space<vmem>>, vector<1x16x16xf32>
    %24 = vector.shape_cast %23 : vector<1x16x16xf32> to vector<16x16xf32>
    %c4 = arith.constant 4 : index
    %c0_27 = arith.constant 0 : index
    %c0_28 = arith.constant 0 : index
    %25 = vector.load %arg6[%c4, %c0_27, %c0_28] : memref<5x16x16xf32, #tpu.memory_space<vmem>>, vector<1x16x16xf32>
    %26 = vector.shape_cast %25 : vector<1x16x16xf32> to vector<16x16xf32>
    %c0_29 = arith.constant 0 : index
    %c0_30 = arith.constant 0 : index
    %c0_31 = arith.constant 0 : index
    %27 = vector.load %arg7[%c0_29, %c0_30, %c0_31] : memref<9x1x16xf32, #tpu.memory_space<vmem>>, vector<1x1x16xf32>
    %28 = vector.shape_cast %27 : vector<1x1x16xf32> to vector<1x16xf32>
    %c1_32 = arith.constant 1 : index
    %c0_33 = arith.constant 0 : index
    %c0_34 = arith.constant 0 : index
    %29 = vector.load %arg7[%c1_32, %c0_33, %c0_34] : memref<9x1x16xf32, #tpu.memory_space<vmem>>, vector<1x1x16xf32>
    %30 = vector.shape_cast %29 : vector<1x1x16xf32> to vector<1x16xf32>
    %c2_35 = arith.constant 2 : index
    %c0_36 = arith.constant 0 : index
    %c0_37 = arith.constant 0 : index
    %31 = vector.load %arg7[%c2_35, %c0_36, %c0_37] : memref<9x1x16xf32, #tpu.memory_space<vmem>>, vector<1x1x16xf32>
    %32 = vector.shape_cast %31 : vector<1x1x16xf32> to vector<1x16xf32>
    %c3_38 = arith.constant 3 : index
    %c0_39 = arith.constant 0 : index
    %c0_40 = arith.constant 0 : index
    %33 = vector.load %arg7[%c3_38, %c0_39, %c0_40] : memref<9x1x16xf32, #tpu.memory_space<vmem>>, vector<1x1x16xf32>
    %34 = vector.shape_cast %33 : vector<1x1x16xf32> to vector<1x16xf32>
    %c4_41 = arith.constant 4 : index
    %c0_42 = arith.constant 0 : index
    %c0_43 = arith.constant 0 : index
    %35 = vector.load %arg7[%c4_41, %c0_42, %c0_43] : memref<9x1x16xf32, #tpu.memory_space<vmem>>, vector<1x1x16xf32>
    %36 = vector.shape_cast %35 : vector<1x1x16xf32> to vector<1x16xf32>
    %c5 = arith.constant 5 : index
    %c0_44 = arith.constant 0 : index
    %c0_45 = arith.constant 0 : index
    %37 = vector.load %arg7[%c5, %c0_44, %c0_45] : memref<9x1x16xf32, #tpu.memory_space<vmem>>, vector<1x1x16xf32>
    %38 = vector.shape_cast %37 : vector<1x1x16xf32> to vector<1x16xf32>
    %c6 = arith.constant 6 : index
    %c0_46 = arith.constant 0 : index
    %c0_47 = arith.constant 0 : index
    %39 = vector.load %arg7[%c6, %c0_46, %c0_47] : memref<9x1x16xf32, #tpu.memory_space<vmem>>, vector<1x1x16xf32>
    %40 = vector.shape_cast %39 : vector<1x1x16xf32> to vector<1x16xf32>
    %c7 = arith.constant 7 : index
    %c0_48 = arith.constant 0 : index
    %c0_49 = arith.constant 0 : index
    %41 = vector.load %arg7[%c7, %c0_48, %c0_49] : memref<9x1x16xf32, #tpu.memory_space<vmem>>, vector<1x1x16xf32>
    %42 = vector.shape_cast %41 : vector<1x1x16xf32> to vector<1x16xf32>
    %c8 = arith.constant 8 : index
    %c0_50 = arith.constant 0 : index
    %c0_51 = arith.constant 0 : index
    %43 = vector.load %arg7[%c8, %c0_50, %c0_51] : memref<9x1x16xf32, #tpu.memory_space<vmem>>, vector<1x1x16xf32>
    %44 = vector.shape_cast %43 : vector<1x1x16xf32> to vector<1x16xf32>
    %cst_52 = arith.constant dense<0.000000e+00> : vector<16x16xf32>
    %45 = tpu.matmul %16, %18, %cst_52 {dimension_numbers = #tpu.dot_dimension_numbers<[1], [0], [0], [1], [0, 0, 1, 1], [], []>} : vector<16x16xf32>, vector<16x16xf32>, vector<16x16xf32> -> vector<16x16xf32>
    %46 = vector.broadcast %28 : vector<1x16xf32> to vector<16x16xf32>
    %47 = arith.addf %45, %46 : vector<16x16xf32>
    %c0_53 = arith.constant 0 : index
    %c0_54 = arith.constant 0 : index
    %48 = vector.load %arg19[%c0_53, %c0_54] : memref<16x64xf32, #tpu.memory_space<vmem>>, vector<16x16xf32>
    tpu.vector_store %arg19[%c0_53, %c0_54], %47 {strides = array<i32>} : memref<16x64xf32, #tpu.memory_space<vmem>>, vector<16x16xf32>,
    %cst_55 = arith.constant dense<0.000000e+00> : vector<16x16xf32>
    %49 = tpu.matmul %16, %20, %cst_55 {dimension_numbers = #tpu.dot_dimension_numbers<[1], [0], [0], [1], [0, 0, 1, 1], [], []>} : vector<16x16xf32>, vector<16x16xf32>, vector<16x16xf32> -> vector<16x16xf32>
    %50 = vector.broadcast %30 : vector<1x16xf32> to vector<16x16xf32>
    %51 = arith.addf %49, %50 : vector<16x16xf32>
    %c0_56 = arith.constant 0 : index
    %c16 = arith.constant 16 : index
    %52 = vector.load %arg19[%c0_56, %c16] : memref<16x64xf32, #tpu.memory_space<vmem>>, vector<16x16xf32>
    tpu.vector_store %arg19[%c0_56, %c16], %51 {strides = array<i32>} : memref<16x64xf32, #tpu.memory_space<vmem>>, vector<16x16xf32>,
    %cst_57 = arith.constant dense<0.000000e+00> : vector<16x16xf32>
    %53 = tpu.matmul %16, %22, %cst_57 {dimension_numbers = #tpu.dot_dimension_numbers<[1], [0], [0], [1], [0, 0, 1, 1], [], []>} : vector<16x16xf32>, vector<16x16xf32>, vector<16x16xf32> -> vector<16x16xf32>
    %54 = vector.broadcast %32 : vector<1x16xf32> to vector<16x16xf32>
    %55 = arith.addf %53, %54 : vector<16x16xf32>
    %c0_58 = arith.constant 0 : index
    %c32 = arith.constant 32 : index
    %56 = vector.load %arg19[%c0_58, %c32] : memref<16x64xf32, #tpu.memory_space<vmem>>, vector<16x16xf32>
    tpu.vector_store %arg19[%c0_58, %c32], %55 {strides = array<i32>} : memref<16x64xf32, #tpu.memory_space<vmem>>, vector<16x16xf32>,
    %c0_i32_59 = arith.constant 0 : i32
    %c2_i32_60 = arith.constant 2 : i32
    %57 = arith.addi %c0_i32_59, %c2_i32_60 : i32
    %c1_i32_61 = arith.constant 1 : i32
    scf.for %arg20 = %c0_i32_59 to %57 step %c1_i32_61  : i32 {
      %c8_i32 = arith.constant 8 : i32
      %226 = arith.muli %arg20, %c8_i32 : i32
      %227 = tpu.assume_multiple %226, 8 : i32
      %228 = arith.index_cast %227 : i32 to index
      %c0_175 = arith.constant 0 : index
      %229 = vector.load %arg19[%228, %c0_175] : memref<16x64xf32, #tpu.memory_space<vmem>>, vector<8x16xf32>
      %230 = arith.index_cast %227 : i32 to index
      %c16_176 = arith.constant 16 : index
      %231 = vector.load %arg19[%230, %c16_176] : memref<16x64xf32, #tpu.memory_space<vmem>>, vector<8x16xf32>
      %232 = arith.index_cast %227 : i32 to index
      %c32_177 = arith.constant 32 : index
      %233 = vector.load %arg19[%232, %c32_177] : memref<16x64xf32, #tpu.memory_space<vmem>>, vector<8x16xf32>
      "tpu.trace_start"() <{level = 10 : i32, message = "qd,kd->qk"}> : () -> ()
      %cst_178 = arith.constant dense<0.000000e+00> : vector<8x8xf32>
      %234 = tpu.matmul %229, %231, %cst_178 {dimension_numbers = #tpu.dot_dimension_numbers<[1], [1], [0], [0], [0, 0, 1, 0], [], []>} : vector<8x16xf32>, vector<8x16xf32>, vector<8x8xf32> -> vector<8x8xf32>
      "tpu.trace_stop"() : () -> ()
      %cst_179 = arith.constant 2.500000e-01 : f32
      %235 = vector.broadcast %cst_179 : f32 to vector<8x8xf32>
      %236 = arith.mulf %234, %235 : vector<8x8xf32>
      %cst_180 = arith.constant dense<0xFF800000> : vector<8xf32>
      %237 = vector.multi_reduction <maximumf>, %236, %cst_180 [1] : vector<8x8xf32> to vector<8xf32>
      %238 = vector.shape_cast %237 : vector<8xf32> to vector<8x1xf32>
      %239 = vector.broadcast %238 : vector<8x1xf32> to vector<8x8xf32>
      %240 = arith.subf %236, %239 : vector<8x8xf32>
      %241 = math.exp %240 : vector<8x8xf32>
      %cst_181 = arith.constant dense<0.000000e+00> : vector<8xf32>
      %242 = vector.multi_reduction <add>, %241, %cst_181 [1] : vector<8x8xf32> to vector<8xf32>
      %243 = vector.shape_cast %242 : vector<8xf32> to vector<8x1xf32>
      %244 = tpu.reciprocal %243 {approx = true} : vector<8x1xf32> -> vector<8x1xf32>
      %245 = vector.broadcast %244 : vector<8x1xf32> to vector<8x8xf32>
      %246 = arith.mulf %241, %245 : vector<8x8xf32>
      %cst_182 = arith.constant dense<0.000000e+00> : vector<8x16xf32>
      %247 = tpu.matmul %246, %233, %cst_182 {dimension_numbers = #tpu.dot_dimension_numbers<[1], [0], [0], [1], [0, 0, 1, 1], [], []>} : vector<8x8xf32>, vector<8x16xf32>, vector<8x16xf32> -> vector<8x16xf32>
      %248 = arith.index_cast %227 : i32 to index
      %c48_183 = arith.constant 48 : index
      %249 = vector.load %arg19[%248, %c48_183] : memref<16x64xf32, #tpu.memory_space<vmem>>, vector<8x16xf32>
      tpu.vector_store %arg19[%248, %c48_183], %247 {strides = array<i32>} : memref<16x64xf32, #tpu.memory_space<vmem>>, vector<8x16xf32>,
    }
    %c2_i32_62 = arith.constant 2 : i32
    %c0_63 = arith.constant 0 : index
    %c48 = arith.constant 48 : index
    %58 = vector.load %arg19[%c0_63, %c48] : memref<16x64xf32, #tpu.memory_space<vmem>>, vector<16x16xf32>
    %cst_64 = arith.constant dense<0.000000e+00> : vector<16x16xf32>
    %59 = tpu.matmul %58, %24, %cst_64 {dimension_numbers = #tpu.dot_dimension_numbers<[1], [0], [0], [1], [0, 0, 1, 1], [], []>} : vector<16x16xf32>, vector<16x16xf32>, vector<16x16xf32> -> vector<16x16xf32>
    %60 = vector.broadcast %34 : vector<1x16xf32> to vector<16x16xf32>
    %61 = arith.addf %59, %60 : vector<16x16xf32>
    %62 = arith.addf %61, %16 : vector<16x16xf32>
    %cst_65 = arith.constant dense<0.000000e+00> : vector<16xf32>
    %63 = vector.multi_reduction <add>, %62, %cst_65 [1] : vector<16x16xf32> to vector<16xf32>
    %64 = vector.shape_cast %63 : vector<16xf32> to vector<16x1xf32>
    %cst_66 = arith.constant 1.600000e+01 : f32
    %65 = vector.broadcast %cst_66 : f32 to vector<16x1xf32>
    %66 = arith.divf %64, %65 : vector<16x1xf32>
    %67 = vector.broadcast %66 : vector<16x1xf32> to vector<16x16xf32>
    %68 = arith.subf %62, %67 : vector<16x16xf32>
    %69 = arith.mulf %68, %68 : vector<16x16xf32>
    %cst_67 = arith.constant dense<0.000000e+00> : vector<16xf32>
    %70 = vector.multi_reduction <add>, %69, %cst_67 [1] : vector<16x16xf32> to vector<16xf32>
    %71 = vector.shape_cast %70 : vector<16xf32> to vector<16x1xf32>
    %cst_68 = arith.constant 1.600000e+01 : f32
    %72 = vector.broadcast %cst_68 : f32 to vector<16x1xf32>
    %73 = arith.divf %71, %72 : vector<16x1xf32>
    %74 = vector.broadcast %66 : vector<16x1xf32> to vector<16x16xf32>
    %75 = arith.subf %62, %74 : vector<16x16xf32>
    %cst_69 = arith.constant 9.99999974E-6 : f32
    %76 = vector.broadcast %cst_69 : f32 to vector<16x1xf32>
    %77 = arith.addf %73, %76 : vector<16x1xf32>
    %78 = math.rsqrt %77 : vector<16x1xf32>
    %79 = vector.broadcast %78 : vector<16x1xf32> to vector<16x16xf32>
    %80 = arith.mulf %75, %79 : vector<16x16xf32>
    %81 = vector.broadcast %36 : vector<1x16xf32> to vector<16x16xf32>
    %82 = arith.mulf %80, %81 : vector<16x16xf32>
    %83 = vector.broadcast %38 : vector<1x16xf32> to vector<16x16xf32>
    %84 = arith.addf %82, %83 : vector<16x16xf32>
    %cst_70 = arith.constant dense<0.000000e+00> : vector<16x16xf32>
    %85 = tpu.matmul %84, %26, %cst_70 {dimension_numbers = #tpu.dot_dimension_numbers<[1], [0], [0], [1], [0, 0, 1, 1], [], []>} : vector<16x16xf32>, vector<16x16xf32>, vector<16x16xf32> -> vector<16x16xf32>
    %86 = vector.broadcast %40 : vector<1x16xf32> to vector<16x16xf32>
    %87 = arith.addf %85, %86 : vector<16x16xf32>
    %88 = arith.addf %87, %84 : vector<16x16xf32>
    %cst_71 = arith.constant dense<0.000000e+00> : vector<16xf32>
    %89 = vector.multi_reduction <add>, %88, %cst_71 [1] : vector<16x16xf32> to vector<16xf32>
    %90 = vector.shape_cast %89 : vector<16xf32> to vector<16x1xf32>
    %cst_72 = arith.constant 1.600000e+01 : f32
    %91 = vector.broadcast %cst_72 : f32 to vector<16x1xf32>
    %92 = arith.divf %90, %91 : vector<16x1xf32>
    %93 = vector.broadcast %92 : vector<16x1xf32> to vector<16x16xf32>
    %94 = arith.subf %88, %93 : vector<16x16xf32>
    %95 = arith.mulf %94, %94 : vector<16x16xf32>
    %cst_73 = arith.constant dense<0.000000e+00> : vector<16xf32>
    %96 = vector.multi_reduction <add>, %95, %cst_73 [1] : vector<16x16xf32> to vector<16xf32>
    %97 = vector.shape_cast %96 : vector<16xf32> to vector<16x1xf32>
    %cst_74 = arith.constant 1.600000e+01 : f32
    %98 = vector.broadcast %cst_74 : f32 to vector<16x1xf32>
    %99 = arith.divf %97, %98 : vector<16x1xf32>
    %100 = vector.broadcast %92 : vector<16x1xf32> to vector<16x16xf32>
    %101 = arith.subf %88, %100 : vector<16x16xf32>
    %cst_75 = arith.constant 9.99999974E-6 : f32
    %102 = vector.broadcast %cst_75 : f32 to vector<16x1xf32>
    %103 = arith.addf %99, %102 : vector<16x1xf32>
    %104 = math.rsqrt %103 : vector<16x1xf32>
    %105 = vector.broadcast %104 : vector<16x1xf32> to vector<16x16xf32>
    %106 = arith.mulf %101, %105 : vector<16x16xf32>
    %107 = vector.broadcast %42 : vector<1x16xf32> to vector<16x16xf32>
    %108 = arith.mulf %106, %107 : vector<16x16xf32>
    %109 = vector.broadcast %44 : vector<1x16xf32> to vector<16x16xf32>
    %110 = arith.addf %108, %109 : vector<16x16xf32>
    %c0_76 = arith.constant 0 : index
    %c0_77 = arith.constant 0 : index
    %c0_78 = arith.constant 0 : index
    %111 = vector.load %arg8[%c0_76, %c0_77, %c0_78] : memref<5x16x16xf32, #tpu.memory_space<vmem>>, vector<1x16x16xf32>
    %112 = vector.shape_cast %111 : vector<1x16x16xf32> to vector<16x16xf32>
    %c1_79 = arith.constant 1 : index
    %c0_80 = arith.constant 0 : index
    %c0_81 = arith.constant 0 : index
    %113 = vector.load %arg8[%c1_79, %c0_80, %c0_81] : memref<5x16x16xf32, #tpu.memory_space<vmem>>, vector<1x16x16xf32>
    %114 = vector.shape_cast %113 : vector<1x16x16xf32> to vector<16x16xf32>
    %c2_82 = arith.constant 2 : index
    %c0_83 = arith.constant 0 : index
    %c0_84 = arith.constant 0 : index
    %115 = vector.load %arg8[%c2_82, %c0_83, %c0_84] : memref<5x16x16xf32, #tpu.memory_space<vmem>>, vector<1x16x16xf32>
    %116 = vector.shape_cast %115 : vector<1x16x16xf32> to vector<16x16xf32>
    %c3_85 = arith.constant 3 : index
    %c0_86 = arith.constant 0 : index
    %c0_87 = arith.constant 0 : index
    %117 = vector.load %arg8[%c3_85, %c0_86, %c0_87] : memref<5x16x16xf32, #tpu.memory_space<vmem>>, vector<1x16x16xf32>
    %118 = vector.shape_cast %117 : vector<1x16x16xf32> to vector<16x16xf32>
    %c4_88 = arith.constant 4 : index
    %c0_89 = arith.constant 0 : index
    %c0_90 = arith.constant 0 : index
    %119 = vector.load %arg8[%c4_88, %c0_89, %c0_90] : memref<5x16x16xf32, #tpu.memory_space<vmem>>, vector<1x16x16xf32>
    %120 = vector.shape_cast %119 : vector<1x16x16xf32> to vector<16x16xf32>
    %c0_91 = arith.constant 0 : index
    %c0_92 = arith.constant 0 : index
    %c0_93 = arith.constant 0 : index
    %121 = vector.load %arg9[%c0_91, %c0_92, %c0_93] : memref<9x1x16xf32, #tpu.memory_space<vmem>>, vector<1x1x16xf32>
    %122 = vector.shape_cast %121 : vector<1x1x16xf32> to vector<1x16xf32>
    %c1_94 = arith.constant 1 : index
    %c0_95 = arith.constant 0 : index
    %c0_96 = arith.constant 0 : index
    %123 = vector.load %arg9[%c1_94, %c0_95, %c0_96] : memref<9x1x16xf32, #tpu.memory_space<vmem>>, vector<1x1x16xf32>
    %124 = vector.shape_cast %123 : vector<1x1x16xf32> to vector<1x16xf32>
    %c2_97 = arith.constant 2 : index
    %c0_98 = arith.constant 0 : index
    %c0_99 = arith.constant 0 : index
    %125 = vector.load %arg9[%c2_97, %c0_98, %c0_99] : memref<9x1x16xf32, #tpu.memory_space<vmem>>, vector<1x1x16xf32>
    %126 = vector.shape_cast %125 : vector<1x1x16xf32> to vector<1x16xf32>
    %c3_100 = arith.constant 3 : index
    %c0_101 = arith.constant 0 : index
    %c0_102 = arith.constant 0 : index
    %127 = vector.load %arg9[%c3_100, %c0_101, %c0_102] : memref<9x1x16xf32, #tpu.memory_space<vmem>>, vector<1x1x16xf32>
    %128 = vector.shape_cast %127 : vector<1x1x16xf32> to vector<1x16xf32>
    %c4_103 = arith.constant 4 : index
    %c0_104 = arith.constant 0 : index
    %c0_105 = arith.constant 0 : index
    %129 = vector.load %arg9[%c4_103, %c0_104, %c0_105] : memref<9x1x16xf32, #tpu.memory_space<vmem>>, vector<1x1x16xf32>
    %130 = vector.shape_cast %129 : vector<1x1x16xf32> to vector<1x16xf32>
    %c5_106 = arith.constant 5 : index
    %c0_107 = arith.constant 0 : index
    %c0_108 = arith.constant 0 : index
    %131 = vector.load %arg9[%c5_106, %c0_107, %c0_108] : memref<9x1x16xf32, #tpu.memory_space<vmem>>, vector<1x1x16xf32>
    %132 = vector.shape_cast %131 : vector<1x1x16xf32> to vector<1x16xf32>
    %c6_109 = arith.constant 6 : index
    %c0_110 = arith.constant 0 : index
    %c0_111 = arith.constant 0 : index
    %133 = vector.load %arg9[%c6_109, %c0_110, %c0_111] : memref<9x1x16xf32, #tpu.memory_space<vmem>>, vector<1x1x16xf32>
    %134 = vector.shape_cast %133 : vector<1x1x16xf32> to vector<1x16xf32>
    %c7_112 = arith.constant 7 : index
    %c0_113 = arith.constant 0 : index
    %c0_114 = arith.constant 0 : index
    %135 = vector.load %arg9[%c7_112, %c0_113, %c0_114] : memref<9x1x16xf32, #tpu.memory_space<vmem>>, vector<1x1x16xf32>
    %136 = vector.shape_cast %135 : vector<1x1x16xf32> to vector<1x16xf32>
    %c8_115 = arith.constant 8 : index
    %c0_116 = arith.constant 0 : index
    %c0_117 = arith.constant 0 : index
    %137 = vector.load %arg9[%c8_115, %c0_116, %c0_117] : memref<9x1x16xf32, #tpu.memory_space<vmem>>, vector<1x1x16xf32>
    %138 = vector.shape_cast %137 : vector<1x1x16xf32> to vector<1x16xf32>
    %cst_118 = arith.constant dense<0.000000e+00> : vector<16x16xf32>
    %139 = tpu.matmul %110, %112, %cst_118 {dimension_numbers = #tpu.dot_dimension_numbers<[1], [0], [0], [1], [0, 0, 1, 1], [], []>} : vector<16x16xf32>, vector<16x16xf32>, vector<16x16xf32> -> vector<16x16xf32>
    %140 = vector.broadcast %122 : vector<1x16xf32> to vector<16x16xf32>
    %141 = arith.addf %139, %140 : vector<16x16xf32>
    %c0_119 = arith.constant 0 : index
    %c0_120 = arith.constant 0 : index
    %142 = vector.load %arg19[%c0_119, %c0_120] : memref<16x64xf32, #tpu.memory_space<vmem>>, vector<16x16xf32>
    tpu.vector_store %arg19[%c0_119, %c0_120], %141 {strides = array<i32>} : memref<16x64xf32, #tpu.memory_space<vmem>>, vector<16x16xf32>,
    %cst_121 = arith.constant dense<0.000000e+00> : vector<16x16xf32>
    %143 = tpu.matmul %110, %114, %cst_121 {dimension_numbers = #tpu.dot_dimension_numbers<[1], [0], [0], [1], [0, 0, 1, 1], [], []>} : vector<16x16xf32>, vector<16x16xf32>, vector<16x16xf32> -> vector<16x16xf32>
    %144 = vector.broadcast %124 : vector<1x16xf32> to vector<16x16xf32>
    %145 = arith.addf %143, %144 : vector<16x16xf32>
    %c0_122 = arith.constant 0 : index
    %c16_123 = arith.constant 16 : index
    %146 = vector.load %arg19[%c0_122, %c16_123] : memref<16x64xf32, #tpu.memory_space<vmem>>, vector<16x16xf32>
    tpu.vector_store %arg19[%c0_122, %c16_123], %145 {strides = array<i32>} : memref<16x64xf32, #tpu.memory_space<vmem>>, vector<16x16xf32>,
    %cst_124 = arith.constant dense<0.000000e+00> : vector<16x16xf32>
    %147 = tpu.matmul %110, %116, %cst_124 {dimension_numbers = #tpu.dot_dimension_numbers<[1], [0], [0], [1], [0, 0, 1, 1], [], []>} : vector<16x16xf32>, vector<16x16xf32>, vector<16x16xf32> -> vector<16x16xf32>
    %148 = vector.broadcast %126 : vector<1x16xf32> to vector<16x16xf32>
    %149 = arith.addf %147, %148 : vector<16x16xf32>
    %c0_125 = arith.constant 0 : index
    %c32_126 = arith.constant 32 : index
    %150 = vector.load %arg19[%c0_125, %c32_126] : memref<16x64xf32, #tpu.memory_space<vmem>>, vector<16x16xf32>
    tpu.vector_store %arg19[%c0_125, %c32_126], %149 {strides = array<i32>} : memref<16x64xf32, #tpu.memory_space<vmem>>, vector<16x16xf32>,
    %c0_i32_127 = arith.constant 0 : i32
    %c2_i32_128 = arith.constant 2 : i32
    %151 = arith.addi %c0_i32_127, %c2_i32_128 : i32
    %c1_i32_129 = arith.constant 1 : i32
    scf.for %arg20 = %c0_i32_127 to %151 step %c1_i32_129  : i32 {
      %c8_i32 = arith.constant 8 : i32
      %226 = arith.muli %arg20, %c8_i32 : i32
      %227 = tpu.assume_multiple %226, 8 : i32
      %228 = arith.index_cast %227 : i32 to index
      %c0_175 = arith.constant 0 : index
      %229 = vector.load %arg19[%228, %c0_175] : memref<16x64xf32, #tpu.memory_space<vmem>>, vector<8x16xf32>
      %230 = arith.index_cast %227 : i32 to index
      %c16_176 = arith.constant 16 : index
      %231 = vector.load %arg19[%230, %c16_176] : memref<16x64xf32, #tpu.memory_space<vmem>>, vector<8x16xf32>
      %232 = arith.index_cast %227 : i32 to index
      %c32_177 = arith.constant 32 : index
      %233 = vector.load %arg19[%232, %c32_177] : memref<16x64xf32, #tpu.memory_space<vmem>>, vector<8x16xf32>
      "tpu.trace_start"() <{level = 10 : i32, message = "qd,kd->qk"}> : () -> ()
      %cst_178 = arith.constant dense<0.000000e+00> : vector<8x8xf32>
      %234 = tpu.matmul %229, %231, %cst_178 {dimension_numbers = #tpu.dot_dimension_numbers<[1], [1], [0], [0], [0, 0, 1, 0], [], []>} : vector<8x16xf32>, vector<8x16xf32>, vector<8x8xf32> -> vector<8x8xf32>
      "tpu.trace_stop"() : () -> ()
      %cst_179 = arith.constant 2.500000e-01 : f32
      %235 = vector.broadcast %cst_179 : f32 to vector<8x8xf32>
      %236 = arith.mulf %234, %235 : vector<8x8xf32>
      %cst_180 = arith.constant dense<0xFF800000> : vector<8xf32>
      %237 = vector.multi_reduction <maximumf>, %236, %cst_180 [1] : vector<8x8xf32> to vector<8xf32>
      %238 = vector.shape_cast %237 : vector<8xf32> to vector<8x1xf32>
      %239 = vector.broadcast %238 : vector<8x1xf32> to vector<8x8xf32>
      %240 = arith.subf %236, %239 : vector<8x8xf32>
      %241 = math.exp %240 : vector<8x8xf32>
      %cst_181 = arith.constant dense<0.000000e+00> : vector<8xf32>
      %242 = vector.multi_reduction <add>, %241, %cst_181 [1] : vector<8x8xf32> to vector<8xf32>
      %243 = vector.shape_cast %242 : vector<8xf32> to vector<8x1xf32>
      %244 = tpu.reciprocal %243 {approx = true} : vector<8x1xf32> -> vector<8x1xf32>
      %245 = vector.broadcast %244 : vector<8x1xf32> to vector<8x8xf32>
      %246 = arith.mulf %241, %245 : vector<8x8xf32>
      %cst_182 = arith.constant dense<0.000000e+00> : vector<8x16xf32>
      %247 = tpu.matmul %246, %233, %cst_182 {dimension_numbers = #tpu.dot_dimension_numbers<[1], [0], [0], [1], [0, 0, 1, 1], [], []>} : vector<8x8xf32>, vector<8x16xf32>, vector<8x16xf32> -> vector<8x16xf32>
      %248 = arith.index_cast %227 : i32 to index
      %c48_183 = arith.constant 48 : index
      %249 = vector.load %arg19[%248, %c48_183] : memref<16x64xf32, #tpu.memory_space<vmem>>, vector<8x16xf32>
      tpu.vector_store %arg19[%248, %c48_183], %247 {strides = array<i32>} : memref<16x64xf32, #tpu.memory_space<vmem>>, vector<8x16xf32>,
    }
    %c2_i32_130 = arith.constant 2 : i32
    %c0_131 = arith.constant 0 : index
    %c48_132 = arith.constant 48 : index
    %152 = vector.load %arg19[%c0_131, %c48_132] : memref<16x64xf32, #tpu.memory_space<vmem>>, vector<16x16xf32>
    %cst_133 = arith.constant dense<0.000000e+00> : vector<16x16xf32>
    %153 = tpu.matmul %152, %118, %cst_133 {dimension_numbers = #tpu.dot_dimension_numbers<[1], [0], [0], [1], [0, 0, 1, 1], [], []>} : vector<16x16xf32>, vector<16x16xf32>, vector<16x16xf32> -> vector<16x16xf32>
    %154 = vector.broadcast %128 : vector<1x16xf32> to vector<16x16xf32>
    %155 = arith.addf %153, %154 : vector<16x16xf32>
    %156 = arith.addf %155, %110 : vector<16x16xf32>
    %cst_134 = arith.constant dense<0.000000e+00> : vector<16xf32>
    %157 = vector.multi_reduction <add>, %156, %cst_134 [1] : vector<16x16xf32> to vector<16xf32>
    %158 = vector.shape_cast %157 : vector<16xf32> to vector<16x1xf32>
    %cst_135 = arith.constant 1.600000e+01 : f32
    %159 = vector.broadcast %cst_135 : f32 to vector<16x1xf32>
    %160 = arith.divf %158, %159 : vector<16x1xf32>
    %161 = vector.broadcast %160 : vector<16x1xf32> to vector<16x16xf32>
    %162 = arith.subf %156, %161 : vector<16x16xf32>
    %163 = arith.mulf %162, %162 : vector<16x16xf32>
    %cst_136 = arith.constant dense<0.000000e+00> : vector<16xf32>
    %164 = vector.multi_reduction <add>, %163, %cst_136 [1] : vector<16x16xf32> to vector<16xf32>
    %165 = vector.shape_cast %164 : vector<16xf32> to vector<16x1xf32>
    %cst_137 = arith.constant 1.600000e+01 : f32
    %166 = vector.broadcast %cst_137 : f32 to vector<16x1xf32>
    %167 = arith.divf %165, %166 : vector<16x1xf32>
    %168 = vector.broadcast %160 : vector<16x1xf32> to vector<16x16xf32>
    %169 = arith.subf %156, %168 : vector<16x16xf32>
    %cst_138 = arith.constant 9.99999974E-6 : f32
    %170 = vector.broadcast %cst_138 : f32 to vector<16x1xf32>
    %171 = arith.addf %167, %170 : vector<16x1xf32>
    %172 = math.rsqrt %171 : vector<16x1xf32>
    %173 = vector.broadcast %172 : vector<16x1xf32> to vector<16x16xf32>
    %174 = arith.mulf %169, %173 : vector<16x16xf32>
    %175 = vector.broadcast %130 : vector<1x16xf32> to vector<16x16xf32>
    %176 = arith.mulf %174, %175 : vector<16x16xf32>
    %177 = vector.broadcast %132 : vector<1x16xf32> to vector<16x16xf32>
    %178 = arith.addf %176, %177 : vector<16x16xf32>
    %cst_139 = arith.constant dense<0.000000e+00> : vector<16x16xf32>
    %179 = tpu.matmul %178, %120, %cst_139 {dimension_numbers = #tpu.dot_dimension_numbers<[1], [0], [0], [1], [0, 0, 1, 1], [], []>} : vector<16x16xf32>, vector<16x16xf32>, vector<16x16xf32> -> vector<16x16xf32>
    %180 = vector.broadcast %134 : vector<1x16xf32> to vector<16x16xf32>
    %181 = arith.addf %179, %180 : vector<16x16xf32>
    %182 = arith.addf %181, %178 : vector<16x16xf32>
    %cst_140 = arith.constant dense<0.000000e+00> : vector<16xf32>
    %183 = vector.multi_reduction <add>, %182, %cst_140 [1] : vector<16x16xf32> to vector<16xf32>
    %184 = vector.shape_cast %183 : vector<16xf32> to vector<16x1xf32>
    %cst_141 = arith.constant 1.600000e+01 : f32
    %185 = vector.broadcast %cst_141 : f32 to vector<16x1xf32>
    %186 = arith.divf %184, %185 : vector<16x1xf32>
    %187 = vector.broadcast %186 : vector<16x1xf32> to vector<16x16xf32>
    %188 = arith.subf %182, %187 : vector<16x16xf32>
    %189 = arith.mulf %188, %188 : vector<16x16xf32>
    %cst_142 = arith.constant dense<0.000000e+00> : vector<16xf32>
    %190 = vector.multi_reduction <add>, %189, %cst_142 [1] : vector<16x16xf32> to vector<16xf32>
    %191 = vector.shape_cast %190 : vector<16xf32> to vector<16x1xf32>
    %cst_143 = arith.constant 1.600000e+01 : f32
    %192 = vector.broadcast %cst_143 : f32 to vector<16x1xf32>
    %193 = arith.divf %191, %192 : vector<16x1xf32>
    %194 = vector.broadcast %186 : vector<16x1xf32> to vector<16x16xf32>
    %195 = arith.subf %182, %194 : vector<16x16xf32>
    %cst_144 = arith.constant 9.99999974E-6 : f32
    %196 = vector.broadcast %cst_144 : f32 to vector<16x1xf32>
    %197 = arith.addf %193, %196 : vector<16x1xf32>
    %198 = math.rsqrt %197 : vector<16x1xf32>
    %199 = vector.broadcast %198 : vector<16x1xf32> to vector<16x16xf32>
    %200 = arith.mulf %195, %199 : vector<16x16xf32>
    %201 = vector.broadcast %136 : vector<1x16xf32> to vector<16x16xf32>
    %202 = arith.mulf %200, %201 : vector<16x16xf32>
    %203 = vector.broadcast %138 : vector<1x16xf32> to vector<16x16xf32>
    %204 = arith.addf %202, %203 : vector<16x16xf32>
    %c0_145 = arith.constant 0 : index
    %c0_146 = arith.constant 0 : index
    %205 = vector.load %arg10[%c0_145, %c0_146] : memref<16x64xf32, #tpu.memory_space<vmem>>, vector<16x64xf32>
    %cst_147 = arith.constant dense<0.000000e+00> : vector<16x64xf32>
    %206 = tpu.matmul %204, %205, %cst_147 {dimension_numbers = #tpu.dot_dimension_numbers<[1], [0], [0], [1], [0, 0, 1, 1], [], []>} : vector<16x16xf32>, vector<16x64xf32>, vector<16x64xf32> -> vector<16x64xf32>
    %c0_148 = arith.constant 0 : index
    %c0_149 = arith.constant 0 : index
    %207 = vector.load %arg12[%c0_148, %c0_149] : memref<1x64xf32, #tpu.memory_space<vmem>>, vector<1x64xf32>
    %208 = vector.broadcast %207 : vector<1x64xf32> to vector<16x64xf32>
    %209 = arith.addf %206, %208 : vector<16x64xf32>
    %c0_150 = arith.constant 0 : index
    %c0_151 = arith.constant 0 : index
    %210 = vector.load %arg17[%c0_150, %c0_151] : memref<16x128xf32, #tpu.memory_space<vmem>>, vector<16x64xf32>
    tpu.vector_store %arg17[%c0_150, %c0_151], %209 {strides = array<i32>} : memref<16x128xf32, #tpu.memory_space<vmem>>, vector<16x64xf32>,
    %c0_152 = arith.constant 0 : index
    %c0_153 = arith.constant 0 : index
    %211 = vector.load %arg11[%c0_152, %c0_153] : memref<16x64xf32, #tpu.memory_space<vmem>>, vector<16x64xf32>
    %cst_154 = arith.constant 0.000000e+00 : f32
    %212 = vector.broadcast %cst_154 : f32 to vector<8x16xf32>
    %c0_i32_155 = arith.constant 0 : i32
    %c2_i32_156 = arith.constant 2 : i32
    %213 = arith.addi %c0_i32_155, %c2_i32_156 : i32
    %c1_i32_157 = arith.constant 1 : i32
    %214:2 = scf.for %arg20 = %c0_i32_155 to %213 step %c1_i32_157 iter_args(%arg21 = %212, %arg22 = %212) -> (vector<8x16xf32>, vector<8x16xf32>)  : i32 {
      %c8_i32 = arith.constant 8 : i32
      %226 = arith.muli %arg20, %c8_i32 : i32
      %227 = tpu.assume_multiple %226, 8 : i32
      %228 = arith.index_cast %227 : i32 to index
      %c0_175 = arith.constant 0 : index
      %229 = vector.load %arg17[%228, %c0_175] : memref<16x128xf32, #tpu.memory_space<vmem>>, vector<8x64xf32>
      %cst_176 = arith.constant dense<0.000000e+00> : vector<8x64xf32>
      %230 = tpu.matmul %arg21, %211, %cst_176 {dimension_numbers = #tpu.dot_dimension_numbers<[1], [0], [0], [1], [0, 0, 1, 1], [], []>} : vector<8x16xf32>, vector<16x64xf32>, vector<8x64xf32> -> vector<8x64xf32>
      %231 = arith.addf %229, %230 : vector<8x64xf32>
      %232 = vector.extract_strided_slice %231 {offsets = [0, 0], sizes = [8, 32], strides = [1, 1]} : vector<8x64xf32> to vector<8x32xf32>
      %233 = arith.negf %232 : vector<8x32xf32>
      %234 = math.exp %233 : vector<8x32xf32>
      %cst_177 = arith.constant 1.000000e+00 : f32
      %235 = vector.broadcast %cst_177 : f32 to vector<8x32xf32>
      %236 = arith.addf %235, %234 : vector<8x32xf32>
      %237 = arith.divf %235, %236 : vector<8x32xf32>
      %238 = vector.extract_strided_slice %231 {offsets = [0, 32], sizes = [8, 16], strides = [1, 1]} : vector<8x64xf32> to vector<8x16xf32>
      %239 = math.tanh %238 : vector<8x16xf32>
      %240 = vector.extract_strided_slice %231 {offsets = [0, 48], sizes = [8, 16], strides = [1, 1]} : vector<8x64xf32> to vector<8x16xf32>
      %241 = arith.negf %240 : vector<8x16xf32>
      %242 = math.exp %241 : vector<8x16xf32>
      %cst_178 = arith.constant 1.000000e+00 : f32
      %243 = vector.broadcast %cst_178 : f32 to vector<8x16xf32>
      %244 = arith.addf %243, %242 : vector<8x16xf32>
      %245 = arith.divf %243, %244 : vector<8x16xf32>
      %246 = vector.extract_strided_slice %237 {offsets = [0, 16], sizes = [8, 16], strides = [1, 1]} : vector<8x32xf32> to vector<8x16xf32>
      %247 = arith.mulf %246, %arg22 : vector<8x16xf32>
      %248 = vector.extract_strided_slice %237 {offsets = [0, 0], sizes = [8, 16], strides = [1, 1]} : vector<8x32xf32> to vector<8x16xf32>
      %249 = arith.mulf %248, %239 : vector<8x16xf32>
      %250 = arith.addf %247, %249 : vector<8x16xf32>
      %251 = math.tanh %250 : vector<8x16xf32>
      %252 = arith.mulf %245, %251 : vector<8x16xf32>
      %253 = arith.index_cast %227 : i32 to index
      %c0_179 = arith.constant 0 : index
      %254 = vector.load %arg18[%253, %c0_179] : memref<16x32xf32, #tpu.memory_space<vmem>>, vector<8x16xf32>
      tpu.vector_store %arg18[%253, %c0_179], %252 {strides = array<i32>} : memref<16x32xf32, #tpu.memory_space<vmem>>, vector<8x16xf32>,
      scf.yield %252, %250 : vector<8x16xf32>, vector<8x16xf32>
    }
    %c2_i32_158 = arith.constant 2 : i32
    %c0_159 = arith.constant 0 : index
    %c0_160 = arith.constant 0 : index
    %215 = vector.load %arg18[%c0_159, %c0_160] : memref<16x32xf32, #tpu.memory_space<vmem>>, vector<16x16xf32>
    %c0_161 = arith.constant 0 : index
    %c0_162 = arith.constant 0 : index
    %216 = vector.load %arg13[%c0_161, %c0_162] : memref<16x64xf32, #tpu.memory_space<vmem>>, vector<16x64xf32>
    %cst_163 = arith.constant dense<0.000000e+00> : vector<16x64xf32>
    %217 = tpu.matmul %215, %216, %cst_163 {dimension_numbers = #tpu.dot_dimension_numbers<[1], [0], [0], [1], [0, 0, 1, 1], [], []>} : vector<16x16xf32>, vector<16x64xf32>, vector<16x64xf32> -> vector<16x64xf32>
    %c0_164 = arith.constant 0 : index
    %c0_165 = arith.constant 0 : index
    %218 = vector.load %arg15[%c0_164, %c0_165] : memref<1x64xf32, #tpu.memory_space<vmem>>, vector<1x64xf32>
    %219 = vector.broadcast %218 : vector<1x64xf32> to vector<16x64xf32>
    %220 = arith.addf %217, %219 : vector<16x64xf32>
    %c0_166 = arith.constant 0 : index
    %c0_167 = arith.constant 0 : index
    %221 = vector.load %arg17[%c0_166, %c0_167] : memref<16x128xf32, #tpu.memory_space<vmem>>, vector<16x64xf32>
    tpu.vector_store %arg17[%c0_166, %c0_167], %220 {strides = array<i32>} : memref<16x128xf32, #tpu.memory_space<vmem>>, vector<16x64xf32>,
    %c0_168 = arith.constant 0 : index
    %c0_169 = arith.constant 0 : index
    %222 = vector.load %arg14[%c0_168, %c0_169] : memref<16x64xf32, #tpu.memory_space<vmem>>, vector<16x64xf32>
    %cst_170 = arith.constant 0.000000e+00 : f32
    %223 = vector.broadcast %cst_170 : f32 to vector<8x16xf32>
    %c0_i32_171 = arith.constant 0 : i32
    %c2_i32_172 = arith.constant 2 : i32
    %224 = arith.addi %c0_i32_171, %c2_i32_172 : i32
    %c1_i32_173 = arith.constant 1 : i32
    %225:2 = scf.for %arg20 = %c0_i32_171 to %224 step %c1_i32_173 iter_args(%arg21 = %223, %arg22 = %223) -> (vector<8x16xf32>, vector<8x16xf32>)  : i32 {
      %c8_i32 = arith.constant 8 : i32
      %226 = arith.muli %arg20, %c8_i32 : i32
      %227 = tpu.assume_multiple %226, 8 : i32
      %228 = arith.index_cast %227 : i32 to index
      %c0_175 = arith.constant 0 : index
      %229 = vector.load %arg17[%228, %c0_175] : memref<16x128xf32, #tpu.memory_space<vmem>>, vector<8x64xf32>
      %cst_176 = arith.constant dense<0.000000e+00> : vector<8x64xf32>
      %230 = tpu.matmul %arg21, %222, %cst_176 {dimension_numbers = #tpu.dot_dimension_numbers<[1], [0], [0], [1], [0, 0, 1, 1], [], []>} : vector<8x16xf32>, vector<16x64xf32>, vector<8x64xf32> -> vector<8x64xf32>
      %231 = arith.addf %229, %230 : vector<8x64xf32>
      %232 = vector.extract_strided_slice %231 {offsets = [0, 0], sizes = [8, 32], strides = [1, 1]} : vector<8x64xf32> to vector<8x32xf32>
      %233 = arith.negf %232 : vector<8x32xf32>
      %234 = math.exp %233 : vector<8x32xf32>
      %cst_177 = arith.constant 1.000000e+00 : f32
      %235 = vector.broadcast %cst_177 : f32 to vector<8x32xf32>
      %236 = arith.addf %235, %234 : vector<8x32xf32>
      %237 = arith.divf %235, %236 : vector<8x32xf32>
      %238 = vector.extract_strided_slice %231 {offsets = [0, 32], sizes = [8, 16], strides = [1, 1]} : vector<8x64xf32> to vector<8x16xf32>
      %239 = math.tanh %238 : vector<8x16xf32>
      %240 = vector.extract_strided_slice %231 {offsets = [0, 48], sizes = [8, 16], strides = [1, 1]} : vector<8x64xf32> to vector<8x16xf32>
      %241 = arith.negf %240 : vector<8x16xf32>
      %242 = math.exp %241 : vector<8x16xf32>
      %cst_178 = arith.constant 1.000000e+00 : f32
      %243 = vector.broadcast %cst_178 : f32 to vector<8x16xf32>
      %244 = arith.addf %243, %242 : vector<8x16xf32>
      %245 = arith.divf %243, %244 : vector<8x16xf32>
      %246 = vector.extract_strided_slice %237 {offsets = [0, 16], sizes = [8, 16], strides = [1, 1]} : vector<8x32xf32> to vector<8x16xf32>
      %247 = arith.mulf %246, %arg22 : vector<8x16xf32>
      %248 = vector.extract_strided_slice %237 {offsets = [0, 0], sizes = [8, 16], strides = [1, 1]} : vector<8x32xf32> to vector<8x16xf32>
      %249 = arith.mulf %248, %239 : vector<8x16xf32>
      %250 = arith.addf %247, %249 : vector<8x16xf32>
      %251 = math.tanh %250 : vector<8x16xf32>
      %252 = arith.mulf %245, %251 : vector<8x16xf32>
      %253 = arith.index_cast %227 : i32 to index
      %c0_179 = arith.constant 0 : index
      %254 = vector.load %arg16[%253, %c0_179] : memref<16x16xf32, #tpu.memory_space<vmem>>, vector<8x16xf32>
      tpu.vector_store %arg16[%253, %c0_179], %252 {strides = array<i32>} : memref<16x16xf32, #tpu.memory_space<vmem>>, vector<8x16xf32>,
      scf.yield %252, %250 : vector<8x16xf32>, vector<8x16xf32>
    }
    %c2_i32_174 = arith.constant 2 : i32
    return
  }
}

</mosaic_0001>

<bundles_post_ra>
// kernel: eq_transformer_encoder.3
= control target key start
LH: loop header
LB: loop body
LE: loop exit
PB: predicated region body
PF: predicated region fallthrough
CT: control target
= control target key end

     0   :  { %s2365_s0 = inlined_call_operand.vmem [shape: f32[16,64], index: 0, kind: input, shape index: {}]   ;;  %s2366_s1 = inlined_call_operand.vmem [shape: f32[64,128], index: 1, kind: input, shape index: {}]   ;;  %s2367_s2 = inlined_call_operand.vmem [shape: f32[32,128], index: 2, kind: input, shape index: {}]   ;;  %s2368_s3 = inlined_call_operand.vmem [shape: f32[1,128], index: 3, kind: input, shape index: {}]   ;;  %s2369_s4 = inlined_call_operand.vmem [shape: f32[32,16], index: 4, kind: input, shape index: {}]   ;;  %s2370_s5 = inlined_call_operand.vmem [shape: f32[1,16], index: 5, kind: input, shape index: {}]   ;;  %s2371_s6 = inlined_call_operand.vmem [shape: f32[5,16,16], index: 6, kind: input, shape index: {}]   ;;  %s2372_s7 = inlined_call_operand.vmem [shape: f32[9,1,16], index: 7, kind: input, shape index: {}]   ;;  %s2373_s8 = inlined_call_operand.vmem [shape: f32[5,16,16], index: 8, kind: input, shape index: {}]   ;;  %s2374_s9 = inlined_call_operand.vmem [shape: f32[9,1,16], index: 9, kind: input, shape index: {}]   ;;  %s2375_s10 = inlined_call_operand.vmem [shape: f32[16,64], index: 10, kind: input, shape index: {}]   ;;  %s2376_s11 = inlined_call_operand.vmem [shape: f32[16,64], index: 11, kind: input, shape index: {}]   ;;  %s2377_s12 = inlined_call_operand.vmem [shape: f32[1,64], index: 12, kind: input, shape index: {}]   ;;  %s2378_s13 = inlined_call_operand.vmem [shape: f32[16,64], index: 13, kind: input, shape index: {}]   ;;  %s2379_s14 = inlined_call_operand.vmem [shape: f32[16,64], index: 14, kind: input, shape index: {}]   ;;  %s2380_s15 = inlined_call_operand.vmem [shape: f32[1,64], index: 15, kind: input, shape index: {}]   ;;  %s2381_s16 = inlined_call_operand.hbm [shape: f32[16,16], index: 16, kind: output, shape index: {}]  }
   0x1   :  { %2383 = sst [smem:[#allocation8_spill]] %s2365_s0 }
   0x2   :  { %21 = vsyncpa [#allocation6], 0  ;;  %v63_v0 = vld [vmem:[%s2366_s1 + $0x38] sm:$0xff]  ;;  %v62_v1 = vld [vmem:[%s2366_s1 + $0x30] sm:$0xff]  ;;  %s2384_s24 = sld [smem:[#allocation8_spill]]  ;;  %vm68_vm0 = vcmask 523264  }
   0x3   :  { %83 = vmatpush.msra.mxu0 %v63_v0  ;;  %1429 = vmatpush.msra.mxu1 %v63_v0  ;;  %v61_v2 = vld [vmem:[%s2366_s1 + $0x28] sm:$0xff]  ;;  %v60_v3 = vld [vmem:[%s2366_s1 + $0x20] sm:$0xff]  ;;  %v59_v4 = vld [vmem:[%s2366_s1 + $0x18] sm:$0xff]  ;;  %v1891_v19 = vmov 0.0   ;;  %v1893_v20 = vmov 0.0   ;;  %s1895_s21 = smov 0  }
   0x4   :  { %v58_v5 = vld [vmem:[%s2366_s1 + $0x10] sm:$0xff]  ;;  %v57_v6 = vld [vmem:[%s2366_s1 + $0x8] sm:$0xff]  ;;  %v56_v7 = vld [vmem:[%s2366_s1] sm:$0xff] }
   0x5   :  { %84 = vmatpush.msra.mxu0 %v62_v1  ;;  %1430 = vmatpush.msra.mxu1 %v62_v1  ;;  %v1871_v10 = vld [vmem:[%s2367_s2] sm:$0xff]  ;;  %v1876_v11 = vld [vmem:[%s2367_s2 + $0x8] sm:$0xff]  ;;  %v1881_v12 = vld [vmem:[%s2367_s2 + $0x10] sm:$0xff] }
   0x6   :  { %v1886_v13 = vld [vmem:[%s2367_s2 + $0x18] sm:$0xff]  ;;  %v1554_v14 = vld [vmem:[%s2368_s3] ss:$0 sm:$0xff] }
   0x7   :  { %85 = vmatpush.msra.mxu0 %v61_v2  ;;  %1431 = vmatpush.msra.mxu1 %v61_v2 }
   0x8   :  { %v54_v8 = vld [vmem:[%s2384_s24] sm:$0xff]  ;;  %v55_v9 = vld [vmem:[%s2384_s24 + $0x8] sm:$0xff] }
   0x9   :  { %86 = vmatpush.msra.mxu0 %v60_v3  ;;  %1432 = vmatpush.msra.mxu1 %v60_v3 }
   0xb   :  { %87 = vmatpush.msra.mxu0 %v59_v4  ;;  %1433 = vmatpush.msra.mxu1 %v59_v4 }
   0xd   :  { %88 = vmatpush.msra.mxu0 %v58_v5  ;;  %1434 = vmatpush.msra.mxu1 %v58_v5 }
   0xf   :  { %89 = vmatpush.msra.mxu0 %v57_v6  ;;  %1435 = vmatpush.msra.mxu1 %v57_v6 }
  0x11   :  { %90 = vmatpush.msra.mxu0 %v56_v7  ;;  %1436 = vmatpush.msra.mxu1 %v56_v7 }
  0x12   :  { %1352 = vmatmul.msk.f32.vlgmr.msra.gmra.mxu0 %vm68_vm0, %v54_v8  ;;  %1353 = vmatmul.msk.f32.vlgmr.msra.gmra.mxu1 %vm68_vm0, %v55_v9 }
  0x8f   :  { %v92_v15 = vpop.f32.mrf.mxu0  ;;  %v95_v16 = vpop.f32.mrf.mxu1 }
  0x90   :  { %v93_v17 = vadd.f32 %v1554_v14, %v92_v15  ;;  %v96_v18 = vadd.f32 %v1554_v14, %v95_v16 }
  0x92   :  { %98 = vst [vmem:[#allocation2] sm:$0xff] %v93_v17 }
  0x93   :  { %99 = vst [vmem:[#allocation2 + $0x8] sm:$0xff] %v96_v18 }
  0x94 LB: > { %133 = vmatpush.msra.mxu0 %v1886_v13  ;;  %s1728_s2 = smov 32   ;;  %vm118_vm1 = vcmask 261120   ;;  %s1354_s3 = sshll.u32 %s1694_s21, 3  ;;  %s1694_s21 = sphi %s1895_s21, %s109_s21   ;;  %v1690_v20 = vphi %v1893_v20, %v178_v20   ;;  %v1686_v19 = vphi %v1891_v19, %v172_v19  }
  0x95   : > { %116 = vrot.lane.b32.xlu0 %v1690_v20, %s1728_s2  ;;  %s113_s22 = scalar_lea.vmem [#allocation2], %s1354_s3  ;;  %s1729_s23 = smov 64  }
  0x96   : > { %134 = vmatpush.msra.mxu0 %v1881_v12  ;;  %s183_s24 = scalar_lea.vmem [#allocation3], %s1354_s3  ;;  %s109_s21 = sadd.s32 1, %s1694_s21  }
  0x97   : > { %p106_p0 = scmp.ge.s32.totalorder %s109_s21, 2  }
  0x98   : > { %135 = vmatpush.msra.mxu0 %v1876_v11  ;;  %v190_v46 = vld [vmem:[%s2369_s4 + $0x18] sm:$0xff] (%p106_p0)  ;;  %v189_v47 = vld [vmem:[%s2369_s4 + $0x10] sm:$0xff] (%p106_p0)  ;;  %v188_v48 = vld [vmem:[%s2369_s4 + $0x8] sm:$0xff] (%p106_p0)  ;;  %vm259_vm6 = vcmask (%p106_p0), 130048   ;;  %s1730_s17 = smov (%p106_p0), 16   ;;  %s1731_s18 = smov (%p106_p0), 32  }
  0x99   :  { %v187_v49 = vld [vmem:[%s2369_s4] sm:$0xff] (%p106_p0)  ;;  %v226_v52 = vld [vmem:[%s2371_s6 + $0x8] sm:$0xff] (%p106_p0)  ;;  %v1360_v53 = vld [vmem:[%s2371_s6 + $0x18] sm:$0xff] (%p106_p0)  ;;  %vm325_vm7 = vcmask (%p106_p0), 261248   ;;  %vm362_vm8 = vcmask (%p106_p0), 392448  }
  0x9a   : > { %136 = vmatpush.msra.mxu0 %v1871_v10  ;;  %v114_v22 = vld [vmem:[%s113_s22] sm:$0xff]  ;;  %v1362_v54 = vld [vmem:[%s2371_s6 + $0x28] sm:$0xff] (%p106_p0)  ;;  %280 = vmatpush.msra.mxu1 (%p106_p0), %v226_v52  ;;  %v1949_v55 = vld [vmem:[%s2371_s6 + $0x30] sm:$0xff] (%p106_p0) }
  0x9b   :  { %308 = vmatpush.msra.mxu2 (%p106_p0), %v1360_v53  ;;  %v1954_v56 = vld [vmem:[%s2371_s6 + $0x38] sm:$0xff] (%p106_p0)  ;;  %v1959_v57 = vld [vmem:[%s2371_s6 + $0x40] sm:$0xff] (%p106_p0)  ;;  %345 = vmatpush.msra.mxu3 (%p106_p0), %v1362_v54  ;;  %v1964_v58 = vld [vmem:[%s2371_s6 + $0x48] sm:$0xff] (%p106_p0) }
  0x9c   :  { %v1969_v59 = vld [vmem:[%s2372_s7 + $0x3] sm:$0x1] (%p106_p0)  ;;  %v1974_v60 = vld [vmem:[%s2372_s7 + $0x4] sm:$0x1] (%p106_p0)  ;;  %v1979_v61 = vld [vmem:[%s2372_s7 + $0x5] sm:$0x1] (%p106_p0) }
  0x9d   :  { %v1984_v62 = vld [vmem:[%s2372_s7 + $0x6] sm:$0x1] (%p106_p0)  ;;  %v1989_v63 = vld [vmem:[%s2372_s7 + $0x7] sm:$0x1] (%p106_p0)  ;;  %v1994_v0 = vld [vmem:[%s2372_s7 + $0x8] sm:$0x1] (%p106_p0) }
  0x9e   :  { %v225_v1 = vld [vmem:[%s2371_s6] sm:$0xff] (%p106_p0)  ;;  %v1359_v2 = vld [vmem:[%s2371_s6 + $0x10] sm:$0xff] (%p106_p0) }
  0x9f   :  { %281 = vmatpush.msra.mxu1 (%p106_p0), %v225_v1  ;;  %309 = vmatpush.msra.mxu2 (%p106_p0), %v1359_v2  ;;  %v1361_v3 = vld [vmem:[%s2371_s6 + $0x20] sm:$0xff] (%p106_p0) }
  0xa0   :  { %346 = vmatpush.msra.mxu3 (%p106_p0), %v1361_v3  ;;  %v1563_v4 = vld [vmem:[%s2370_s5] ss:$0 sm:$0xff] (%p106_p0)  ;;  %v1565_v12 = vld [vmem:[%s2372_s7 + $0x1] ss:$0 sm:$0xff] (%p106_p0)  ;;  %v1566_v13 = vld [vmem:[%s2372_s7 + $0x2] ss:$0 sm:$0xff] (%p106_p0) }
  0xa1   :  { %v1564_v9 = vld [vmem:[%s2372_s7] ss:$0 sm:$0xff] (%p106_p0)  ;;  %s2043_s7 = smov (%p106_p0), 0  }
 0x107   : > { %v117_v21 = vpop.permute.xlu0 %116 }
 0x108   : > { %1355 = vmatmul.msk.f32.vlgmr.msra.gmra.mxu0 %vm118_vm1, %v117_v21 }
 0x109   :  { %214 = vmatpush.msra.mxu0 (%p106_p0), %v190_v46 }
 0x10b   :  { %215 = vmatpush.msra.mxu0 (%p106_p0), %v189_v47 }
 0x10d   :  { %216 = vmatpush.msra.mxu0 (%p106_p0), %v188_v48 }
 0x10f   :  { %217 = vmatpush.msra.mxu0 (%p106_p0), %v187_v49 }
 0x185   : > { %v138_v23 = vpop.f32.mrf.mxu0 }
 0x186   : > { %v141_v24 = vadd.f32 %v138_v23, %v114_v22 }
 0x188   : > { %1555 = vtanh.f32 %v141_v24  ;;  %v1356_v26 = vmul.f32 -1.442695, %v141_v24 }
 0x18a   : > { %1557 = vpow2.f32 %v1356_v26 }
 0x18e   : > { %v1556_v25 = vpop.eup %1555 }
 0x18f   : > { %164 = vrot.lane.b32.xlu0 %v1556_v25, %s1729_s23 }
 0x190   : > { %v1558_v27 = vpop.eup %1557 }
 0x191   : > { %v145_v28 = vadd.f32 1.0, %v1558_v27 }
 0x193   : > { %1559 = vrcp.f32 %v145_v28  ;;  %v157_v34 = vand.u32 2147483648, %v145_v28  ;;  %vm151_vm3 = vweird.f32 %v145_v28  ;;  %v155_v35 = vand.u32 2147483647, %v145_v28 }
 0x195   : > { %v158_v37 = vor.u32 1.1754944e-38, %v157_v34  ;;  %vm156_vm5 = vcmp.eq.f32.partialorder %v155_v35, 8.507059e+37 }
 0x199   : > { %v1560_v29 = vpop.eup %1559 }
 0x19a   : > { %v147_v30 = vmul.f32 %v1560_v29, %v145_v28  ;;  %vm152_vm2 = vweird.f32 %v1560_v29 }
 0x19b   : > { %vm153_vm4 = vmor %vm151_vm3, %vm152_vm2 }
 0x19c   : > { %v148_v31 = vsub.f32 1.0, %v147_v30 }
 0x19e   : > { %v149_v32 = vmul.f32 %v1560_v29, %v148_v31 }
 0x1a0   : > { %v150_v33 = vadd.f32 %v1560_v29, %v149_v32 }
 0x1a2   : > { %v154_v36 = vsel %vm153_vm4, %v1560_v29, %v150_v33 }
 0x1a3   : > { %v159_v39 = vsel %vm156_vm5, %v158_v37, %v154_v36 }
 0x1a4   : > { %v162_v41 = vmul.f32 %v1686_v19, %v159_v39 }
 0x201   : > { %v165_v38 = vpop.permute.xlu0 %164 }
 0x202   : > { %v167_v40 = vmul.f32 %v165_v38, %v159_v39 }
 0x204   : > { %169 = vrot.lane.b32.xlu1 %v167_v40, %s1728_s2 }
 0x276   : > { %v170_v42 = vpop.permute.xlu1 %169 }
 0x277   : > { %v172_v19 = vadd.f32 %v170_v42, %v162_v41  }
 0x279   : > { %1561 = vtanh.f32 %v172_v19 }
 0x27f   : > { %v1562_v43 = vpop.eup %1561 }
 0x280   : > { %175 = vrot.lane.b32.xlu1 %v1562_v43, %s1729_s23 }
 0x2f2   : > { %v176_v44 = vpop.permute.xlu1 %175 }
 0x2f3   : > { %v178_v20 = vmul.f32 %v176_v44, %v159_v39  }
 0x2f5   : > { %180 = vrot.lane.b32.xlu2 %v178_v20, %s1728_s2 }
 0x34c   :  { %108 = sbr.rel (!%p106_p0) target bundleno = 148 (0x94), region = 151 }
 0x34f   : > { %v181_v45 = vpop.permute.xlu2 %180 }
 0x350   : > { %184 = vst.msk [vmem:[%s183_s24] sm:$0xff] %vm118_vm1, %v181_v45 }
 0x357   :  { %v185_v50 = vld [vmem:[#allocation3] sm:$0xff]  ;;  %v186_v51 = vld [vmem:[#allocation3 + $0x8] sm:$0xff] }
 0x358   :  { %1357 = vmatmul.msk.f32.vlgmr.msra.gmra.mxu0 %vm118_vm1, %v185_v50 }
 0x360   :  { %1358 = vmatmul.msk.f32.gmra.mxu0 %vm118_vm1, %v186_v51 }
 0x3d5   :  { %v219_v5 = vpop.f32.mrf.mxu0 }
 0x3d6   :  { %v2008_v6 = vadd.f32 %v1563_v4, %v219_v5 }
 0x3d8   :  { %1375 = vmatmul.msk.f32.vlgmr.msra.gmra.mxu1 %vm259_vm6, %v2008_v6  ;;  %1377 = vmatmul.msk.f32.vlgmr.msra.gmra.mxu2 %vm259_vm6, %v2008_v6 }
 0x3d9   :  { %1379 = vmatmul.msk.f32.vlgmr.msra.gmra.mxu3 %vm259_vm6, %v2008_v6 }
 0x3dd   :  { %v222_v7 = vpop.f32.mrf.mxu0 }
 0x3de   :  { %v2016_v8 = vadd.f32 %v1563_v4, %v222_v7 }
 0x3e0   :  { %1376 = vmatmul.msk.f32.gmra.mxu1 %vm259_vm6, %v2016_v8  ;;  %1378 = vmatmul.msk.f32.gmra.mxu2 %vm259_vm6, %v2016_v8 }
 0x3e1   :  { %1380 = vmatmul.msk.f32.gmra.mxu3 %vm259_vm6, %v2016_v8 }
 0x455   :  { %v283_v10 = vpop.f32.mrf.mxu1 }
 0x456   :  { %v284_v11 = vadd.f32 %v1564_v9, %v283_v10 }
 0x458   :  { %289 = vst.msk [vmem:[#allocation4] sm:$0xff] %vm259_vm6, %v284_v11 }
 0x45b   :  { %v311_v14 = vpop.f32.mrf.mxu2 }
 0x45c   :  { %v312_v15 = vadd.f32 %v1565_v12, %v311_v14  ;;  %v348_v16 = vpop.f32.mrf.mxu3 }
 0x45d   :  { %v349_v17 = vadd.f32 %v1566_v13, %v348_v16  ;;  %v286_v18 = vpop.f32.mrf.mxu1 }
 0x45e   :  { %v287_v19 = vadd.f32 %v1564_v9, %v286_v18  ;;  %319 = vrot.lane.b32.xlu0 %v312_v15, %s1730_s17 }
 0x45f   :  { %356 = vrot.lane.b32.xlu1 %v349_v17, %s1731_s18 }
 0x460   :  { %290 = vst.msk [vmem:[#allocation4 + $0x8] sm:$0xff] %vm259_vm6, %v287_v19 }
 0x463   :  { %v314_v20 = vpop.f32.mrf.mxu2 }
 0x464   :  { %v315_v21 = vadd.f32 %v1565_v12, %v314_v20  ;;  %v351_v22 = vpop.f32.mrf.mxu3 }
 0x465   :  { %v352_v23 = vadd.f32 %v1566_v13, %v351_v22 }
 0x466   :  { %321 = vrot.lane.b32.xlu0 %v315_v21, %s1730_s17 }
 0x467   :  { %358 = vrot.lane.b32.xlu1 %v352_v23, %s1731_s18 }
 0x4d0   :  { %v320_v24 = vpop.permute.xlu0 %319 }
 0x4d1   :  { %v357_v25 = vpop.permute.xlu1 %356  ;;  %326 = vst.msk [vmem:[#allocation4] sm:$0xff] %vm325_vm7, %v320_v24 }
 0x4d2   :  { %363 = vst.msk [vmem:[#allocation4] sm:$0xff] %vm362_vm8, %v357_v25 }
 0x4d8   :  { %v322_v26 = vpop.permute.xlu0 %321 }
 0x4d9   :  { %v359_v27 = vpop.permute.xlu1 %358  ;;  %327 = vst.msk [vmem:[#allocation4 + $0x8] sm:$0xff] %vm325_vm7, %v322_v26 }
 0x4da   :  { %364 = vst.msk [vmem:[#allocation4 + $0x8] sm:$0xff] %vm362_vm8, %v359_v27 }
 0x4db LB: > { %s1381_s19 = sshll.u32 %s1698_s7, 3  ;;  %s1732_s21 = smov 112   ;;  %vm402_vm9 = vcmask 64512   ;;  %vm444_vm10 = vcmask 523648   ;;  %s1698_s7 = sphi %s2043_s7, %s370_s7  }
 0x4dc   : > { %s2049_s20 = scalar_lea.vmem [#allocation4], %s1381_s19  ;;  %s1733_s2 = smov 96  }
 0x4dd   : > { %s1734_s4 = smov 48   ;;  %s370_s7 = sadd.s32 1, %s1698_s7  }
 0x4de   : > { %p367_p1 = scmp.ge.s32.totalorder %s370_s7, 2  }
 0x4df   :  { %s1735_s3 = smov (%p367_p1), 80   ;;  %v449_v48 = vperm.slane (%p367_p1), %v1969_v59, 0 }
 0x4e1   : > { %v373_v28 = vld [vmem:[%s2049_s20] sm:$0xff] }
 0x4e2   : > { %375 = vrot.lane.b32.xlu0 %v373_v28, %s1732_s21 }
 0x554   : > { %v376_v29 = vpop.permute.xlu0 %375 }
 0x555   : > { %1382 = vmatpush.xpose.msk.msra.mxu0 %vm259_vm6, %v376_v29  ;;  %v538_v29 = vperm.slane (%p367_p1), %v1974_v60, 0  ;;  %v548_v60 = vperm.slane (%p367_p1), %v1984_v62, 0 }
 0x558   : > { %1383 = vmatmul.msk.f32.vlgmr.msra.gmra.mxu0 %vm259_vm6, %v373_v28 }
 0x559   :  { %475 = vmatpush.msra.mxu0 (%p367_p1), %v1954_v56 }
 0x55b   :  { %476 = vmatpush.msra.mxu0 (%p367_p1), %v1949_v55 }
 0x5d5   : > { %v398_v30 = vpop.f32.mrf.mxu0 }
 0x5d6   : > { %v401_v31 = vmul.f32 0.25, %v398_v30 }
 0x5d8   : > { %v403_v32 = vsel %vm402_vm9, %v401_v31, -inf }
 0x5d9   : > { %404 = vmax.xlane.f32.xlu0 %v403_v32 }
 0x64c   : > { %v405_v33 = vpop.xlane.xlu0 %404 }
 0x64d   : > { %v406_v34 = vsub.f32 %v401_v31, %v405_v33  ;;  %v543_v33 = vperm.slane (%p367_p1), %v1979_v61, 0 }
 0x64f   : > { %v407_v35 = vmul.f32 1.442695, %v406_v34 }
 0x651   : > { %1567 = vpow2.f32 %v407_v35 }
 0x657   : > { %v1568_v36 = vpop.eup %1567 }
 0x658   : > { %v409_v37 = vsel %vm402_vm9, %v1568_v36, 0.0 }
 0x659   : > { %410 = vadd.xlane.f32.xlu1 %v409_v37 }
 0x672   : > { %414 = vrot.lane.b32.xlu1 %v373_v28, %s1733_s2 }
 0x6cc   : > { %v411_v38 = vpop.xlane.xlu1 %410 }
 0x6cd   : > { %1569 = vrcp.f32 %v411_v38 }
 0x6d3   : > { %v1570_v39 = vpop.eup %1569 }
 0x6d4   : > { %v413_v41 = vmul.f32 %v1570_v39, %v1568_v36 }
 0x6e4   : > { %v415_v40 = vpop.permute.xlu1 %414 }
 0x6e5   : > { %435 = vmatpush.msra.mxu1 %v415_v40 }
 0x6e6   : > { %1384 = vmatmul.msk.f32.vlgmr.msra.gmra.mxu1 %vm402_vm9, %v413_v41 }
 0x6e7   :  { %1437 = vmatpush.msra.mxu1 (%p367_p1), %v1954_v56 }
 0x6e9   :  { %1438 = vmatpush.msra.mxu1 (%p367_p1), %v1949_v55 }
 0x6eb   :  { %570 = vmatpush.msrb.mxu1 (%p367_p1), %v1964_v58 }
 0x6ed   :  { %571 = vmatpush.msrb.mxu1 (%p367_p1), %v1959_v57  ;;  %v1736_v57 = vmov (%p367_p1), 16.0  }
 0x6ee   :  { %1574 = vrcp.f32 (%p367_p1), %v1736_v57 }
 0x6f4   :  { %v1575_v58 = vpop.eup (%p367_p1), %1574 }
 0x6f5   :  { %v493_v1 = vmul.f32 (%p367_p1), 16.0, %v1575_v58  ;;  %vm497_vm11 = vweird.f32 (%p367_p1), %v1575_v58 }
 0x6f7   :  { %v494_v2 = vsub.f32 (%p367_p1), 1.0, %v493_v1  ;;  %v636_v1 = vld [vmem:[%s2373_s8 + $0x8] sm:$0xff] (%p367_p1) }
 0x6f8   :  { %689 = vmatpush.msra.mxu2 (%p367_p1), %v636_v1 }
 0x6f9   :  { %v495_v59 = vmul.f32 (%p367_p1), %v1575_v58, %v494_v2  ;;  %v1390_v2 = vld [vmem:[%s2373_s8 + $0x18] sm:$0xff] (%p367_p1) }
 0x6fa   :  { %717 = vmatpush.msra.mxu3 (%p367_p1), %v1390_v2 }
 0x6fb   :  { %v496_v3 = vadd.f32 (%p367_p1), %v1575_v58, %v495_v59  ;;  %v1392_v59 = vld [vmem:[%s2373_s8 + $0x28] sm:$0xff] (%p367_p1) }
 0x6fc   :  { %753 = vmatpush.msrb.mxu0 (%p367_p1), %v1392_v59 }
 0x6fd   :  { %v2077_v4 = vsel (%p367_p1), %vm497_vm11, %v1575_v58, %v496_v3  ;;  %v635_v3 = vld [vmem:[%s2373_s8] sm:$0xff] (%p367_p1) }
 0x6fe   :  { %690 = vmatpush.msra.mxu2 (%p367_p1), %v635_v3 }
 0x763   : > { %v437_v42 = vpop.f32.mrf.mxu1 }
 0x764   : > { %441 = vrot.lane.b32.xlu2 %v437_v42, %s1734_s4 }
 0x7bb   :  { %369 = sbr.rel (!%p367_p1) target bundleno = 1243 (0x4db), region = 162 }
 0x7be   : > { %v442_v43 = vpop.permute.xlu2 %441 }
 0x7bf   : > { %445 = vst.msk [vmem:[%s2049_s20] sm:$0xff] %vm444_vm10, %v442_v43 }
 0x7c6   :  { %v446_v44 = vld [vmem:[#allocation4] sm:$0xff]  ;;  %v447_v45 = vld [vmem:[#allocation4 + $0x8] sm:$0xff] }
 0x7c7   :  { %453 = vrot.lane.b32.xlu0 %v446_v44, %s1735_s3 }
 0x7cf   :  { %455 = vrot.lane.b32.xlu0 %v447_v45, %s1735_s3 }
 0x839   :  { %v454_v46 = vpop.permute.xlu0 %453 }
 0x83a   :  { %1385 = vmatmul.msk.f32.vlgmr.msra.gmra.mxu0 %vm259_vm6, %v454_v46 }
 0x841   :  { %v456_v47 = vpop.permute.xlu0 %455 }
 0x842   :  { %1386 = vmatmul.msk.f32.vlgmr.msra.gmra.mxu1 %vm259_vm6, %v456_v47 }
 0x8b7   :  { %v478_v49 = vpop.f32.mrf.mxu0 }
 0x8b8   :  { %v479_v50 = vadd.f32 %v478_v49, %v449_v48 }
 0x8ba   :  { %v484_v51 = vadd.f32 %v479_v50, %v2008_v6 }
 0x8bc   :  { %v486_v52 = vsel %vm259_vm6, %v484_v51, 0.0 }
 0x8bd   :  { %487 = vadd.xlane.f32.xlu1 %v486_v52 }
 0x8bf   :  { %v481_v53 = vpop.f32.mrf.mxu1 }
 0x8c0   :  { %v482_v54 = vadd.f32 %v481_v53, %v449_v48 }
 0x8c2   :  { %v485_v55 = vadd.f32 %v482_v54, %v2016_v8 }
 0x8c4   :  { %v489_v56 = vsel %vm259_vm6, %v485_v55, 0.0 }
 0x8c5   :  { %490 = vadd.xlane.f32.xlu1 %v489_v56 }
 0x930   :  { %v488_v5 = vpop.xlane.xlu1 %487 }
 0x931   :  { %v499_v6 = vmul.f32 %v2077_v4, %v488_v5  ;;  %v1389_v5 = vld [vmem:[%s2373_s8 + $0x10] sm:$0xff] }
 0x932   :  { %718 = vmatpush.msra.mxu3 %v1389_v5 }
 0x933   :  { %v501_v7 = vsub.f32 %v484_v51, %v499_v6  ;;  %v1391_v6 = vld [vmem:[%s2373_s8 + $0x20] sm:$0xff] }
 0x934   :  { %754 = vmatpush.msrb.mxu0 %v1391_v6 }
 0x935   :  { %v503_v9 = vmul.f32 %v501_v7, %v501_v7 }
 0x937   :  { %v505_v8 = vsel %vm259_vm6, %v503_v9, 0.0  ;;  %v2122_v9 = vld [vmem:[%s2373_s8 + $0x38] sm:$0xff] }
 0x938   :  { %506 = vadd.xlane.f32.xlu2 %v505_v8  ;;  %v491_v10 = vpop.xlane.xlu1 %490  ;;  %v2127_v8 = vld [vmem:[%s2373_s8 + $0x40] sm:$0xff] }
 0x939   :  { %v500_v11 = vmul.f32 %v2077_v4, %v491_v10  ;;  %v2132_v10 = vld [vmem:[%s2373_s8 + $0x48] sm:$0xff] }
 0x93b   :  { %v502_v12 = vsub.f32 %v485_v55, %v500_v11  ;;  %v2137_v11 = vld [vmem:[%s2374_s9 + $0x3] sm:$0x1] }
 0x93d   :  { %v504_v13 = vmul.f32 %v502_v12, %v502_v12 }
 0x93f   :  { %v508_v14 = vsel %vm259_vm6, %v504_v13, 0.0 }
 0x940   :  { %509 = vadd.xlane.f32.xlu2 %v508_v14  ;;  %v2147_v14 = vld [vmem:[%s2374_s9 + $0x5] sm:$0x1] }
 0x9ab   :  { %v507_v15 = vpop.xlane.xlu2 %506 }
 0x9ac   :  { %v511_v16 = vmul.f32 %v507_v15, %v2077_v4  ;;  %v2152_v15 = vld [vmem:[%s2374_s9 + $0x6] sm:$0x1] }
 0x9ae   :  { %v513_v17 = vadd.f32 1e-05, %v511_v16  ;;  %v2157_v16 = vld [vmem:[%s2374_s9 + $0x7] sm:$0x1] }
 0x9b0   :  { %1576 = vrsqrt.f32 %v513_v17  ;;  %vm521_vm13 = vweird.f32 %v513_v17 }
 0x9b3   :  { %v510_v18 = vpop.xlane.xlu2 %509 }
 0x9b4   :  { %v512_v19 = vmul.f32 %v510_v18, %v2077_v4  ;;  %v2163_v18 = vld [vmem:[%s2374_s9 + $0x8] sm:$0x1] }
 0x9b6   :  { %v1577_v20 = vpop.eup %1576  ;;  %v514_v21 = vadd.f32 1e-05, %v512_v19 }
 0x9b7   :  { %v516_v22 = vmul.f32 %v1577_v20, %v513_v17  ;;  %vm522_vm12 = vweird.f32 %v1577_v20 }
 0x9b8   :  { %1578 = vrsqrt.f32 %v514_v21  ;;  %vm523_vm14 = vmor %vm521_vm13, %vm522_vm12  ;;  %vm531_vm1 = vweird.f32 %v514_v21 }
 0x9b9   :  { %v517_v23 = vmul.f32 %v1577_v20, %v516_v22 }
 0x9bb   :  { %v518_v24 = vmul.f32 0.5, %v517_v23 }
 0x9bd   :  { %v519_v25 = vsub.f32 1.5, %v518_v24 }
 0x9be   :  { %v1579_v26 = vpop.eup %1578 }
 0x9bf   :  { %v520_v27 = vmul.f32 %v1577_v20, %v519_v25  ;;  %v526_v28 = vmul.f32 %v1579_v26, %v514_v21  ;;  %vm532_vm15 = vweird.f32 %v1579_v26 }
 0x9c0   :  { %vm533_vm2 = vmor %vm531_vm1, %vm532_vm15 }
 0x9c1   :  { %v524_v30 = vsel %vm523_vm14, %v1577_v20, %v520_v27  ;;  %v527_v31 = vmul.f32 %v1579_v26, %v526_v28 }
 0x9c2   :  { %v535_v32 = vmul.f32 %v524_v30, %v501_v7  ;;  %v2117_v7 = vld [vmem:[%s2373_s8 + $0x30] sm:$0xff] }
 0x9c3   :  { %v528_v34 = vmul.f32 0.5, %v527_v31  ;;  %v626_v31 = vperm.slane %v1989_v63, 0 }
 0x9c4   :  { %v540_v35 = vmul.f32 %v538_v29, %v535_v32 }
 0x9c5   :  { %v529_v36 = vsub.f32 1.5, %v528_v34 }
 0x9c6   :  { %v545_v37 = vadd.f32 %v543_v33, %v540_v35  ;;  %v631_v35 = vperm.slane %v1994_v0, 0 }
 0x9c7   :  { %v530_v38 = vmul.f32 %v1579_v26, %v529_v36 }
 0x9c8   :  { %1387 = vmatmul.msk.f32.vlgmr.msrb.gmra.mxu1 %vm259_vm6, %v545_v37 }
 0x9c9   :  { %v534_v39 = vsel %vm533_vm2, %v1579_v26, %v530_v38 }
 0x9ca   :  { %v536_v40 = vmul.f32 %v534_v39, %v502_v12  ;;  %v2142_v12 = vld [vmem:[%s2374_s9 + $0x4] sm:$0x1] }
 0x9cc   :  { %v541_v41 = vmul.f32 %v538_v29, %v536_v40 }
 0x9ce   :  { %v546_v42 = vadd.f32 %v543_v33, %v541_v41 }
 0x9d0   :  { %1388 = vmatmul.msk.f32.gmra.mxu1 %vm259_vm6, %v546_v42 }
 0xa45   :  { %v573_v43 = vpop.f32.mrf.mxu1 }
 0xa46   :  { %v574_v61 = vadd.f32 %v573_v43, %v548_v60  ;;  %v1573_v43 = vld [vmem:[%s2374_s9 + $0x1] ss:$0 sm:$0xff] }
 0xa48   :  { %v579_v44 = vadd.f32 %v574_v61, %v545_v37 }
 0xa4a   :  { %v581_v45 = vsel %vm259_vm6, %v579_v44, 0.0 }
 0xa4b   :  { %582 = vadd.xlane.f32.xlu0 %v581_v45 }
 0xa4d   :  { %v576_v46 = vpop.f32.mrf.mxu1 }
 0xa4e   :  { %v577_v47 = vadd.f32 %v576_v46, %v548_v60  ;;  %v1572_v60 = vld [vmem:[%s2374_s9] ss:$0 sm:$0xff] }
 0xa50   :  { %v580_v48 = vadd.f32 %v577_v47, %v546_v42 }
 0xa52   :  { %v584_v49 = vsel %vm259_vm6, %v580_v48, 0.0 }
 0xa53   :  { %585 = vadd.xlane.f32.xlu1 %v584_v49 }
 0xabe   :  { %v583_v50 = vpop.xlane.xlu0 %582 }
 0xabf   :  { %v587_v51 = vmul.f32 %v583_v50, %v2077_v4 }
 0xac1   :  { %v589_v52 = vsub.f32 %v579_v44, %v587_v51 }
 0xac3   :  { %v591_v53 = vmul.f32 %v589_v52, %v589_v52 }
 0xac5   :  { %v593_v54 = vsel %vm259_vm6, %v591_v53, 0.0 }
 0xac6   :  { %594 = vadd.xlane.f32.xlu2 %v593_v54  ;;  %v586_v62 = vpop.xlane.xlu1 %585 }
 0xac7   :  { %v588_v55 = vmul.f32 %v586_v62, %v2077_v4 }
 0xac9   :  { %v590_v56 = vsub.f32 %v580_v48, %v588_v55  ;;  %v1571_v48 = vld [vmem:[%s2374_s9 + $0x2] ss:$0 sm:$0xff]  ;;  %s2203_s9 = smov 0  }
 0xacb   :  { %v592_v57 = vmul.f32 %v590_v56, %v590_v56 }
 0xacd   :  { %v596_v58 = vsel %vm259_vm6, %v592_v57, 0.0 }
 0xace   :  { %597 = vadd.xlane.f32.xlu1 %v596_v58 }
 0xb39   :  { %v595_v13 = vpop.xlane.xlu2 %594 }
 0xb3a   :  { %v599_v17 = vmul.f32 %v595_v13, %v2077_v4 }
 0xb3c   :  { %v601_v19 = vadd.f32 1e-05, %v599_v17 }
 0xb3e   :  { %1580 = vrsqrt.f32 %v601_v19  ;;  %vm609_vm4 = vweird.f32 %v601_v19 }
 0xb41   :  { %v598_v20 = vpop.xlane.xlu1 %597 }
 0xb42   :  { %v600_v21 = vmul.f32 %v598_v20, %v2077_v4 }
 0xb44   :  { %v1581_v22 = vpop.eup %1580  ;;  %v602_v23 = vadd.f32 1e-05, %v600_v21 }
 0xb45   :  { %v604_v24 = vmul.f32 %v1581_v22, %v601_v19  ;;  %vm610_vm3 = vweird.f32 %v1581_v22 }
 0xb46   :  { %1582 = vrsqrt.f32 %v602_v23  ;;  %vm611_vm5 = vmor %vm609_vm4, %vm610_vm3  ;;  %vm619_vm12 = vweird.f32 %v602_v23 }
 0xb47   :  { %v605_v25 = vmul.f32 %v1581_v22, %v604_v24 }
 0xb49   :  { %v606_v26 = vmul.f32 0.5, %v605_v25 }
 0xb4b   :  { %v607_v27 = vsub.f32 1.5, %v606_v26 }
 0xb4c   :  { %v1583_v28 = vpop.eup %1582 }
 0xb4d   :  { %v608_v29 = vmul.f32 %v1581_v22, %v607_v27  ;;  %v614_v30 = vmul.f32 %v1583_v28, %v602_v23  ;;  %vm620_vm11 = vweird.f32 %v1583_v28 }
 0xb4e   :  { %vm621_vm13 = vmor %vm619_vm12, %vm620_vm11 }
 0xb4f   :  { %v612_v32 = vsel %vm611_vm5, %v1581_v22, %v608_v29  ;;  %v615_v33 = vmul.f32 %v1583_v28, %v614_v30 }
 0xb50   :  { %v623_v34 = vmul.f32 %v612_v32, %v589_v52 }
 0xb51   :  { %v616_v36 = vmul.f32 0.5, %v615_v33 }
 0xb52   :  { %v628_v37 = vmul.f32 %v626_v31, %v623_v34 }
 0xb53   :  { %v617_v38 = vsub.f32 1.5, %v616_v36 }
 0xb54   :  { %v2168_v39 = vadd.f32 %v631_v35, %v628_v37 }
 0xb55   :  { %v618_v40 = vmul.f32 %v1583_v28, %v617_v38 }
 0xb56   :  { %1405 = vmatmul.msk.f32.vlgmr.msra.gmra.mxu2 %vm259_vm6, %v2168_v39  ;;  %1407 = vmatmul.msk.f32.vlgmr.msra.gmra.mxu3 %vm259_vm6, %v2168_v39 }
 0xb57   :  { %v622_v63 = vsel %vm621_vm13, %v1583_v28, %v618_v40  ;;  %1409 = vmatmul.msk.f32.vlgmr.msrb.gmra.mxu0 %vm259_vm6, %v2168_v39 }
 0xb58   :  { %v624_v0 = vmul.f32 %v622_v63, %v590_v56 }
 0xb5a   :  { %v629_v41 = vmul.f32 %v626_v31, %v624_v0 }
 0xb5c   :  { %v2176_v42 = vadd.f32 %v631_v35, %v629_v41 }
 0xb5e   :  { %1406 = vmatmul.msk.f32.gmra.mxu2 %vm259_vm6, %v2176_v42  ;;  %1408 = vmatmul.msk.f32.gmra.mxu3 %vm259_vm6, %v2176_v42 }
 0xb5f   :  { %1410 = vmatmul.msk.f32.gmra.mxu0 %vm259_vm6, %v2176_v42 }
 0xbd4   :  { %v756_v47 = vpop.f32.mrf.mxu0 }
 0xbd5   :  { %v757_v51 = vadd.f32 %v1571_v48, %v756_v47 }
 0xbd9   :  { %v692_v61 = vpop.f32.mrf.mxu2  ;;  %v720_v44 = vpop.f32.mrf.mxu3 }
 0xbda   :  { %v693_v45 = vadd.f32 %v1572_v60, %v692_v61  ;;  %v721_v46 = vadd.f32 %v1573_v43, %v720_v44 }
 0xbdc   :  { %698 = vst.msk [vmem:[#allocation4] sm:$0xff] %vm259_vm6, %v693_v45  ;;  %728 = vrot.lane.b32.xlu2 %v721_v46, %s1730_s17  ;;  %v759_v54 = vpop.f32.mrf.mxu0 }
 0xbdd   :  { %v760_v62 = vadd.f32 %v1571_v48, %v759_v54 }
 0xbe1   :  { %v695_v49 = vpop.f32.mrf.mxu2  ;;  %v723_v50 = vpop.f32.mrf.mxu3 }
 0xbe2   :  { %v696_v52 = vadd.f32 %v1572_v60, %v695_v49  ;;  %v724_v53 = vadd.f32 %v1573_v43, %v723_v50 }
 0xbe4   :  { %699 = vst.msk [vmem:[#allocation4 + $0x8] sm:$0xff] %vm259_vm6, %v696_v52  ;;  %730 = vrot.lane.b32.xlu1 %v724_v53, %s1730_s17  ;;  %764 = vrot.lane.b32.xlu2 %v757_v51, %s1731_s18 }
 0xbec   :  { %766 = vrot.lane.b32.xlu2 %v760_v62, %s1731_s18 }
 0xc36   :  { %v729_v55 = vpop.permute.xlu2 %728 }
 0xc37   :  { %734 = vst.msk [vmem:[#allocation4] sm:$0xff] %vm325_vm7, %v729_v55 }
 0xc3e   :  { %v765_v56 = vpop.permute.xlu2 %764 }
 0xc3f   :  { %770 = vst.msk [vmem:[#allocation4] sm:$0xff] %vm362_vm8, %v765_v56 }
 0xc46   :  { %v767_v58 = vpop.permute.xlu2 %766 }
 0xc56   :  { %v731_v57 = vpop.permute.xlu1 %730 }
 0xc57   :  { %735 = vst.msk [vmem:[#allocation4 + $0x8] sm:$0xff] %vm325_vm7, %v731_v57 }
 0xc58   :  { %771 = vst.msk [vmem:[#allocation4 + $0x8] sm:$0xff] %vm362_vm8, %v767_v58 }
 0xc59 LB: > { %s1411_s17 = sshll.u32 %s1702_s9, 3  ;;  %s1737_s4 = smov 112   ;;  %s1702_s9 = sphi %s2203_s9, %s777_s9  }
 0xc5a   : > { %s2209_s18 = scalar_lea.vmem [#allocation4], %s1411_s17  ;;  %s1738_s22 = smov 96  }
 0xc5b   : > { %s1739_s23 = smov 48   ;;  %s777_s9 = sadd.s32 1, %s1702_s9  }
 0xc5c   : > { %p774_p2 = scmp.ge.s32.totalorder %s777_s9, 2  }
 0xc5d   :  { %1439 = vmatpush.msra.mxu3 (%p774_p2), %v2122_v9  ;;  %v938_v53 = vperm.slane (%p774_p2), %v2142_v12, 0  ;;  %v943_v55 = vperm.slane (%p774_p2), %v2147_v14, 0  ;;  %v948_v14 = vperm.slane (%p774_p2), %v2152_v15, 0  ;;  %s2285_s1 = smov (%p774_p2), 0  }
 0xc5f   : > { %v780_v1 = vld [vmem:[%s2209_s18] sm:$0xff]  ;;  %1440 = vmatpush.msra.mxu3 (%p774_p2), %v2117_v7 }
 0xc60   : > { %782 = vrot.lane.b32.xlu0 %v780_v1, %s1737_s4 }
 0xcd2   : > { %v783_v2 = vpop.permute.xlu0 %782 }
 0xcd3   : > { %1412 = vmatpush.xpose.msk.msra.mxu0 %vm259_vm6, %v783_v2 }
 0xcd6   : > { %1413 = vmatmul.msk.f32.vlgmr.msra.gmra.mxu0 %vm259_vm6, %v780_v1 }
 0xcd7   :  { %882 = vmatpush.msra.mxu0 (%p774_p2), %v2122_v9  ;;  %v856_v9 = vperm.slane (%p774_p2), %v2137_v11, 0 }
 0xcd9   :  { %883 = vmatpush.msra.mxu0 (%p774_p2), %v2117_v7 }
 0xd53   : > { %v805_v59 = vpop.f32.mrf.mxu0 }
 0xd54   : > { %v808_v3 = vmul.f32 0.25, %v805_v59 }
 0xd56   : > { %v810_v5 = vsel %vm402_vm9, %v808_v3, -inf }
 0xd57   : > { %811 = vmax.xlane.f32.xlu0 %v810_v5 }
 0xdca   : > { %v812_v6 = vpop.xlane.xlu0 %811 }
 0xdcb   : > { %v813_v13 = vsub.f32 %v808_v3, %v812_v6 }
 0xdcd   : > { %v814_v17 = vmul.f32 1.442695, %v813_v13 }
 0xdcf   : > { %1584 = vpow2.f32 %v814_v17 }
 0xdd5   : > { %v1585_v19 = vpop.eup %1584 }
 0xdd6   : > { %v816_v20 = vsel %vm402_vm9, %v1585_v19, 0.0 }
 0xdd7   : > { %817 = vadd.xlane.f32.xlu1 %v816_v20 }
 0xdf0   : > { %821 = vrot.lane.b32.xlu1 %v780_v1, %s1738_s22 }
 0xe4a   : > { %v818_v21 = vpop.xlane.xlu1 %817 }
 0xe4b   : > { %1586 = vrcp.f32 %v818_v21 }
 0xe51   : > { %v1587_v22 = vpop.eup %1586 }
 0xe52   : > { %v820_v24 = vmul.f32 %v1587_v22, %v1585_v19 }
 0xe62   : > { %v822_v23 = vpop.permute.xlu1 %821 }
 0xe63   : > { %842 = vmatpush.msra.mxu1 %v822_v23 }
 0xe64   : > { %1414 = vmatmul.msk.f32.vlgmr.msra.gmra.mxu1 %vm402_vm9, %v820_v24 }
 0xe65   :  { %970 = vmatpush.msra.mxu1 (%p774_p2), %v2132_v10 }
 0xe67   :  { %971 = vmatpush.msra.mxu1 (%p774_p2), %v2127_v8 }
 0xee1   : > { %v844_v25 = vpop.f32.mrf.mxu1 }
 0xee2   : > { %848 = vrot.lane.b32.xlu2 %v844_v25, %s1739_s23 }
 0xf39   :  { %776 = sbr.rel (!%p774_p2) target bundleno = 3161 (0xc59), region = 173 }
 0xf3c   : > { %v849_v26 = vpop.permute.xlu2 %848 }
 0xf3d   : > { %852 = vst.msk [vmem:[%s2209_s18] sm:$0xff] %vm444_vm10, %v849_v26 }
 0xf44   :  { %v853_v27 = vld [vmem:[#allocation4] sm:$0xff]  ;;  %v854_v28 = vld [vmem:[#allocation4 + $0x8] sm:$0xff] }
 0xf45   :  { %860 = vrot.lane.b32.xlu0 %v853_v27, %s1735_s3 }
 0xf4d   :  { %862 = vrot.lane.b32.xlu0 %v854_v28, %s1735_s3 }
 0xfb7   :  { %v861_v29 = vpop.permute.xlu0 %860 }
 0xfb8   :  { %1415 = vmatmul.msk.f32.vlgmr.msra.gmra.mxu0 %vm259_vm6, %v861_v29 }
 0xfbf   :  { %v863_v30 = vpop.permute.xlu0 %862 }
 0xfc0   :  { %1416 = vmatmul.msk.f32.vlgmr.msra.gmra.mxu3 %vm259_vm6, %v863_v30 }
0x1035   :  { %v885_v31 = vpop.f32.mrf.mxu0 }
0x1036   :  { %v886_v32 = vadd.f32 %v885_v31, %v856_v9 }
0x1038   :  { %v891_v10 = vadd.f32 %v886_v32, %v2168_v39 }
0x103a   :  { %v893_v33 = vsel %vm259_vm6, %v891_v10, 0.0 }
0x103b   :  { %894 = vadd.xlane.f32.xlu1 %v893_v33 }
0x1043   :  { %v888_v7 = vpop.f32.mrf.mxu3 }
0x1044   :  { %v889_v8 = vadd.f32 %v888_v7, %v856_v9  ;;  %v1036_v7 = vld [vmem:[%s2375_s10 + $0x8] sm:$0xff] }
0x1045   :  { %1061 = vmatpush.msra.mxu2 %v1036_v7 }
0x1046   :  { %v892_v34 = vadd.f32 %v889_v8, %v2176_v42  ;;  %v1035_v8 = vld [vmem:[%s2375_s10] sm:$0xff] }
0x1047   :  { %1062 = vmatpush.msra.mxu2 %v1035_v8 }
0x1048   :  { %v896_v35 = vsel %vm259_vm6, %v892_v34, 0.0 }
0x1049   :  { %897 = vadd.xlane.f32.xlu1 %v896_v35 }
0x10ae   :  { %v895_v36 = vpop.xlane.xlu1 %894 }
0x10af   :  { %v899_v37 = vmul.f32 %v895_v36, %v2077_v4 }
0x10b1   :  { %v901_v38 = vsub.f32 %v891_v10, %v899_v37 }
0x10b3   :  { %v903_v40 = vmul.f32 %v901_v38, %v901_v38 }
0x10b5   :  { %v905_v11 = vsel %vm259_vm6, %v903_v40, 0.0 }
0x10b6   :  { %906 = vadd.xlane.f32.xlu2 %v905_v11 }
0x10bc   :  { %v898_v63 = vpop.xlane.xlu1 %897 }
0x10bd   :  { %v900_v39 = vmul.f32 %v898_v63, %v2077_v4 }
0x10bf   :  { %v902_v0 = vsub.f32 %v892_v34, %v900_v39 }
0x10c1   :  { %v904_v41 = vmul.f32 %v902_v0, %v902_v0 }
0x10c3   :  { %v908_v60 = vsel %vm259_vm6, %v904_v41, 0.0 }
0x10c4   :  { %909 = vadd.xlane.f32.xlu2 %v908_v60 }
0x1129   :  { %v907_v42 = vpop.xlane.xlu2 %906 }
0x112a   :  { %v911_v43 = vmul.f32 %v907_v42, %v2077_v4  ;;  %v1026_v42 = vperm.slane %v2157_v16, 0 }
0x112c   :  { %v913_v61 = vadd.f32 1e-05, %v911_v43 }
0x112e   :  { %1589 = vrsqrt.f32 %v913_v61  ;;  %vm921_vm8 = vweird.f32 %v913_v61 }
0x1134   :  { %v1590_v44 = vpop.eup %1589 }
0x1135   :  { %v916_v45 = vmul.f32 %v1590_v44, %v913_v61  ;;  %vm922_vm7 = vweird.f32 %v1590_v44 }
0x1136   :  { %vm923_vm9 = vmor %vm921_vm8, %vm922_vm7 }
0x1137   :  { %v917_v46 = vmul.f32 %v1590_v44, %v916_v45  ;;  %v910_v47 = vpop.xlane.xlu2 %909 }
0x1138   :  { %v912_v48 = vmul.f32 %v910_v47, %v2077_v4 }
0x1139   :  { %v918_v49 = vmul.f32 0.5, %v917_v46 }
0x113a   :  { %v914_v50 = vadd.f32 1e-05, %v912_v48 }
0x113b   :  { %v919_v51 = vsub.f32 1.5, %v918_v49 }
0x113c   :  { %1591 = vrsqrt.f32 %v914_v50  ;;  %vm931_vm14 = vweird.f32 %v914_v50 }
0x113d   :  { %v920_v52 = vmul.f32 %v1590_v44, %v919_v51 }
0x113f   :  { %v924_v54 = vsel %vm923_vm9, %v1590_v44, %v920_v52  ;;  %v1031_v44 = vperm.slane %v2163_v18, 0  ;;  %v2269_v18 = vld [vmem:[%s2376_s11] sm:$0xff] }
0x1140   :  { %v935_v62 = vmul.f32 %v924_v54, %v901_v38 }
0x1142   :  { %v1592_v56 = vpop.eup %1591  ;;  %v940_v57 = vmul.f32 %v938_v53, %v935_v62  ;;  %v2274_v62 = vld [vmem:[%s2376_s11 + $0x8] sm:$0xff] }
0x1143   :  { %v926_v58 = vmul.f32 %v1592_v56, %v914_v50  ;;  %vm932_vm10 = vweird.f32 %v1592_v56 }
0x1144   :  { %v945_v1 = vadd.f32 %v943_v55, %v940_v57  ;;  %vm933_vm15 = vmor %vm931_vm14, %vm932_vm10 }
0x1145   :  { %v927_v2 = vmul.f32 %v1592_v56, %v926_v58 }
0x1146   :  { %1417 = vmatmul.msk.f32.vlgmr.msra.gmra.mxu1 %vm259_vm6, %v945_v1 }
0x1147   :  { %v928_v59 = vmul.f32 0.5, %v927_v2  ;;  %v2281_v2 = vmov 0.0  }
0x1149   :  { %v929_v3 = vsub.f32 1.5, %v928_v59  ;;  %v2283_v59 = vmov 0.0  }
0x114b   :  { %v930_v5 = vmul.f32 %v1592_v56, %v929_v3 }
0x114d   :  { %v934_v6 = vsel %vm933_vm15, %v1592_v56, %v930_v5 }
0x114e   :  { %v936_v13 = vmul.f32 %v934_v6, %v902_v0 }
0x1150   :  { %v941_v12 = vmul.f32 %v938_v53, %v936_v13 }
0x1152   :  { %v946_v17 = vadd.f32 %v943_v55, %v941_v12  ;;  %v1588_v55 = vld [vmem:[%s2377_s12] ss:$0 sm:$0xff] }
0x1154   :  { %1418 = vmatmul.msk.f32.gmra.mxu1 %vm259_vm6, %v946_v17 }
0x11c3   :  { %v973_v19 = vpop.f32.mrf.mxu1 }
0x11c4   :  { %v974_v20 = vadd.f32 %v973_v19, %v948_v14 }
0x11c6   :  { %v979_v21 = vadd.f32 %v974_v20, %v945_v1 }
0x11c8   :  { %v981_v22 = vsel %vm259_vm6, %v979_v21, 0.0 }
0x11c9   :  { %982 = vadd.xlane.f32.xlu0 %v981_v22 }
0x11d1   :  { %v976_v23 = vpop.f32.mrf.mxu1 }
0x11d2   :  { %v977_v24 = vadd.f32 %v976_v23, %v948_v14 }
0x11d4   :  { %v980_v25 = vadd.f32 %v977_v24, %v946_v17 }
0x11d6   :  { %v984_v26 = vsel %vm259_vm6, %v980_v25, 0.0 }
0x11d7   :  { %985 = vadd.xlane.f32.xlu1 %v984_v26 }
0x123c   :  { %v983_v27 = vpop.xlane.xlu0 %982 }
0x123d   :  { %v987_v28 = vmul.f32 %v983_v27, %v2077_v4 }
0x123f   :  { %v989_v29 = vsub.f32 %v979_v21, %v987_v28 }
0x1241   :  { %v991_v30 = vmul.f32 %v989_v29, %v989_v29 }
0x1243   :  { %v993_v9 = vsel %vm259_vm6, %v991_v30, 0.0 }
0x1244   :  { %994 = vadd.xlane.f32.xlu2 %v993_v9 }
0x124a   :  { %v986_v15 = vpop.xlane.xlu1 %985 }
0x124b   :  { %v988_v31 = vmul.f32 %v986_v15, %v2077_v4 }
0x124d   :  { %v990_v32 = vsub.f32 %v980_v25, %v988_v31 }
0x124f   :  { %v992_v10 = vmul.f32 %v990_v32, %v990_v32 }
0x1251   :  { %v996_v33 = vsel %vm259_vm6, %v992_v10, 0.0 }
0x1252   :  { %997 = vadd.xlane.f32.xlu1 %v996_v33 }
0x12b7   :  { %v995_v34 = vpop.xlane.xlu2 %994 }
0x12b8   :  { %v999_v35 = vmul.f32 %v995_v34, %v2077_v4 }
0x12ba   :  { %v1001_v36 = vadd.f32 1e-05, %v999_v35 }
0x12bc   :  { %1593 = vrsqrt.f32 %v1001_v36  ;;  %vm1009_vm2 = vweird.f32 %v1001_v36 }
0x12c2   :  { %v1594_v37 = vpop.eup %1593 }
0x12c3   :  { %v1004_v38 = vmul.f32 %v1594_v37, %v1001_v36  ;;  %vm1010_vm1 = vweird.f32 %v1594_v37 }
0x12c4   :  { %vm1011_vm3 = vmor %vm1009_vm2, %vm1010_vm1 }
0x12c5   :  { %v1005_v40 = vmul.f32 %v1594_v37, %v1004_v38  ;;  %v998_v11 = vpop.xlane.xlu1 %997 }
0x12c6   :  { %v1000_v63 = vmul.f32 %v998_v11, %v2077_v4 }
0x12c7   :  { %v1006_v39 = vmul.f32 0.5, %v1005_v40 }
0x12c8   :  { %v1002_v0 = vadd.f32 1e-05, %v1000_v63 }
0x12c9   :  { %v1007_v41 = vsub.f32 1.5, %v1006_v39 }
0x12ca   :  { %1595 = vrsqrt.f32 %v1002_v0  ;;  %vm1019_vm5 = vweird.f32 %v1002_v0 }
0x12cb   :  { %v1008_v60 = vmul.f32 %v1594_v37, %v1007_v41 }
0x12cd   :  { %v1012_v43 = vsel %vm1011_vm3, %v1594_v37, %v1008_v60 }
0x12ce   :  { %v1023_v61 = vmul.f32 %v1012_v43, %v989_v29 }
0x12d0   :  { %v1596_v45 = vpop.eup %1595  ;;  %v1028_v46 = vmul.f32 %v1026_v42, %v1023_v61 }
0x12d1   :  { %v1014_v47 = vmul.f32 %v1596_v45, %v1002_v0  ;;  %vm1020_vm4 = vweird.f32 %v1596_v45 }
0x12d2   :  { %v1033_v48 = vadd.f32 %v1031_v44, %v1028_v46  ;;  %vm1021_vm11 = vmor %vm1019_vm5, %vm1020_vm4 }
0x12d3   :  { %v1015_v49 = vmul.f32 %v1596_v45, %v1014_v47 }
0x12d4   :  { %1419 = vmatmul.msk.f32.vlgmr.msra.gmra.mxu2 %vm259_vm6, %v1033_v48 }
0x12d5   :  { %v1016_v4 = vmul.f32 0.5, %v1015_v49 }
0x12d7   :  { %v1017_v50 = vsub.f32 1.5, %v1016_v4 }
0x12d9   :  { %v1018_v51 = vmul.f32 %v1596_v45, %v1017_v50 }
0x12db   :  { %v1022_v52 = vsel %vm1021_vm11, %v1596_v45, %v1018_v51 }
0x12dc   :  { %v1024_v53 = vmul.f32 %v1022_v52, %v990_v32 }
0x12de   :  { %v1029_v16 = vmul.f32 %v1026_v42, %v1024_v53 }
0x12e0   :  { %v1034_v54 = vadd.f32 %v1031_v44, %v1029_v16 }
0x12e2   :  { %1420 = vmatmul.msk.f32.gmra.mxu2 %vm259_vm6, %v1034_v54 }
0x1357   :  { %v1064_v56 = vpop.f32.mrf.mxu2 }
0x1358   :  { %v1065_v57 = vadd.f32 %v1588_v55, %v1064_v56 }
0x135a   :  { %1070 = vst.msk [vmem:[#allocation2] sm:$0xff] %vm68_vm0, %v1065_v57 }
0x1365   :  { %v1067_v58 = vpop.f32.mrf.mxu2 }
0x1366   :  { %v1068_v1 = vadd.f32 %v1588_v55, %v1067_v58 }
0x1368   :  { %1071 = vst.msk [vmem:[#allocation2 + $0x8] sm:$0xff] %vm68_vm0, %v1068_v1 }
0x1369 LB: > { %1104 = vmatpush.msra.mxu0 %v2274_v62  ;;  %s1740_s11 = smov 80   ;;  %s1421_s12 = sshll.u32 %s1714_s1, 3  ;;  %s1714_s1 = sphi %s2285_s1, %s1079_s1   ;;  %v1710_v59 = vphi %v2283_v59, %v1147_v59   ;;  %v1706_v2 = vphi %v2281_v2, %v1141_v2  }
0x136a   : > { %1086 = vrot.lane.b32.xlu0 %v1710_v59, %s1740_s11  ;;  %s1083_s29 = scalar_lea.vmem [#allocation2], %s1421_s12  ;;  %s1741_s30 = smov 96  }
0x136b   : > { %1105 = vmatpush.msra.mxu0 %v2269_v18  ;;  %s1742_s0 = smov 16   ;;  %s1743_s7 = smov 32  }
0x136c   : > { %s1152_s19 = scalar_lea.vmem [#allocation3], %s1421_s12  ;;  %s1079_s1 = sadd.s32 1, %s1714_s1  }
0x136d   : > { %p1076_p3 = scmp.ge.s32.totalorder %s1079_s1, 2  }
0x136e   :  { %v1157_v7 = vld [vmem:[%s2378_s13 + $0x8] sm:$0xff] (%p1076_p3)  ;;  %v1156_v8 = vld [vmem:[%s2378_s13] sm:$0xff] (%p1076_p3)  ;;  %v2333_v0 = vmov (%p1076_p3), 0.0   ;;  %v2335_v41 = vmov (%p1076_p3), 0.0   ;;  %s2337_s3 = smov (%p1076_p3), 0  }
0x136f   : > { %v1084_v5 = vld [vmem:[%s1083_s29] sm:$0xff]  ;;  %1441 = vmatpush.msra.mxu1 (%p1076_p3), %v1157_v7  ;;  %v2326_v37 = vld [vmem:[%s2379_s14 + $0x8] sm:$0xff] (%p1076_p3) }
0x1370   :  { %v2321_v36 = vld [vmem:[%s2379_s14] sm:$0xff] (%p1076_p3) }
0x1371   :  { %1442 = vmatpush.msra.mxu1 (%p1076_p3), %v1156_v8  ;;  %v1605_v38 = vld [vmem:[%s2380_s15] ss:$0 sm:$0xff] (%p1076_p3) }
0x13dc   : > { %v1087_v3 = vpop.permute.xlu0 %1086 }
0x13dd   : > { %1422 = vmatmul.msk.f32.vlgmr.msra.gmra.mxu0 %vm259_vm6, %v1087_v3 }
0x13de   :  { %1182 = vmatpush.msra.mxu0 (%p1076_p3), %v1157_v7 }
0x13e0   :  { %1183 = vmatpush.msra.mxu0 (%p1076_p3), %v1156_v8 }
0x145a   : > { %v1107_v6 = vpop.f32.mrf.mxu0 }
0x145b   : > { %v1110_v13 = vadd.f32 %v1107_v6, %v1084_v5 }
0x145d   : > { %1597 = vtanh.f32 %v1110_v13  ;;  %v1423_v17 = vmul.f32 -1.442695, %v1110_v13 }
0x145f   : > { %1599 = vpow2.f32 %v1423_v17 }
0x1463   : > { %v1598_v12 = vpop.eup %1597 }
0x1464   : > { %1133 = vrot.lane.b32.xlu0 %v1598_v12, %s1741_s30 }
0x1465   : > { %v1600_v14 = vpop.eup %1599 }
0x1466   : > { %v1114_v19 = vadd.f32 1.0, %v1600_v14 }
0x1468   : > { %1601 = vrcp.f32 %v1114_v19  ;;  %v1126_v25 = vand.u32 2147483648, %v1114_v19  ;;  %vm1120_vm13 = vweird.f32 %v1114_v19  ;;  %v1124_v26 = vand.u32 2147483647, %v1114_v19 }
0x146a   : > { %v1127_v28 = vor.u32 1.1754944e-38, %v1126_v25  ;;  %vm1125_vm8 = vcmp.eq.f32.partialorder %v1124_v26, 8.507059e+37 }
0x146e   : > { %v1602_v20 = vpop.eup %1601 }
0x146f   : > { %v1116_v21 = vmul.f32 %v1602_v20, %v1114_v19  ;;  %vm1121_vm12 = vweird.f32 %v1602_v20 }
0x1470   : > { %vm1122_vm7 = vmor %vm1120_vm13, %vm1121_vm12 }
0x1471   : > { %v1117_v22 = vsub.f32 1.0, %v1116_v21 }
0x1473   : > { %v1118_v23 = vmul.f32 %v1602_v20, %v1117_v22 }
0x1475   : > { %v1119_v24 = vadd.f32 %v1602_v20, %v1118_v23 }
0x1477   : > { %v1123_v27 = vsel %vm1122_vm7, %v1602_v20, %v1119_v24 }
0x1478   : > { %v1128_v30 = vsel %vm1125_vm8, %v1127_v28, %v1123_v27 }
0x1479   : > { %v1131_v15 = vmul.f32 %v1706_v2, %v1128_v30 }
0x14d6   : > { %v1134_v29 = vpop.permute.xlu0 %1133 }
0x14d7   : > { %v1136_v9 = vmul.f32 %v1134_v29, %v1128_v30 }
0x14d9   : > { %1138 = vrot.lane.b32.xlu1 %v1136_v9, %s1742_s0 }
0x154b   : > { %v1139_v31 = vpop.permute.xlu1 %1138 }
0x154c   : > { %v1141_v2 = vadd.f32 %v1139_v31, %v1131_v15  }
0x154e   : > { %1603 = vtanh.f32 %v1141_v2 }
0x1554   : > { %v1604_v32 = vpop.eup %1603 }
0x1555   : > { %1144 = vrot.lane.b32.xlu1 %v1604_v32, %s1743_s7 }
0x15c7   : > { %v1145_v10 = vpop.permute.xlu1 %1144 }
0x15c8   : > { %v1147_v59 = vmul.f32 %v1145_v10, %v1128_v30  }
0x15ca   : > { %1149 = vrot.lane.b32.xlu2 %v1147_v59, %s1740_s11 }
0x1621   :  { %1078 = sbr.rel (!%p1076_p3) target bundleno = 4969 (0x1369), region = 184 }
0x1624   : > { %v1150_v33 = vpop.permute.xlu2 %1149 }
0x1625   : > { %1153 = vst.msk [vmem:[%s1152_s19] sm:$0xff] %vm259_vm6, %v1150_v33 }
0x162c   :  { %v1154_v34 = vld [vmem:[#allocation3] sm:$0xff]  ;;  %v1155_v35 = vld [vmem:[#allocation3 + $0x8] sm:$0xff] }
0x162d   :  { %1424 = vmatmul.msk.f32.vlgmr.msra.gmra.mxu0 %vm259_vm6, %v1154_v34  ;;  %1425 = vmatmul.msk.f32.vlgmr.msra.gmra.mxu1 %vm259_vm6, %v1155_v35 }
0x16aa   :  { %v1185_v40 = vpop.f32.mrf.mxu0  ;;  %v1188_v11 = vpop.f32.mrf.mxu1 }
0x16ab   :  { %v1186_v63 = vadd.f32 %v1605_v38, %v1185_v40  ;;  %v1189_v39 = vadd.f32 %v1605_v38, %v1188_v11 }
0x16ad   :  { %1191 = vst.msk [vmem:[#allocation2] sm:$0xff] %vm68_vm0, %v1186_v63 }
0x16ae   :  { %1192 = vst.msk [vmem:[#allocation2 + $0x8] sm:$0xff] %vm68_vm0, %v1189_v39 }
0x16af LB: > { %1225 = vmatpush.msra.mxu0 %v2326_v37  ;;  %s1744_s14 = smov 80   ;;  %s1426_s15 = sshll.u32 %s1726_s3, 3  ;;  %s1726_s3 = sphi %s2337_s3, %s1200_s3   ;;  %v1722_v41 = vphi %v2335_v41, %v1268_v41   ;;  %v1718_v0 = vphi %v2333_v0, %v1262_v0  }
0x16b0   : > { %1207 = vrot.lane.b32.xlu0 %v1722_v41, %s1744_s14  ;;  %s1204_s24 = scalar_lea.vmem [#allocation2], %s1426_s15  ;;  %s1745_s25 = smov 96  }
0x16b1   : > { %1226 = vmatpush.msra.mxu0 %v2321_v36  ;;  %s1746_s26 = smov 16   ;;  %s1747_s10 = smov 32  }
0x16b2   : > { %s1273_s27 = scalar_lea.vmem [#allocation5], %s1426_s15  ;;  %s1200_s3 = sadd.s32 1, %s1726_s3  }
0x16b3   : > { %p1197_p4 = scmp.ge.s32.totalorder %s1200_s3, 2  }
0x16b4   :  { %s1281_s6 = sshll.u32 (%p1197_p4), %s2381_s16, 4  ;;  %s1748_s8 = smov (%p1197_p4), [#allocation5]   ;;  %s1282_s6 = int_to_ptr.hbm [resolvable:$true] %s1281_s6 }
0x16b5   : > { %v1205_v42 = vld [vmem:[%s1204_s24] sm:$0xff]  ;;  %s1279_s1 = sshll.u32 (%p1197_p4), %s1748_s8, 4  ;;  %s1749_s11 = smov (%p1197_p4), 128   ;;  %s1280_s1 = int_to_ptr.vmem [resolvable:$true] %s1279_s1 }
0x16b6   :  { %s1750_s12 = smov (%p1197_p4), 8  }
0x1722   : > { %v1208_v60 = vpop.permute.xlu0 %1207 }
0x1723   : > { %1427 = vmatmul.msk.f32.vlgmr.msra.gmra.mxu0 %vm259_vm6, %v1208_v60 }
0x17a0   : > { %v1228_v43 = vpop.f32.mrf.mxu0 }
0x17a1   : > { %v1231_v61 = vadd.f32 %v1228_v43, %v1205_v42 }
0x17a3   : > { %1606 = vtanh.f32 %v1231_v61  ;;  %v1428_v45 = vmul.f32 -1.442695, %v1231_v61 }
0x17a5   : > { %1608 = vpow2.f32 %v1428_v45 }
0x17a9   : > { %v1607_v44 = vpop.eup %1606 }
0x17aa   : > { %1254 = vrot.lane.b32.xlu0 %v1607_v44, %s1745_s25 }
0x17ab   : > { %v1609_v46 = vpop.eup %1608 }
0x17ac   : > { %v1235_v47 = vadd.f32 1.0, %v1609_v46 }
0x17ae   : > { %1610 = vrcp.f32 %v1235_v47  ;;  %v1247_v52 = vand.u32 2147483648, %v1235_v47  ;;  %vm1241_vm9 = vweird.f32 %v1235_v47  ;;  %v1245_v53 = vand.u32 2147483647, %v1235_v47 }
0x17b0   : > { %v1248_v54 = vor.u32 1.1754944e-38, %v1247_v52  ;;  %vm1246_vm14 = vcmp.eq.f32.partialorder %v1245_v53, 8.507059e+37 }
0x17b4   : > { %v1611_v48 = vpop.eup %1610 }
0x17b5   : > { %v1237_v49 = vmul.f32 %v1611_v48, %v1235_v47  ;;  %vm1242_vm0 = vweird.f32 %v1611_v48 }
0x17b6   : > { %vm1243_vm10 = vmor %vm1241_vm9, %vm1242_vm0 }
0x17b7   : > { %v1238_v4 = vsub.f32 1.0, %v1237_v49 }
0x17b9   : > { %v1239_v50 = vmul.f32 %v1611_v48, %v1238_v4 }
0x17bb   : > { %v1240_v51 = vadd.f32 %v1611_v48, %v1239_v50 }
0x17bd   : > { %v1244_v16 = vsel %vm1243_vm10, %v1611_v48, %v1240_v51 }
0x17be   : > { %v1249_v62 = vsel %vm1246_vm14, %v1248_v54, %v1244_v16 }
0x17bf   : > { %v1252_v56 = vmul.f32 %v1718_v0, %v1249_v62 }
0x181c   : > { %v1255_v18 = vpop.permute.xlu0 %1254 }
0x181d   : > { %v1257_v55 = vmul.f32 %v1255_v18, %v1249_v62 }
0x181f   : > { %1259 = vrot.lane.b32.xlu1 %v1257_v55, %s1746_s26 }
0x1891   : > { %v1260_v57 = vpop.permute.xlu1 %1259 }
0x1892   : > { %v1262_v0 = vadd.f32 %v1260_v57, %v1252_v56  }
0x1894   : > { %1612 = vtanh.f32 %v1262_v0 }
0x189a   : > { %v1613_v58 = vpop.eup %1612 }
0x189b   : > { %1265 = vrot.lane.b32.xlu1 %v1613_v58, %s1747_s10 }
0x190d   : > { %v1266_v1 = vpop.permute.xlu1 %1265 }
0x190e   : > { %v1268_v41 = vmul.f32 %v1266_v1, %v1249_v62  }
0x1910   : > { %1270 = vrot.lane.b32.xlu2 %v1268_v41, %s1744_s14 }
0x1967   :  { %1199 = sbr.rel (!%p1197_p4) target bundleno = 5807 (0x16af), region = 195 }
0x196a   : > { %v1271_v2 = vpop.permute.xlu2 %1270 }
0x196b   : > { %1274 = vst.msk [vmem:[%s1273_s27] sm:$0xff] %vm259_vm6, %v1271_v2 }
0x196c   :  { %1287 = dma.vmem_to_hbm [thread:$0]  %s1280_s1, 256, %s1282_s6, [#allocation6], %s1749_s11, %s1749_s11, %s1750_s12  }
0x196d   :  { %1682 = dma.done.wait [#allocation6], 256  }
0x196e   :  { %1683 = vsyncadd [#allocation6], 4294967040 }
0x196f   :  { %1292 = vsyncpa [#allocation6], 1 }

// kernel: eq_transformer_encoder.2
= control target key start
LH: loop header
LB: loop body
LE: loop exit
PB: predicated region body
PF: predicated region fallthrough
CT: control target
= control target key end

     0   :  { %s4937_s0 = inlined_call_operand.vmem [shape: f32[2048,8], index: 0, kind: input, shape index: {}]   ;;  %s4938_s1 = inlined_call_operand.vmem [shape: f32[8,8], index: 1, kind: input, shape index: {}]   ;;  %s4939_s2 = inlined_call_operand.vmem [shape: f32[1,8], index: 2, kind: input, shape index: {}]   ;;  %s4940_s3 = inlined_call_operand.vmem [shape: f32[8,16], index: 3, kind: input, shape index: {}]   ;;  %s4941_s4 = inlined_call_operand.vmem [shape: f32[1,16], index: 4, kind: input, shape index: {}]   ;;  %s4942_s5 = inlined_call_operand.vmem [shape: f32[16,16], index: 5, kind: input, shape index: {}]   ;;  %s4943_s6 = inlined_call_operand.vmem [shape: f32[1,16], index: 6, kind: input, shape index: {}]   ;;  %s4944_s7 = inlined_call_operand.vmem [shape: f32[16,32], index: 7, kind: input, shape index: {}]   ;;  %s4945_s8 = inlined_call_operand.vmem [shape: f32[1,32], index: 8, kind: input, shape index: {}]   ;;  %s4946_s9 = inlined_call_operand.vmem [shape: f32[32,32], index: 9, kind: input, shape index: {}]   ;;  %s4947_s10 = inlined_call_operand.vmem [shape: f32[1,32], index: 10, kind: input, shape index: {}]   ;;  %s4948_s11 = inlined_call_operand.vmem [shape: f32[32,64], index: 11, kind: input, shape index: {}]   ;;  %s4949_s12 = inlined_call_operand.vmem [shape: f32[1,64], index: 12, kind: input, shape index: {}]   ;;  %s4950_s13 = inlined_call_operand.vmem [shape: f32[64,64], index: 13, kind: input, shape index: {}]   ;;  %s4951_s14 = inlined_call_operand.vmem [shape: f32[1,64], index: 14, kind: input, shape index: {}]   ;;  %s4952_s15 = inlined_call_operand.vmem [shape: f32[2,64,64], index: 15, kind: input, shape index: {}]   ;;  %s4953_s16 = inlined_call_operand.vmem [shape: f32[6,1,64], index: 16, kind: input, shape index: {}]   ;;  %s4954_s17 = inlined_call_operand.vmem [shape: f32[2,64,64], index: 17, kind: input, shape index: {}]   ;;  %s4955_s18 = inlined_call_operand.vmem [shape: f32[6,1,64], index: 18, kind: input, shape index: {}]   ;;  %s4956_s19 = inlined_call_operand.vmem [shape: f32[16,64], index: 19, kind: output, shape index: {}]  }
   0x1   :  { %4958 = sst [smem:[#allocation3_spill]] %s4937_s0  ;;  %s4053_s0 = smov 0  }
   0x2   :  { %4959 = sst [smem:[#allocation4_spill]] %s4938_s1 }
   0x3   :  { %4960 = sst [smem:[#allocation5_spill]] %s4939_s2 }
   0x4   :  { %4961 = sst [smem:[#allocation6_spill]] %s4940_s3 }
   0x5 LB: > { %s4059_s30 = sadd.s32 4294967295, %s3951_s0   ;;  %p3499_p0 = scmp.ge.s32.totalorder %s3951_s0, 1  ;;  %s3951_s0 = sphi %s4053_s0, %s29_s0  }
   0x6   : > { %p538_p1 = scmp.lt.s32.totalorder %s3951_s0, 3 }
   0x8   : > { %p539_p2 = pnand %p3499_p0, %p538_p1 }
   0x9   : > { %s4962_s1 = sld [smem:[#allocation4_spill]] (!%p539_p2)  ;;  %s3500_s22 = sshll.u32 (!%p539_p2), %s4059_s30, 7 }
   0xa   : > { %542 = sbr.rel (%p539_p2) target bundleno = 2070 (0x816), region = 96  ;;  %p594_p3 = scmp.lt.s32.totalorder (!%p539_p2), %s3500_s22, 255 }
   0xb   : > { %s4963_s25 = sld [smem:[#allocation3_spill]] (!%p539_p2)  ;;  %p599_p4 = scmp.lt.s32.totalorder (!%p539_p2), %s4059_s30, 1 }
   0xc   : > { %s4964_s28 = sld [smem:[#allocation6_spill]] (!%p539_p2) }
   0xd   : > { %s4965_s21 = sld [smem:[#allocation5_spill]] (!%p539_p2) }
   0xf   : > { %v858_v0 = vld [vmem:[%s4962_s1] sm:$0xff]  ;;  %s4967_s22 = smov (!%p594_p3, %s3500_s22), 255  ;;  %vm859_vm0 = vcmask 64512   ;;  %vm2472_vm1 = vcmask 130048   ;;  %vm2985_vm2 = vcmask 261120   ;;  %vm3178_vm3 = vcmask 523264  }
  0x10   : > { %1067 = vmatpush.msra.mxu0 %v858_v0  ;;  %1468 = vmatpush.msra.mxu1 %v858_v0  ;;  %s3501_s2 = sshll.u32 %s4967_s22, 3  ;;  %s4969_s30 = smov (!%p599_p4, %s4059_s30), 1 }
  0x11   : > { %s4070_s3 = scalar_lea.vmem %s4963_s25, %s3501_s2  ;;  %s3502_s1 = sshll.u32 %s4969_s30, 3 }
  0x12   : > { %v603_v1 = vld [vmem:[%s4070_s3] ss:$2 sm:$0xff]  ;;  %v3566_v2 = vld [vmem:[%s4070_s3 + $0x1] ss:$2 sm:$0xff]  ;;  %v3503_v3 = vld [vmem:[%s4070_s3 + $0x10] ss:$2 sm:$0xff]  ;;  %s602_s23 = scalar_lea.vmem %s4956_s19, %s3502_s1 }
  0x13   : > { %3630 = vmatmul.msk.f32.vlgmr.msra.gmra.mxu0 %vm859_vm0, %v603_v1  ;;  %3694 = vmatmul.msk.f32.vlgmr.msra.gmra.mxu1 %vm859_vm0, %v3566_v2  ;;  %v3567_v4 = vld [vmem:[%s4070_s3 + $0x11] ss:$2 sm:$0xff]  ;;  %v3504_v5 = vld [vmem:[%s4070_s3 + $0x20] ss:$2 sm:$0xff]  ;;  %v3568_v6 = vld [vmem:[%s4070_s3 + $0x21] ss:$2 sm:$0xff] }
  0x14   : > { %v3505_v7 = vld [vmem:[%s4070_s3 + $0x30] ss:$2 sm:$0xff]  ;;  %v3569_v8 = vld [vmem:[%s4070_s3 + $0x31] ss:$2 sm:$0xff]  ;;  %v3506_v9 = vld [vmem:[%s4070_s3 + $0x40] ss:$2 sm:$0xff] }
  0x15   : > { %v3570_v10 = vld [vmem:[%s4070_s3 + $0x41] ss:$2 sm:$0xff]  ;;  %v3507_v11 = vld [vmem:[%s4070_s3 + $0x50] ss:$2 sm:$0xff]  ;;  %v3571_v12 = vld [vmem:[%s4070_s3 + $0x51] ss:$2 sm:$0xff] }
  0x16   : > { %v3508_v13 = vld [vmem:[%s4070_s3 + $0x60] ss:$2 sm:$0xff]  ;;  %v3572_v14 = vld [vmem:[%s4070_s3 + $0x61] ss:$2 sm:$0xff]  ;;  %v3509_v15 = vld [vmem:[%s4070_s3 + $0x70] ss:$2 sm:$0xff] }
  0x17   : > { %v3573_v16 = vld [vmem:[%s4070_s3 + $0x71] ss:$2 sm:$0xff]  ;;  %v3510_v17 = vld [vmem:[%s4070_s3 + $0x80] ss:$2 sm:$0xff]  ;;  %v3574_v18 = vld [vmem:[%s4070_s3 + $0x81] ss:$2 sm:$0xff] }
  0x18   : > { %v3511_v19 = vld [vmem:[%s4070_s3 + $0x90] ss:$2 sm:$0xff]  ;;  %v3575_v20 = vld [vmem:[%s4070_s3 + $0x91] ss:$2 sm:$0xff]  ;;  %v3512_v21 = vld [vmem:[%s4070_s3 + $0xa0] ss:$2 sm:$0xff] }
  0x19   : > { %v3576_v22 = vld [vmem:[%s4070_s3 + $0xa1] ss:$2 sm:$0xff]  ;;  %v3513_v23 = vld [vmem:[%s4070_s3 + $0xb0] ss:$2 sm:$0xff]  ;;  %v3577_v24 = vld [vmem:[%s4070_s3 + $0xb1] ss:$2 sm:$0xff] }
  0x1a   : > { %v3514_v25 = vld [vmem:[%s4070_s3 + $0xc0] ss:$2 sm:$0xff]  ;;  %v3578_v26 = vld [vmem:[%s4070_s3 + $0xc1] ss:$2 sm:$0xff]  ;;  %v3515_v27 = vld [vmem:[%s4070_s3 + $0xd0] ss:$2 sm:$0xff] }
  0x1b   : > { %3631 = vmatmul.msk.f32.gmra.mxu0 %vm859_vm0, %v3503_v3  ;;  %3695 = vmatmul.msk.f32.gmra.mxu1 %vm859_vm0, %v3567_v4  ;;  %v3579_v28 = vld [vmem:[%s4070_s3 + $0xd1] ss:$2 sm:$0xff]  ;;  %v3516_v29 = vld [vmem:[%s4070_s3 + $0xe0] ss:$2 sm:$0xff]  ;;  %v3580_v30 = vld [vmem:[%s4070_s3 + $0xe1] ss:$2 sm:$0xff] }
  0x1c   : > { %v1985_v31 = vld [vmem:[%s4964_s28] sm:$0xff]  ;;  %v3517_v32 = vld [vmem:[%s4070_s3 + $0xf0] ss:$2 sm:$0xff]  ;;  %v3581_v33 = vld [vmem:[%s4070_s3 + $0xf1] ss:$2 sm:$0xff] }
  0x1d   : > { %2097 = vmatpush.msra.mxu2 %v1985_v31  ;;  %2306 = vmatpush.msra.mxu3 %v1985_v31  ;;  %v4142_v34 = vld [vmem:[%s4965_s21] ss:$0 sm:$0xff]  ;;  %v3582_v38 = vld [vmem:[%s4070_s3 + $0x101] ss:$2 sm:$0xff]  ;;  %v3519_v43 = vld [vmem:[%s4070_s3 + $0x110] ss:$2 sm:$0xff] }
  0x1e   : > { %v3518_v37 = vld [vmem:[%s4070_s3 + $0x100] ss:$2 sm:$0xff]  ;;  %v3583_v44 = vld [vmem:[%s4070_s3 + $0x111] ss:$2 sm:$0xff]  ;;  %v3584_v50 = vld [vmem:[%s4070_s3 + $0x121] ss:$2 sm:$0xff] }
  0x1f   : > { %v3520_v49 = vld [vmem:[%s4070_s3 + $0x120] ss:$2 sm:$0xff]  ;;  %v3521_v57 = vld [vmem:[%s4070_s3 + $0x130] ss:$2 sm:$0xff]  ;;  %v3585_v58 = vld [vmem:[%s4070_s3 + $0x131] ss:$2 sm:$0xff] }
  0x20   : > { %v3522_v63 = vld [vmem:[%s4070_s3 + $0x140] ss:$2 sm:$0xff]  ;;  %v3586_v0 = vld [vmem:[%s4070_s3 + $0x141] ss:$2 sm:$0xff] }
  0x23   : > { %3632 = vmatmul.msk.f32.gmra.mxu0 %vm859_vm0, %v3504_v5  ;;  %3696 = vmatmul.msk.f32.gmra.mxu1 %vm859_vm0, %v3568_v6 }
  0x2b   : > { %3633 = vmatmul.msk.f32.gmra.mxu0 %vm859_vm0, %v3505_v7  ;;  %3697 = vmatmul.msk.f32.gmra.mxu1 %vm859_vm0, %v3569_v8  ;;  %v3523_v7 = vld [vmem:[%s4070_s3 + $0x150] ss:$2 sm:$0xff]  ;;  %v3587_v8 = vld [vmem:[%s4070_s3 + $0x151] ss:$2 sm:$0xff] }
  0x33   : > { %3634 = vmatmul.msk.f32.gmra.mxu0 %vm859_vm0, %v3506_v9  ;;  %3698 = vmatmul.msk.f32.gmra.mxu1 %vm859_vm0, %v3570_v10 }
  0x3b   : > { %3635 = vmatmul.msk.f32.gmra.mxu0 %vm859_vm0, %v3507_v11  ;;  %3699 = vmatmul.msk.f32.gmra.mxu1 %vm859_vm0, %v3571_v12 }
  0x43   : > { %3636 = vmatmul.msk.f32.gmra.mxu0 %vm859_vm0, %v3508_v13  ;;  %3700 = vmatmul.msk.f32.gmra.mxu1 %vm859_vm0, %v3572_v14  ;;  %v3524_v13 = vld [vmem:[%s4070_s3 + $0x160] ss:$2 sm:$0xff]  ;;  %v3588_v14 = vld [vmem:[%s4070_s3 + $0x161] ss:$2 sm:$0xff] }
  0x4b   : > { %3637 = vmatmul.msk.f32.gmra.mxu0 %vm859_vm0, %v3509_v15  ;;  %3701 = vmatmul.msk.f32.gmra.mxu1 %vm859_vm0, %v3573_v16 }
  0x53   : > { %3638 = vmatmul.msk.f32.gmra.mxu0 %vm859_vm0, %v3510_v17  ;;  %3702 = vmatmul.msk.f32.gmra.mxu1 %vm859_vm0, %v3574_v18 }
  0x5b   : > { %3639 = vmatmul.msk.f32.gmra.mxu0 %vm859_vm0, %v3511_v19  ;;  %3703 = vmatmul.msk.f32.gmra.mxu1 %vm859_vm0, %v3575_v20 }
  0x63   : > { %3640 = vmatmul.msk.f32.gmra.mxu0 %vm859_vm0, %v3512_v21  ;;  %3704 = vmatmul.msk.f32.gmra.mxu1 %vm859_vm0, %v3576_v22  ;;  %v3525_v21 = vld [vmem:[%s4070_s3 + $0x170] ss:$2 sm:$0xff]  ;;  %v3589_v22 = vld [vmem:[%s4070_s3 + $0x171] ss:$2 sm:$0xff] }
  0x6b   : > { %3641 = vmatmul.msk.f32.gmra.mxu0 %vm859_vm0, %v3513_v23  ;;  %3705 = vmatmul.msk.f32.gmra.mxu1 %vm859_vm0, %v3577_v24 }
  0x73   : > { %3642 = vmatmul.msk.f32.gmra.mxu0 %vm859_vm0, %v3514_v25  ;;  %3706 = vmatmul.msk.f32.gmra.mxu1 %vm859_vm0, %v3578_v26 }
  0x7b   : > { %3643 = vmatmul.msk.f32.gmra.mxu0 %vm859_vm0, %v3515_v27  ;;  %3707 = vmatmul.msk.f32.gmra.mxu1 %vm859_vm0, %v3579_v28  ;;  %v3526_v27 = vld [vmem:[%s4070_s3 + $0x180] ss:$2 sm:$0xff]  ;;  %v3590_v28 = vld [vmem:[%s4070_s3 + $0x181] ss:$2 sm:$0xff] }
  0x83   : > { %3644 = vmatmul.msk.f32.gmra.mxu0 %vm859_vm0, %v3516_v29  ;;  %3708 = vmatmul.msk.f32.gmra.mxu1 %vm859_vm0, %v3580_v30 }
  0x8b   : > { %3645 = vmatmul.msk.f32.gmra.mxu0 %vm859_vm0, %v3517_v32  ;;  %3709 = vmatmul.msk.f32.gmra.mxu1 %vm859_vm0, %v3581_v33 }
  0x90   : > { %v1069_v35 = vpop.f32.mrf.mxu0  ;;  %v1470_v36 = vpop.f32.mrf.mxu1 }
  0x91   : > { %v1662_v39 = vmax.f32 %v1069_v35, %v1470_v36  ;;  %v3527_v36 = vld [vmem:[%s4070_s3 + $0x190] ss:$2 sm:$0xff] }
  0x93   : > { %v1730_v40 = vadd.f32 %v4142_v34, %v1662_v39  ;;  %3646 = vmatmul.msk.f32.gmra.mxu0 %vm859_vm0, %v3518_v37  ;;  %3710 = vmatmul.msk.f32.gmra.mxu1 %vm859_vm0, %v3582_v38  ;;  %v3591_v37 = vld [vmem:[%s4070_s3 + $0x191] ss:$2 sm:$0xff] }
  0x95   : > { %1794 = vst.msk [vmem:[#allocation2] sm:$0xff] %vm859_vm0, %v1730_v40 }
  0x98   : > { %v1072_v41 = vpop.f32.mrf.mxu0  ;;  %v1473_v42 = vpop.f32.mrf.mxu1 }
  0x99   : > { %v1663_v45 = vmax.f32 %v1072_v41, %v1473_v42  ;;  %v3528_v42 = vld [vmem:[%s4070_s3 + $0x1a0] ss:$2 sm:$0xff] }
  0x9b   : > { %v1731_v46 = vadd.f32 %v4142_v34, %v1663_v45  ;;  %3647 = vmatmul.msk.f32.gmra.mxu0 %vm859_vm0, %v3519_v43  ;;  %3711 = vmatmul.msk.f32.gmra.mxu1 %vm859_vm0, %v3583_v44  ;;  %v3592_v43 = vld [vmem:[%s4070_s3 + $0x1a1] ss:$2 sm:$0xff] }
  0x9d   : > { %1795 = vst.msk [vmem:[#allocation2 + $0x8] sm:$0xff] %vm859_vm0, %v1731_v46 }
  0xa0   : > { %v1075_v47 = vpop.f32.mrf.mxu0  ;;  %v1476_v48 = vpop.f32.mrf.mxu1 }
  0xa1   : > { %v1664_v51 = vmax.f32 %v1075_v47, %v1476_v48 }
  0xa3   : > { %v1732_v52 = vadd.f32 %v4142_v34, %v1664_v51  ;;  %3648 = vmatmul.msk.f32.gmra.mxu0 %vm859_vm0, %v3520_v49  ;;  %3712 = vmatmul.msk.f32.gmra.mxu1 %vm859_vm0, %v3584_v50  ;;  %v3529_v50 = vld [vmem:[%s4070_s3 + $0x1b0] ss:$2 sm:$0xff]  ;;  %v3593_v51 = vld [vmem:[%s4070_s3 + $0x1b1] ss:$2 sm:$0xff] }
  0xa4   : > { %v1858_v53 = vld [vmem:[#allocation2] ss:$2 sm:$0xff]  ;;  %v1922_v54 = vld [vmem:[#allocation2 + $0x1] ss:$2 sm:$0xff] }
  0xa5   : > { %1796 = vst.msk [vmem:[#allocation2 + $0x10] sm:$0xff] %vm859_vm0, %v1732_v52  ;;  %3758 = vmatmul.msk.f32.vlgmr.msra.gmra.mxu2 %vm859_vm0, %v1858_v53  ;;  %3790 = vmatmul.msk.f32.vlgmr.msra.gmra.mxu3 %vm859_vm0, %v1922_v54 }
  0xa8   : > { %v1078_v55 = vpop.f32.mrf.mxu0  ;;  %v1479_v56 = vpop.f32.mrf.mxu1 }
  0xa9   : > { %v1665_v59 = vmax.f32 %v1078_v55, %v1479_v56  ;;  %v3530_v56 = vld [vmem:[%s4070_s3 + $0x1c0] ss:$2 sm:$0xff] }
  0xab   : > { %v1733_v60 = vadd.f32 %v4142_v34, %v1665_v59  ;;  %3649 = vmatmul.msk.f32.gmra.mxu0 %vm859_vm0, %v3521_v57  ;;  %3713 = vmatmul.msk.f32.gmra.mxu1 %vm859_vm0, %v3585_v58  ;;  %v3594_v57 = vld [vmem:[%s4070_s3 + $0x1c1] ss:$2 sm:$0xff] }
  0xad   : > { %1797 = vst.msk [vmem:[#allocation2 + $0x18] sm:$0xff] %vm859_vm0, %v1733_v60 }
  0xb0   : > { %v1081_v61 = vpop.f32.mrf.mxu0  ;;  %v1482_v62 = vpop.f32.mrf.mxu1 }
  0xb1   : > { %v1666_v1 = vmax.f32 %v1081_v61, %v1482_v62 }
  0xb3   : > { %v1734_v2 = vadd.f32 %v4142_v34, %v1666_v1  ;;  %3650 = vmatmul.msk.f32.gmra.mxu0 %vm859_vm0, %v3522_v63  ;;  %3714 = vmatmul.msk.f32.gmra.mxu1 %vm859_vm0, %v3586_v0  ;;  %v3531_v0 = vld [vmem:[%s4070_s3 + $0x1d0] ss:$2 sm:$0xff]  ;;  %v3595_v1 = vld [vmem:[%s4070_s3 + $0x1d1] ss:$2 sm:$0xff] }
  0xb4   : > { %v1860_v3 = vld [vmem:[#allocation2 + $0x10] ss:$2 sm:$0xff]  ;;  %v1924_v4 = vld [vmem:[#allocation2 + $0x11] ss:$2 sm:$0xff] }
  0xb5   : > { %1798 = vst.msk [vmem:[#allocation2 + $0x20] sm:$0xff] %vm859_vm0, %v1734_v2  ;;  %3759 = vmatmul.msk.f32.gmra.mxu2 %vm859_vm0, %v1860_v3  ;;  %3791 = vmatmul.msk.f32.gmra.mxu3 %vm859_vm0, %v1924_v4 }
  0xb8   : > { %v1084_v5 = vpop.f32.mrf.mxu0  ;;  %v1485_v6 = vpop.f32.mrf.mxu1 }
  0xb9   : > { %v1667_v9 = vmax.f32 %v1084_v5, %v1485_v6  ;;  %v3532_v6 = vld [vmem:[%s4070_s3 + $0x1e0] ss:$2 sm:$0xff] }
  0xbb   : > { %v1735_v10 = vadd.f32 %v4142_v34, %v1667_v9  ;;  %3651 = vmatmul.msk.f32.gmra.mxu0 %vm859_vm0, %v3523_v7  ;;  %3715 = vmatmul.msk.f32.gmra.mxu1 %vm859_vm0, %v3587_v8  ;;  %v3596_v7 = vld [vmem:[%s4070_s3 + $0x1e1] ss:$2 sm:$0xff] }
  0xbd   : > { %1799 = vst.msk [vmem:[#allocation2 + $0x28] sm:$0xff] %vm859_vm0, %v1735_v10 }
  0xc0   : > { %v1087_v11 = vpop.f32.mrf.mxu0  ;;  %v1488_v12 = vpop.f32.mrf.mxu1 }
  0xc1   : > { %v1668_v15 = vmax.f32 %v1087_v11, %v1488_v12 }
  0xc3   : > { %v1736_v16 = vadd.f32 %v4142_v34, %v1668_v15  ;;  %3652 = vmatmul.msk.f32.gmra.mxu0 %vm859_vm0, %v3524_v13  ;;  %3716 = vmatmul.msk.f32.gmra.mxu1 %vm859_vm0, %v3588_v14  ;;  %v3533_v14 = vld [vmem:[%s4070_s3 + $0x1f0] ss:$2 sm:$0xff]  ;;  %v3597_v15 = vld [vmem:[%s4070_s3 + $0x1f1] ss:$2 sm:$0xff] }
  0xc4   : > { %v1862_v17 = vld [vmem:[#allocation2 + $0x20] ss:$2 sm:$0xff]  ;;  %v1926_v18 = vld [vmem:[#allocation2 + $0x21] ss:$2 sm:$0xff] }
  0xc5   : > { %1800 = vst.msk [vmem:[#allocation2 + $0x30] sm:$0xff] %vm859_vm0, %v1736_v16  ;;  %3760 = vmatmul.msk.f32.gmra.mxu2 %vm859_vm0, %v1862_v17  ;;  %3792 = vmatmul.msk.f32.gmra.mxu3 %vm859_vm0, %v1926_v18 }
  0xc8   : > { %v1090_v19 = vpop.f32.mrf.mxu0  ;;  %v1491_v20 = vpop.f32.mrf.mxu1 }
  0xc9   : > { %v1669_v23 = vmax.f32 %v1090_v19, %v1491_v20  ;;  %v3534_v20 = vld [vmem:[%s4070_s3 + $0x200] ss:$2 sm:$0xff] }
  0xcb   : > { %v1737_v24 = vadd.f32 %v4142_v34, %v1669_v23  ;;  %3653 = vmatmul.msk.f32.gmra.mxu0 %vm859_vm0, %v3525_v21  ;;  %3717 = vmatmul.msk.f32.gmra.mxu1 %vm859_vm0, %v3589_v22  ;;  %v3598_v21 = vld [vmem:[%s4070_s3 + $0x201] ss:$2 sm:$0xff] }
  0xcd   : > { %1801 = vst.msk [vmem:[#allocation2 + $0x38] sm:$0xff] %vm859_vm0, %v1737_v24 }
  0xd0   : > { %v1093_v25 = vpop.f32.mrf.mxu0  ;;  %v1494_v26 = vpop.f32.mrf.mxu1 }
  0xd1   : > { %v1670_v29 = vmax.f32 %v1093_v25, %v1494_v26 }
  0xd3   : > { %v1738_v30 = vadd.f32 %v4142_v34, %v1670_v29  ;;  %3654 = vmatmul.msk.f32.gmra.mxu0 %vm859_vm0, %v3526_v27  ;;  %3718 = vmatmul.msk.f32.gmra.mxu1 %vm859_vm0, %v3590_v28  ;;  %v3535_v28 = vld [vmem:[%s4070_s3 + $0x210] ss:$2 sm:$0xff]  ;;  %v3599_v29 = vld [vmem:[%s4070_s3 + $0x211] ss:$2 sm:$0xff] }
  0xd4   : > { %v1864_v31 = vld [vmem:[#allocation2 + $0x30] ss:$2 sm:$0xff]  ;;  %v1928_v32 = vld [vmem:[#allocation2 + $0x31] ss:$2 sm:$0xff] }
  0xd5   : > { %1802 = vst.msk [vmem:[#allocation2 + $0x40] sm:$0xff] %vm859_vm0, %v1738_v30  ;;  %3761 = vmatmul.msk.f32.gmra.mxu2 %vm859_vm0, %v1864_v31  ;;  %3793 = vmatmul.msk.f32.gmra.mxu3 %vm859_vm0, %v1928_v32 }
  0xd8   : > { %v1096_v33 = vpop.f32.mrf.mxu0  ;;  %v1497_v35 = vpop.f32.mrf.mxu1 }
  0xd9   : > { %v1671_v38 = vmax.f32 %v1096_v33, %v1497_v35  ;;  %v3536_v35 = vld [vmem:[%s4070_s3 + $0x220] ss:$2 sm:$0xff] }
  0xdb   : > { %v1739_v39 = vadd.f32 %v4142_v34, %v1671_v38  ;;  %3655 = vmatmul.msk.f32.gmra.mxu0 %vm859_vm0, %v3527_v36  ;;  %3719 = vmatmul.msk.f32.gmra.mxu1 %vm859_vm0, %v3591_v37  ;;  %v3600_v36 = vld [vmem:[%s4070_s3 + $0x221] ss:$2 sm:$0xff] }
  0xdd   : > { %1803 = vst.msk [vmem:[#allocation2 + $0x48] sm:$0xff] %vm859_vm0, %v1739_v39 }
  0xe0   : > { %v1099_v40 = vpop.f32.mrf.mxu0  ;;  %v1500_v41 = vpop.f32.mrf.mxu1 }
  0xe1   : > { %v1672_v44 = vmax.f32 %v1099_v40, %v1500_v41 }
  0xe3   : > { %v1740_v45 = vadd.f32 %v4142_v34, %v1672_v44  ;;  %3656 = vmatmul.msk.f32.gmra.mxu0 %vm859_vm0, %v3528_v42  ;;  %3720 = vmatmul.msk.f32.gmra.mxu1 %vm859_vm0, %v3592_v43  ;;  %v4279_v43 = vld [vmem:[%s4941_s4] ss:$0 sm:$0xff]  ;;  %v3537_v44 = vld [vmem:[%s4070_s3 + $0x230] ss:$2 sm:$0xff] }
  0xe4   : > { %v1866_v46 = vld [vmem:[#allocation2 + $0x40] ss:$2 sm:$0xff]  ;;  %v1930_v47 = vld [vmem:[#allocation2 + $0x41] ss:$2 sm:$0xff] }
  0xe5   : > { %1804 = vst.msk [vmem:[#allocation2 + $0x50] sm:$0xff] %vm859_vm0, %v1740_v45  ;;  %3762 = vmatmul.msk.f32.gmra.mxu2 %vm859_vm0, %v1866_v46  ;;  %3794 = vmatmul.msk.f32.gmra.mxu3 %vm859_vm0, %v1930_v47  ;;  %v3601_v45 = vld [vmem:[%s4070_s3 + $0x231] ss:$2 sm:$0xff] }
  0xe8   : > { %v1102_v48 = vpop.f32.mrf.mxu0  ;;  %v1503_v49 = vpop.f32.mrf.mxu1 }
  0xe9   : > { %v1673_v52 = vmax.f32 %v1102_v48, %v1503_v49 }
  0xeb   : > { %v1741_v53 = vadd.f32 %v4142_v34, %v1673_v52  ;;  %3657 = vmatmul.msk.f32.gmra.mxu0 %vm859_vm0, %v3529_v50  ;;  %3721 = vmatmul.msk.f32.gmra.mxu1 %vm859_vm0, %v3593_v51 }
  0xed   : > { %1805 = vst.msk [vmem:[#allocation2 + $0x58] sm:$0xff] %vm859_vm0, %v1741_v53 }
  0xf0   : > { %v1105_v54 = vpop.f32.mrf.mxu0  ;;  %v1506_v55 = vpop.f32.mrf.mxu1 }
  0xf1   : > { %v1674_v58 = vmax.f32 %v1105_v54, %v1506_v55  ;;  %v3538_v54 = vld [vmem:[%s4070_s3 + $0x240] ss:$2 sm:$0xff]  ;;  %v3602_v55 = vld [vmem:[%s4070_s3 + $0x241] ss:$2 sm:$0xff] }
  0xf3   : > { %v1742_v59 = vadd.f32 %v4142_v34, %v1674_v58  ;;  %3658 = vmatmul.msk.f32.gmra.mxu0 %vm859_vm0, %v3530_v56  ;;  %3722 = vmatmul.msk.f32.gmra.mxu1 %vm859_vm0, %v3594_v57 }
  0xf4   : > { %v1868_v60 = vld [vmem:[#allocation2 + $0x50] ss:$2 sm:$0xff]  ;;  %v1932_v61 = vld [vmem:[#allocation2 + $0x51] ss:$2 sm:$0xff] }
  0xf5   : > { %1806 = vst.msk [vmem:[#allocation2 + $0x60] sm:$0xff] %vm859_vm0, %v1742_v59  ;;  %3763 = vmatmul.msk.f32.gmra.mxu2 %vm859_vm0, %v1868_v60  ;;  %3795 = vmatmul.msk.f32.gmra.mxu3 %vm859_vm0, %v1932_v61 }
  0xf8   : > { %v1108_v62 = vpop.f32.mrf.mxu0  ;;  %v1509_v63 = vpop.f32.mrf.mxu1 }
  0xf9   : > { %v1675_v2 = vmax.f32 %v1108_v62, %v1509_v63  ;;  %v3539_v62 = vld [vmem:[%s4070_s3 + $0x250] ss:$2 sm:$0xff]  ;;  %v3603_v63 = vld [vmem:[%s4070_s3 + $0x251] ss:$2 sm:$0xff] }
  0xfb   : > { %v1743_v3 = vadd.f32 %v4142_v34, %v1675_v2  ;;  %3659 = vmatmul.msk.f32.gmra.mxu0 %vm859_vm0, %v3531_v0  ;;  %3723 = vmatmul.msk.f32.gmra.mxu1 %vm859_vm0, %v3595_v1 }
  0xfd   : > { %1807 = vst.msk [vmem:[#allocation2 + $0x68] sm:$0xff] %vm859_vm0, %v1743_v3 }
 0x100   : > { %v1111_v4 = vpop.f32.mrf.mxu0  ;;  %v1512_v5 = vpop.f32.mrf.mxu1 }
 0x101   : > { %v1676_v8 = vmax.f32 %v1111_v4, %v1512_v5 }
 0x103   : > { %v1744_v9 = vadd.f32 %v4142_v34, %v1676_v8  ;;  %3660 = vmatmul.msk.f32.gmra.mxu0 %vm859_vm0, %v3532_v6  ;;  %3724 = vmatmul.msk.f32.gmra.mxu1 %vm859_vm0, %v3596_v7  ;;  %v3540_v8 = vld [vmem:[%s4070_s3 + $0x260] ss:$2 sm:$0xff] }
 0x104   : > { %v1870_v10 = vld [vmem:[#allocation2 + $0x60] ss:$2 sm:$0xff]  ;;  %v1934_v11 = vld [vmem:[#allocation2 + $0x61] ss:$2 sm:$0xff] }
 0x105   : > { %1808 = vst.msk [vmem:[#allocation2 + $0x70] sm:$0xff] %vm859_vm0, %v1744_v9  ;;  %3764 = vmatmul.msk.f32.gmra.mxu2 %vm859_vm0, %v1870_v10  ;;  %3796 = vmatmul.msk.f32.gmra.mxu3 %vm859_vm0, %v1934_v11  ;;  %v3604_v9 = vld [vmem:[%s4070_s3 + $0x261] ss:$2 sm:$0xff] }
 0x108   : > { %v1114_v12 = vpop.f32.mrf.mxu0  ;;  %v1515_v13 = vpop.f32.mrf.mxu1 }
 0x109   : > { %v1677_v16 = vmax.f32 %v1114_v12, %v1515_v13 }
 0x10b   : > { %v1745_v17 = vadd.f32 %v4142_v34, %v1677_v16  ;;  %3661 = vmatmul.msk.f32.gmra.mxu0 %vm859_vm0, %v3533_v14  ;;  %3725 = vmatmul.msk.f32.gmra.mxu1 %vm859_vm0, %v3597_v15  ;;  %v3541_v16 = vld [vmem:[%s4070_s3 + $0x270] ss:$2 sm:$0xff] }
 0x10d   : > { %1809 = vst.msk [vmem:[#allocation2 + $0x78] sm:$0xff] %vm859_vm0, %v1745_v17  ;;  %v3605_v17 = vld [vmem:[%s4070_s3 + $0x271] ss:$2 sm:$0xff] }
 0x110   : > { %v1117_v18 = vpop.f32.mrf.mxu0  ;;  %v1518_v19 = vpop.f32.mrf.mxu1 }
 0x111   : > { %v1678_v22 = vmax.f32 %v1117_v18, %v1518_v19 }
 0x113   : > { %v1746_v23 = vadd.f32 %v4142_v34, %v1678_v22  ;;  %3662 = vmatmul.msk.f32.gmra.mxu0 %vm859_vm0, %v3534_v20  ;;  %3726 = vmatmul.msk.f32.gmra.mxu1 %vm859_vm0, %v3598_v21 }
 0x114   : > { %v1872_v24 = vld [vmem:[#allocation2 + $0x70] ss:$2 sm:$0xff]  ;;  %v1936_v25 = vld [vmem:[#allocation2 + $0x71] ss:$2 sm:$0xff] }
 0x115   : > { %1810 = vst.msk [vmem:[#allocation2 + $0x80] sm:$0xff] %vm859_vm0, %v1746_v23  ;;  %3765 = vmatmul.msk.f32.gmra.mxu2 %vm859_vm0, %v1872_v24  ;;  %3797 = vmatmul.msk.f32.gmra.mxu3 %vm859_vm0, %v1936_v25 }
 0x118   : > { %v1120_v26 = vpop.f32.mrf.mxu0  ;;  %v1521_v27 = vpop.f32.mrf.mxu1 }
 0x119   : > { %v1679_v30 = vmax.f32 %v1120_v26, %v1521_v27  ;;  %v3542_v26 = vld [vmem:[%s4070_s3 + $0x280] ss:$2 sm:$0xff]  ;;  %v3606_v27 = vld [vmem:[%s4070_s3 + $0x281] ss:$2 sm:$0xff] }
 0x11b   : > { %v1747_v31 = vadd.f32 %v4142_v34, %v1679_v30  ;;  %3663 = vmatmul.msk.f32.gmra.mxu0 %vm859_vm0, %v3535_v28  ;;  %3727 = vmatmul.msk.f32.gmra.mxu1 %vm859_vm0, %v3599_v29 }
 0x11d   : > { %1811 = vst.msk [vmem:[#allocation2 + $0x88] sm:$0xff] %vm859_vm0, %v1747_v31 }
 0x120   : > { %v1123_v32 = vpop.f32.mrf.mxu0  ;;  %v1524_v33 = vpop.f32.mrf.mxu1 }
 0x121   : > { %v1680_v37 = vmax.f32 %v1123_v32, %v1524_v33 }
 0x123   : > { %v1748_v38 = vadd.f32 %v4142_v34, %v1680_v37  ;;  %3664 = vmatmul.msk.f32.gmra.mxu0 %vm859_vm0, %v3536_v35  ;;  %3728 = vmatmul.msk.f32.gmra.mxu1 %vm859_vm0, %v3600_v36  ;;  %v3543_v35 = vld [vmem:[%s4070_s3 + $0x290] ss:$2 sm:$0xff]  ;;  %v3607_v36 = vld [vmem:[%s4070_s3 + $0x291] ss:$2 sm:$0xff] }
 0x124   : > { %v1874_v39 = vld [vmem:[#allocation2 + $0x80] ss:$2 sm:$0xff]  ;;  %v1938_v40 = vld [vmem:[#allocation2 + $0x81] ss:$2 sm:$0xff] }
 0x125   : > { %1812 = vst.msk [vmem:[#allocation2 + $0x90] sm:$0xff] %vm859_vm0, %v1748_v38  ;;  %3766 = vmatmul.msk.f32.gmra.mxu2 %vm859_vm0, %v1874_v39  ;;  %3798 = vmatmul.msk.f32.gmra.mxu3 %vm859_vm0, %v1938_v40 }
 0x128   : > { %v1126_v41 = vpop.f32.mrf.mxu0  ;;  %v1527_v42 = vpop.f32.mrf.mxu1 }
 0x129   : > { %v1681_v46 = vmax.f32 %v1126_v41, %v1527_v42  ;;  %v2099_v47 = vpop.f32.mrf.mxu2  ;;  %v2308_v48 = vpop.f32.mrf.mxu3 }
 0x12a   : > { %v2404_v49 = vmax.f32 %v2099_v47, %v2308_v48  ;;  %v3608_v47 = vld [vmem:[%s4070_s3 + $0x2a1] ss:$2 sm:$0xff] }
 0x12b   : > { %v1749_v50 = vadd.f32 %v4142_v34, %v1681_v46  ;;  %3665 = vmatmul.msk.f32.gmra.mxu0 %vm859_vm0, %v3537_v44  ;;  %3729 = vmatmul.msk.f32.gmra.mxu1 %vm859_vm0, %v3601_v45  ;;  %v3544_v46 = vld [vmem:[%s4070_s3 + $0x2a0] ss:$2 sm:$0xff] }
 0x12c   : > { %v2440_v51 = vadd.f32 %v4279_v43, %v2404_v49 }
 0x12d   : > { %1813 = vst.msk [vmem:[#allocation2 + $0x98] sm:$0xff] %vm859_vm0, %v1749_v50 }
 0x12e   : > { %2473 = vst.msk [vmem:[#allocation2] sm:$0xff] %vm2472_vm1, %v2440_v51 }
 0x130   : > { %v1129_v52 = vpop.f32.mrf.mxu0  ;;  %v1530_v53 = vpop.f32.mrf.mxu1 }
 0x131   : > { %v1682_v56 = vmax.f32 %v1129_v52, %v1530_v53 }
 0x133   : > { %v1750_v57 = vadd.f32 %v4142_v34, %v1682_v56  ;;  %3666 = vmatmul.msk.f32.gmra.mxu0 %vm859_vm0, %v3538_v54  ;;  %3730 = vmatmul.msk.f32.gmra.mxu1 %vm859_vm0, %v3602_v55  ;;  %v3545_v54 = vld [vmem:[%s4070_s3 + $0x2b0] ss:$2 sm:$0xff]  ;;  %v3609_v55 = vld [vmem:[%s4070_s3 + $0x2b1] ss:$2 sm:$0xff] }
 0x134   : > { %v1876_v58 = vld [vmem:[#allocation2 + $0x90] ss:$2 sm:$0xff]  ;;  %v1940_v59 = vld [vmem:[#allocation2 + $0x91] ss:$2 sm:$0xff] }
 0x135   : > { %1814 = vst.msk [vmem:[#allocation2 + $0xa0] sm:$0xff] %vm859_vm0, %v1750_v57  ;;  %3767 = vmatmul.msk.f32.gmra.mxu2 %vm859_vm0, %v1876_v58  ;;  %3799 = vmatmul.msk.f32.gmra.mxu3 %vm859_vm0, %v1940_v59 }
 0x138   : > { %v1132_v60 = vpop.f32.mrf.mxu0  ;;  %v1533_v61 = vpop.f32.mrf.mxu1 }
 0x139   : > { %v1683_v0 = vmax.f32 %v1132_v60, %v1533_v61  ;;  %v2102_v1 = vpop.f32.mrf.mxu2  ;;  %v2311_v2 = vpop.f32.mrf.mxu3 }
 0x13a   : > { %v2405_v3 = vmax.f32 %v2102_v1, %v2311_v2  ;;  %v3610_v1 = vld [vmem:[%s4070_s3 + $0x2c1] ss:$2 sm:$0xff] }
 0x13b   : > { %v1751_v4 = vadd.f32 %v4142_v34, %v1683_v0  ;;  %3667 = vmatmul.msk.f32.gmra.mxu0 %vm859_vm0, %v3539_v62  ;;  %3731 = vmatmul.msk.f32.gmra.mxu1 %vm859_vm0, %v3603_v63  ;;  %v3546_v0 = vld [vmem:[%s4070_s3 + $0x2c0] ss:$2 sm:$0xff] }
 0x13c   : > { %v2441_v5 = vadd.f32 %v4279_v43, %v2405_v3 }
 0x13d   : > { %1815 = vst.msk [vmem:[#allocation2 + $0xa8] sm:$0xff] %vm859_vm0, %v1751_v4 }
 0x13e   : > { %2474 = vst.msk [vmem:[#allocation2 + $0x8] sm:$0xff] %vm2472_vm1, %v2441_v5 }
 0x140   : > { %v1135_v6 = vpop.f32.mrf.mxu0  ;;  %v1536_v7 = vpop.f32.mrf.mxu1 }
 0x141   : > { %v1684_v10 = vmax.f32 %v1135_v6, %v1536_v7 }
 0x143   : > { %v1752_v11 = vadd.f32 %v4142_v34, %v1684_v10  ;;  %3668 = vmatmul.msk.f32.gmra.mxu0 %vm859_vm0, %v3540_v8  ;;  %3732 = vmatmul.msk.f32.gmra.mxu1 %vm859_vm0, %v3604_v9  ;;  %v3547_v8 = vld [vmem:[%s4070_s3 + $0x2d0] ss:$2 sm:$0xff]  ;;  %v3611_v9 = vld [vmem:[%s4070_s3 + $0x2d1] ss:$2 sm:$0xff] }
 0x144   : > { %v1878_v12 = vld [vmem:[#allocation2 + $0xa0] ss:$2 sm:$0xff]  ;;  %v1942_v13 = vld [vmem:[#allocation2 + $0xa1] ss:$2 sm:$0xff] }
 0x145   : > { %1816 = vst.msk [vmem:[#allocation2 + $0xb0] sm:$0xff] %vm859_vm0, %v1752_v11  ;;  %3768 = vmatmul.msk.f32.gmra.mxu2 %vm859_vm0, %v1878_v12  ;;  %3800 = vmatmul.msk.f32.gmra.mxu3 %vm859_vm0, %v1942_v13 }
 0x148   : > { %v1138_v14 = vpop.f32.mrf.mxu0  ;;  %v1539_v15 = vpop.f32.mrf.mxu1 }
 0x149   : > { %v1685_v18 = vmax.f32 %v1138_v14, %v1539_v15  ;;  %v2105_v19 = vpop.f32.mrf.mxu2  ;;  %v2314_v20 = vpop.f32.mrf.mxu3 }
 0x14a   : > { %v2406_v21 = vmax.f32 %v2105_v19, %v2314_v20  ;;  %v3612_v19 = vld [vmem:[%s4070_s3 + $0x2e1] ss:$2 sm:$0xff] }
 0x14b   : > { %v1753_v22 = vadd.f32 %v4142_v34, %v1685_v18  ;;  %3669 = vmatmul.msk.f32.gmra.mxu0 %vm859_vm0, %v3541_v16  ;;  %3733 = vmatmul.msk.f32.gmra.mxu1 %vm859_vm0, %v3605_v17  ;;  %v3548_v18 = vld [vmem:[%s4070_s3 + $0x2e0] ss:$2 sm:$0xff] }
 0x14c   : > { %v2442_v23 = vadd.f32 %v4279_v43, %v2406_v21 }
 0x14d   : > { %1817 = vst.msk [vmem:[#allocation2 + $0xb8] sm:$0xff] %vm859_vm0, %v1753_v22 }
 0x14e   : > { %2475 = vst.msk [vmem:[#allocation2 + $0x10] sm:$0xff] %vm2472_vm1, %v2442_v23 }
 0x150   : > { %v1141_v24 = vpop.f32.mrf.mxu0  ;;  %v1542_v25 = vpop.f32.mrf.mxu1 }
 0x151   : > { %v1686_v28 = vmax.f32 %v1141_v24, %v1542_v25 }
 0x153   : > { %v1754_v29 = vadd.f32 %v4142_v34, %v1686_v28  ;;  %3670 = vmatmul.msk.f32.gmra.mxu0 %vm859_vm0, %v3542_v26  ;;  %3734 = vmatmul.msk.f32.gmra.mxu1 %vm859_vm0, %v3606_v27  ;;  %v3549_v26 = vld [vmem:[%s4070_s3 + $0x2f0] ss:$2 sm:$0xff]  ;;  %v3613_v27 = vld [vmem:[%s4070_s3 + $0x2f1] ss:$2 sm:$0xff] }
 0x154   : > { %v1880_v30 = vld [vmem:[#allocation2 + $0xb0] ss:$2 sm:$0xff]  ;;  %v1944_v31 = vld [vmem:[#allocation2 + $0xb1] ss:$2 sm:$0xff] }
 0x155   : > { %1818 = vst.msk [vmem:[#allocation2 + $0xc0] sm:$0xff] %vm859_vm0, %v1754_v29  ;;  %3769 = vmatmul.msk.f32.gmra.mxu2 %vm859_vm0, %v1880_v30  ;;  %3801 = vmatmul.msk.f32.gmra.mxu3 %vm859_vm0, %v1944_v31 }
 0x158   : > { %v1144_v32 = vpop.f32.mrf.mxu0  ;;  %v1545_v33 = vpop.f32.mrf.mxu1 }
 0x159   : > { %v1687_v37 = vmax.f32 %v1144_v32, %v1545_v33  ;;  %v2108_v38 = vpop.f32.mrf.mxu2  ;;  %v2317_v39 = vpop.f32.mrf.mxu3 }
 0x15a   : > { %v2407_v40 = vmax.f32 %v2108_v38, %v2317_v39  ;;  %v3550_v38 = vld [vmem:[%s4070_s3 + $0x300] ss:$2 sm:$0xff]  ;;  %v3614_v39 = vld [vmem:[%s4070_s3 + $0x301] ss:$2 sm:$0xff] }
 0x15b   : > { %v1755_v41 = vadd.f32 %v4142_v34, %v1687_v37  ;;  %3671 = vmatmul.msk.f32.gmra.mxu0 %vm859_vm0, %v3543_v35  ;;  %3735 = vmatmul.msk.f32.gmra.mxu1 %vm859_vm0, %v3607_v36  ;;  %v2538_v35 = vld [vmem:[%s4942_s5 + $0x8] sm:$0xff] }
 0x15c   : > { %v2443_v42 = vadd.f32 %v4279_v43, %v2407_v40  ;;  %2601 = vmatpush.msrb.mxu2 %v2538_v35  ;;  %2714 = vmatpush.msrb.mxu3 %v2538_v35 }
 0x15d   : > { %1819 = vst.msk [vmem:[#allocation2 + $0xc8] sm:$0xff] %vm859_vm0, %v1755_v41 }
 0x15e   : > { %2476 = vst.msk [vmem:[#allocation2 + $0x18] sm:$0xff] %vm2472_vm1, %v2443_v42 }
 0x160   : > { %v1147_v44 = vpop.f32.mrf.mxu0  ;;  %v1548_v45 = vpop.f32.mrf.mxu1 }
 0x161   : > { %v1688_v48 = vmax.f32 %v1147_v44, %v1548_v45 }
 0x163   : > { %v1756_v49 = vadd.f32 %v4142_v34, %v1688_v48  ;;  %3672 = vmatmul.msk.f32.gmra.mxu0 %vm859_vm0, %v3544_v46  ;;  %3736 = vmatmul.msk.f32.gmra.mxu1 %vm859_vm0, %v3608_v47  ;;  %v3551_v47 = vld [vmem:[%s4070_s3 + $0x310] ss:$2 sm:$0xff]  ;;  %v3615_v48 = vld [vmem:[%s4070_s3 + $0x311] ss:$2 sm:$0xff] }
 0x164   : > { %v1882_v50 = vld [vmem:[#allocation2 + $0xc0] ss:$2 sm:$0xff]  ;;  %v1946_v51 = vld [vmem:[#allocation2 + $0xc1] ss:$2 sm:$0xff] }
 0x165   : > { %1820 = vst.msk [vmem:[#allocation2 + $0xd0] sm:$0xff] %vm859_vm0, %v1756_v49  ;;  %3770 = vmatmul.msk.f32.gmra.mxu2 %vm859_vm0, %v1882_v50  ;;  %3802 = vmatmul.msk.f32.gmra.mxu3 %vm859_vm0, %v1946_v51 }
 0x168   : > { %v1150_v52 = vpop.f32.mrf.mxu0  ;;  %v1551_v53 = vpop.f32.mrf.mxu1 }
 0x169   : > { %v1689_v56 = vmax.f32 %v1150_v52, %v1551_v53  ;;  %v2111_v57 = vpop.f32.mrf.mxu2  ;;  %v2320_v58 = vpop.f32.mrf.mxu3 }
 0x16a   : > { %v2408_v59 = vmax.f32 %v2111_v57, %v2320_v58  ;;  %v3552_v57 = vld [vmem:[%s4070_s3 + $0x320] ss:$2 sm:$0xff]  ;;  %v3616_v58 = vld [vmem:[%s4070_s3 + $0x321] ss:$2 sm:$0xff] }
 0x16b   : > { %v1757_v60 = vadd.f32 %v4142_v34, %v1689_v56  ;;  %3673 = vmatmul.msk.f32.gmra.mxu0 %vm859_vm0, %v3545_v54  ;;  %3737 = vmatmul.msk.f32.gmra.mxu1 %vm859_vm0, %v3609_v55 }
 0x16c   : > { %v2444_v61 = vadd.f32 %v4279_v43, %v2408_v59 }
 0x16d   : > { %1821 = vst.msk [vmem:[#allocation2 + $0xd8] sm:$0xff] %vm859_vm0, %v1757_v60 }
 0x16e   : > { %2477 = vst.msk [vmem:[#allocation2 + $0x20] sm:$0xff] %vm2472_vm1, %v2444_v61 }
 0x170   : > { %v1153_v62 = vpop.f32.mrf.mxu0  ;;  %v1554_v63 = vpop.f32.mrf.mxu1 }
 0x171   : > { %v1690_v2 = vmax.f32 %v1153_v62, %v1554_v63 }
 0x173   : > { %v1758_v3 = vadd.f32 %v4142_v34, %v1690_v2  ;;  %3674 = vmatmul.msk.f32.gmra.mxu0 %vm859_vm0, %v3546_v0  ;;  %3738 = vmatmul.msk.f32.gmra.mxu1 %vm859_vm0, %v3610_v1  ;;  %v3553_v1 = vld [vmem:[%s4070_s3 + $0x330] ss:$2 sm:$0xff]  ;;  %v3617_v2 = vld [vmem:[%s4070_s3 + $0x331] ss:$2 sm:$0xff] }
 0x174   : > { %v1884_v4 = vld [vmem:[#allocation2 + $0xd0] ss:$2 sm:$0xff]  ;;  %v1948_v5 = vld [vmem:[#allocation2 + $0xd1] ss:$2 sm:$0xff] }
 0x175   : > { %1822 = vst.msk [vmem:[#allocation2 + $0xe0] sm:$0xff] %vm859_vm0, %v1758_v3  ;;  %3771 = vmatmul.msk.f32.gmra.mxu2 %vm859_vm0, %v1884_v4  ;;  %3803 = vmatmul.msk.f32.gmra.mxu3 %vm859_vm0, %v1948_v5 }
 0x178   : > { %v1156_v6 = vpop.f32.mrf.mxu0  ;;  %v1557_v7 = vpop.f32.mrf.mxu1 }
 0x179   : > { %v1691_v10 = vmax.f32 %v1156_v6, %v1557_v7  ;;  %v2114_v11 = vpop.f32.mrf.mxu2  ;;  %v2323_v12 = vpop.f32.mrf.mxu3 }
 0x17a   : > { %v2409_v13 = vmax.f32 %v2114_v11, %v2323_v12  ;;  %v3554_v11 = vld [vmem:[%s4070_s3 + $0x340] ss:$2 sm:$0xff]  ;;  %v3618_v12 = vld [vmem:[%s4070_s3 + $0x341] ss:$2 sm:$0xff] }
 0x17b   : > { %v1759_v14 = vadd.f32 %v4142_v34, %v1691_v10  ;;  %3675 = vmatmul.msk.f32.gmra.mxu0 %vm859_vm0, %v3547_v8  ;;  %3739 = vmatmul.msk.f32.gmra.mxu1 %vm859_vm0, %v3611_v9 }
 0x17c   : > { %v2445_v15 = vadd.f32 %v4279_v43, %v2409_v13 }
 0x17d   : > { %1823 = vst.msk [vmem:[#allocation2 + $0xe8] sm:$0xff] %vm859_vm0, %v1759_v14 }
 0x17e   : > { %2478 = vst.msk [vmem:[#allocation2 + $0x28] sm:$0xff] %vm2472_vm1, %v2445_v15 }
 0x180   : > { %v1159_v16 = vpop.f32.mrf.mxu0  ;;  %v1560_v17 = vpop.f32.mrf.mxu1 }
 0x181   : > { %v1692_v20 = vmax.f32 %v1159_v16, %v1560_v17 }
 0x183   : > { %v1760_v21 = vadd.f32 %v4142_v34, %v1692_v20  ;;  %3676 = vmatmul.msk.f32.gmra.mxu0 %vm859_vm0, %v3548_v18  ;;  %3740 = vmatmul.msk.f32.gmra.mxu1 %vm859_vm0, %v3612_v19  ;;  %v3555_v19 = vld [vmem:[%s4070_s3 + $0x350] ss:$2 sm:$0xff]  ;;  %v3619_v20 = vld [vmem:[%s4070_s3 + $0x351] ss:$2 sm:$0xff] }
 0x184   : > { %v1886_v22 = vld [vmem:[#allocation2 + $0xe0] ss:$2 sm:$0xff]  ;;  %v1950_v23 = vld [vmem:[#allocation2 + $0xe1] ss:$2 sm:$0xff] }
 0x185   : > { %1824 = vst.msk [vmem:[#allocation2 + $0xf0] sm:$0xff] %vm859_vm0, %v1760_v21  ;;  %3772 = vmatmul.msk.f32.gmra.mxu2 %vm859_vm0, %v1886_v22  ;;  %3804 = vmatmul.msk.f32.gmra.mxu3 %vm859_vm0, %v1950_v23 }
 0x188   : > { %v1162_v24 = vpop.f32.mrf.mxu0  ;;  %v1563_v25 = vpop.f32.mrf.mxu1 }
 0x189   : > { %v1693_v28 = vmax.f32 %v1162_v24, %v1563_v25  ;;  %v2117_v29 = vpop.f32.mrf.mxu2  ;;  %v2326_v30 = vpop.f32.mrf.mxu3 }
 0x18a   : > { %v2410_v31 = vmax.f32 %v2117_v29, %v2326_v30  ;;  %v3556_v29 = vld [vmem:[%s4070_s3 + $0x360] ss:$2 sm:$0xff]  ;;  %v3620_v30 = vld [vmem:[%s4070_s3 + $0x361] ss:$2 sm:$0xff] }
 0x18b   : > { %v1761_v32 = vadd.f32 %v4142_v34, %v1693_v28  ;;  %3677 = vmatmul.msk.f32.gmra.mxu0 %vm859_vm0, %v3549_v26  ;;  %3741 = vmatmul.msk.f32.gmra.mxu1 %vm859_vm0, %v3613_v27 }
 0x18c   : > { %v2446_v33 = vadd.f32 %v4279_v43, %v2410_v31 }
 0x18d   : > { %1825 = vst.msk [vmem:[#allocation2 + $0xf8] sm:$0xff] %vm859_vm0, %v1761_v32 }
 0x18e   : > { %2479 = vst.msk [vmem:[#allocation2 + $0x30] sm:$0xff] %vm2472_vm1, %v2446_v33 }
 0x190   : > { %v1165_v36 = vpop.f32.mrf.mxu0  ;;  %v1566_v37 = vpop.f32.mrf.mxu1 }
 0x191   : > { %v1694_v40 = vmax.f32 %v1165_v36, %v1566_v37 }
 0x193   : > { %v1762_v41 = vadd.f32 %v4142_v34, %v1694_v40  ;;  %3678 = vmatmul.msk.f32.gmra.mxu0 %vm859_vm0, %v3550_v38  ;;  %3742 = vmatmul.msk.f32.gmra.mxu1 %vm859_vm0, %v3614_v39  ;;  %v3557_v38 = vld [vmem:[%s4070_s3 + $0x370] ss:$2 sm:$0xff]  ;;  %v3621_v39 = vld [vmem:[%s4070_s3 + $0x371] ss:$2 sm:$0xff] }
 0x194   : > { %v1888_v42 = vld [vmem:[#allocation2 + $0xf0] ss:$2 sm:$0xff]  ;;  %v1952_v44 = vld [vmem:[#allocation2 + $0xf1] ss:$2 sm:$0xff] }
 0x195   : > { %1826 = vst.msk [vmem:[#allocation2 + $0x100] sm:$0xff] %vm859_vm0, %v1762_v41  ;;  %3773 = vmatmul.msk.f32.gmra.mxu2 %vm859_vm0, %v1888_v42  ;;  %3805 = vmatmul.msk.f32.gmra.mxu3 %vm859_vm0, %v1952_v44 }
 0x198   : > { %v1168_v45 = vpop.f32.mrf.mxu0  ;;  %v1569_v46 = vpop.f32.mrf.mxu1 }
 0x199   : > { %v1695_v49 = vmax.f32 %v1168_v45, %v1569_v46  ;;  %v2120_v50 = vpop.f32.mrf.mxu2  ;;  %v2329_v51 = vpop.f32.mrf.mxu3 }
 0x19a   : > { %v2411_v52 = vmax.f32 %v2120_v50, %v2329_v51  ;;  %v3622_v50 = vld [vmem:[%s4070_s3 + $0x381] ss:$2 sm:$0xff] }
 0x19b   : > { %v1763_v53 = vadd.f32 %v4142_v34, %v1695_v49  ;;  %3679 = vmatmul.msk.f32.gmra.mxu0 %vm859_vm0, %v3551_v47  ;;  %3743 = vmatmul.msk.f32.gmra.mxu1 %vm859_vm0, %v3615_v48  ;;  %v3558_v49 = vld [vmem:[%s4070_s3 + $0x380] ss:$2 sm:$0xff] }
 0x19c   : > { %v2447_v54 = vadd.f32 %v4279_v43, %v2411_v52 }
 0x19d   : > { %1827 = vst.msk [vmem:[#allocation2 + $0x108] sm:$0xff] %vm859_vm0, %v1763_v53 }
 0x19e   : > { %2480 = vst.msk [vmem:[#allocation2 + $0x38] sm:$0xff] %vm2472_vm1, %v2447_v54 }
 0x1a0   : > { %v1171_v55 = vpop.f32.mrf.mxu0  ;;  %v1572_v56 = vpop.f32.mrf.mxu1 }
 0x1a1   : > { %v1696_v59 = vmax.f32 %v1171_v55, %v1572_v56 }
 0x1a3   : > { %v1764_v60 = vadd.f32 %v4142_v34, %v1696_v59  ;;  %3680 = vmatmul.msk.f32.gmra.mxu0 %vm859_vm0, %v3552_v57  ;;  %3744 = vmatmul.msk.f32.gmra.mxu1 %vm859_vm0, %v3616_v58  ;;  %v3559_v57 = vld [vmem:[%s4070_s3 + $0x390] ss:$2 sm:$0xff]  ;;  %v3623_v58 = vld [vmem:[%s4070_s3 + $0x391] ss:$2 sm:$0xff] }
 0x1a4   : > { %v1890_v61 = vld [vmem:[#allocation2 + $0x100] ss:$2 sm:$0xff]  ;;  %v1954_v62 = vld [vmem:[#allocation2 + $0x101] ss:$2 sm:$0xff] }
 0x1a5   : > { %1828 = vst.msk [vmem:[#allocation2 + $0x110] sm:$0xff] %vm859_vm0, %v1764_v60  ;;  %3774 = vmatmul.msk.f32.gmra.mxu2 %vm859_vm0, %v1890_v61  ;;  %3806 = vmatmul.msk.f32.gmra.mxu3 %vm859_vm0, %v1954_v62  ;;  %v4465_v62 = vld [vmem:[%s4965_s21] ss:$0 sm:$0xff] }
 0x1a8   : > { %v1174_v63 = vpop.f32.mrf.mxu0  ;;  %v1575_v0 = vpop.f32.mrf.mxu1 }
 0x1a9   : > { %v1697_v3 = vmax.f32 %v1174_v63, %v1575_v0  ;;  %v2123_v4 = vpop.f32.mrf.mxu2  ;;  %v2332_v5 = vpop.f32.mrf.mxu3 }
 0x1aa   : > { %v2412_v6 = vmax.f32 %v2123_v4, %v2332_v5  ;;  %v3624_v4 = vld [vmem:[%s4070_s3 + $0x3a1] ss:$2 sm:$0xff] }
 0x1ab   : > { %v1765_v7 = vadd.f32 %v4142_v34, %v1697_v3  ;;  %3681 = vmatmul.msk.f32.gmra.mxu0 %vm859_vm0, %v3553_v1  ;;  %3745 = vmatmul.msk.f32.gmra.mxu1 %vm859_vm0, %v3617_v2  ;;  %v3560_v3 = vld [vmem:[%s4070_s3 + $0x3a0] ss:$2 sm:$0xff] }
 0x1ac   : > { %v2448_v8 = vadd.f32 %v4279_v43, %v2412_v6 }
 0x1ad   : > { %1829 = vst.msk [vmem:[#allocation2 + $0x118] sm:$0xff] %vm859_vm0, %v1765_v7 }
 0x1ae   : > { %2481 = vst.msk [vmem:[#allocation2 + $0x40] sm:$0xff] %vm2472_vm1, %v2448_v8 }
 0x1b0   : > { %v1177_v9 = vpop.f32.mrf.mxu0  ;;  %v1578_v10 = vpop.f32.mrf.mxu1 }
 0x1b1   : > { %v1698_v13 = vmax.f32 %v1177_v9, %v1578_v10 }
 0x1b3   : > { %v1766_v14 = vadd.f32 %v4142_v34, %v1698_v13  ;;  %3682 = vmatmul.msk.f32.gmra.mxu0 %vm859_vm0, %v3554_v11  ;;  %3746 = vmatmul.msk.f32.gmra.mxu1 %vm859_vm0, %v3618_v12  ;;  %v3561_v11 = vld [vmem:[%s4070_s3 + $0x3b0] ss:$2 sm:$0xff]  ;;  %v3625_v12 = vld [vmem:[%s4070_s3 + $0x3b1] ss:$2 sm:$0xff] }
 0x1b4   : > { %v1892_v15 = vld [vmem:[#allocation2 + $0x110] ss:$2 sm:$0xff]  ;;  %v1956_v16 = vld [vmem:[#allocation2 + $0x111] ss:$2 sm:$0xff] }
 0x1b5   : > { %1830 = vst.msk [vmem:[#allocation2 + $0x120] sm:$0xff] %vm859_vm0, %v1766_v14  ;;  %3775 = vmatmul.msk.f32.gmra.mxu2 %vm859_vm0, %v1892_v15  ;;  %3807 = vmatmul.msk.f32.gmra.mxu3 %vm859_vm0, %v1956_v16 }
 0x1b8   : > { %v1180_v17 = vpop.f32.mrf.mxu0  ;;  %v1581_v18 = vpop.f32.mrf.mxu1 }
 0x1b9   : > { %v1699_v21 = vmax.f32 %v1180_v17, %v1581_v18  ;;  %v2126_v22 = vpop.f32.mrf.mxu2  ;;  %v2335_v23 = vpop.f32.mrf.mxu3 }
 0x1ba   : > { %v2413_v24 = vmax.f32 %v2126_v22, %v2335_v23  ;;  %v3626_v22 = vld [vmem:[%s4070_s3 + $0x3c1] ss:$2 sm:$0xff] }
 0x1bb   : > { %v1767_v25 = vadd.f32 %v4142_v34, %v1699_v21  ;;  %3683 = vmatmul.msk.f32.gmra.mxu0 %vm859_vm0, %v3555_v19  ;;  %3747 = vmatmul.msk.f32.gmra.mxu1 %vm859_vm0, %v3619_v20  ;;  %v3562_v21 = vld [vmem:[%s4070_s3 + $0x3c0] ss:$2 sm:$0xff] }
 0x1bc   : > { %v2449_v26 = vadd.f32 %v4279_v43, %v2413_v24 }
 0x1bd   : > { %1831 = vst.msk [vmem:[#allocation2 + $0x128] sm:$0xff] %vm859_vm0, %v1767_v25 }
 0x1be   : > { %2482 = vst.msk [vmem:[#allocation2 + $0x48] sm:$0xff] %vm2472_vm1, %v2449_v26 }
 0x1c0   : > { %v1183_v27 = vpop.f32.mrf.mxu0  ;;  %v1584_v28 = vpop.f32.mrf.mxu1 }
 0x1c1   : > { %v1700_v31 = vmax.f32 %v1183_v27, %v1584_v28 }
 0x1c3   : > { %v1768_v32 = vadd.f32 %v4142_v34, %v1700_v31  ;;  %3684 = vmatmul.msk.f32.gmra.mxu0 %vm859_vm0, %v3556_v29  ;;  %3748 = vmatmul.msk.f32.gmra.mxu1 %vm859_vm0, %v3620_v30  ;;  %v3563_v29 = vld [vmem:[%s4070_s3 + $0x3d0] ss:$2 sm:$0xff]  ;;  %v3627_v30 = vld [vmem:[%s4070_s3 + $0x3d1] ss:$2 sm:$0xff] }
 0x1c4   : > { %v1894_v33 = vld [vmem:[#allocation2 + $0x120] ss:$2 sm:$0xff]  ;;  %v1958_v35 = vld [vmem:[#allocation2 + $0x121] ss:$2 sm:$0xff] }
 0x1c5   : > { %1832 = vst.msk [vmem:[#allocation2 + $0x130] sm:$0xff] %vm859_vm0, %v1768_v32  ;;  %3776 = vmatmul.msk.f32.gmra.mxu2 %vm859_vm0, %v1894_v33  ;;  %3808 = vmatmul.msk.f32.gmra.mxu3 %vm859_vm0, %v1958_v35 }
 0x1c8   : > { %v1186_v36 = vpop.f32.mrf.mxu0  ;;  %v1587_v37 = vpop.f32.mrf.mxu1 }
 0x1c9   : > { %v1701_v40 = vmax.f32 %v1186_v36, %v1587_v37  ;;  %v2129_v41 = vpop.f32.mrf.mxu2  ;;  %v2338_v42 = vpop.f32.mrf.mxu3 }
 0x1ca   : > { %v2414_v44 = vmax.f32 %v2129_v41, %v2338_v42  ;;  %v3628_v41 = vld [vmem:[%s4070_s3 + $0x3e1] ss:$2 sm:$0xff] }
 0x1cb   : > { %v1769_v45 = vadd.f32 %v4142_v34, %v1701_v40  ;;  %3685 = vmatmul.msk.f32.gmra.mxu0 %vm859_vm0, %v3557_v38  ;;  %3749 = vmatmul.msk.f32.gmra.mxu1 %vm859_vm0, %v3621_v39  ;;  %v3564_v40 = vld [vmem:[%s4070_s3 + $0x3e0] ss:$2 sm:$0xff] }
 0x1cc   : > { %v2450_v46 = vadd.f32 %v4279_v43, %v2414_v44 }
 0x1cd   : > { %1833 = vst.msk [vmem:[#allocation2 + $0x138] sm:$0xff] %vm859_vm0, %v1769_v45 }
 0x1ce   : > { %2483 = vst.msk [vmem:[#allocation2 + $0x50] sm:$0xff] %vm2472_vm1, %v2450_v46 }
 0x1d0   : > { %v1189_v47 = vpop.f32.mrf.mxu0  ;;  %v1590_v48 = vpop.f32.mrf.mxu1 }
 0x1d1   : > { %v1702_v51 = vmax.f32 %v1189_v47, %v1590_v48 }
 0x1d3   : > { %v1770_v52 = vadd.f32 %v4142_v34, %v1702_v51  ;;  %3686 = vmatmul.msk.f32.gmra.mxu0 %vm859_vm0, %v3558_v49  ;;  %3750 = vmatmul.msk.f32.gmra.mxu1 %vm859_vm0, %v3622_v50  ;;  %v3565_v49 = vld [vmem:[%s4070_s3 + $0x3f0] ss:$2 sm:$0xff]  ;;  %v3629_v50 = vld [vmem:[%s4070_s3 + $0x3f1] ss:$2 sm:$0xff] }
 0x1d4   : > { %v1896_v53 = vld [vmem:[#allocation2 + $0x130] ss:$2 sm:$0xff]  ;;  %v1960_v54 = vld [vmem:[#allocation2 + $0x131] ss:$2 sm:$0xff] }
 0x1d5   : > { %1834 = vst.msk [vmem:[#allocation2 + $0x140] sm:$0xff] %vm859_vm0, %v1770_v52  ;;  %3777 = vmatmul.msk.f32.gmra.mxu2 %vm859_vm0, %v1896_v53  ;;  %3809 = vmatmul.msk.f32.gmra.mxu3 %vm859_vm0, %v1960_v54 }
 0x1d8   : > { %v1192_v55 = vpop.f32.mrf.mxu0  ;;  %v1593_v56 = vpop.f32.mrf.mxu1 }
 0x1d9   : > { %v1703_v59 = vmax.f32 %v1192_v55, %v1593_v56  ;;  %v2132_v34 = vpop.f32.mrf.mxu2  ;;  %v2341_v60 = vpop.f32.mrf.mxu3 }
 0x1da   : > { %v2415_v61 = vmax.f32 %v2132_v34, %v2341_v60 }
 0x1db   : > { %v1771_v63 = vadd.f32 %v4465_v62, %v1703_v59  ;;  %3687 = vmatmul.msk.f32.gmra.mxu0 %vm859_vm0, %v3559_v57  ;;  %3751 = vmatmul.msk.f32.gmra.mxu1 %vm859_vm0, %v3623_v58  ;;  %v2537_v57 = vld [vmem:[%s4942_s5] sm:$0xff] }
 0x1dc   : > { %v2451_v0 = vadd.f32 %v4279_v43, %v2415_v61  ;;  %2602 = vmatpush.msrb.mxu2 %v2537_v57  ;;  %2715 = vmatpush.msrb.mxu3 %v2537_v57 }
 0x1dd   : > { %1835 = vst.msk [vmem:[#allocation2 + $0x148] sm:$0xff] %vm859_vm0, %v1771_v63 }
 0x1de   : > { %2484 = vst.msk [vmem:[#allocation2 + $0x58] sm:$0xff] %vm2472_vm1, %v2451_v0 }
 0x1e0   : > { %v1195_v1 = vpop.f32.mrf.mxu0  ;;  %v1596_v2 = vpop.f32.mrf.mxu1 }
 0x1e1   : > { %v1704_v5 = vmax.f32 %v1195_v1, %v1596_v2 }
 0x1e3   : > { %v1772_v6 = vadd.f32 %v4465_v62, %v1704_v5  ;;  %3688 = vmatmul.msk.f32.gmra.mxu0 %vm859_vm0, %v3560_v3  ;;  %3752 = vmatmul.msk.f32.gmra.mxu1 %vm859_vm0, %v3624_v4 }
 0x1e4   : > { %v1898_v7 = vld [vmem:[#allocation2 + $0x140] ss:$2 sm:$0xff]  ;;  %v1962_v8 = vld [vmem:[#allocation2 + $0x141] ss:$2 sm:$0xff] }
 0x1e5   : > { %1836 = vst.msk [vmem:[#allocation2 + $0x150] sm:$0xff] %vm859_vm0, %v1772_v6  ;;  %3778 = vmatmul.msk.f32.gmra.mxu2 %vm859_vm0, %v1898_v7  ;;  %3810 = vmatmul.msk.f32.gmra.mxu3 %vm859_vm0, %v1962_v8 }
 0x1e8   : > { %v1198_v9 = vpop.f32.mrf.mxu0  ;;  %v1599_v10 = vpop.f32.mrf.mxu1 }
 0x1e9   : > { %v1705_v13 = vmax.f32 %v1198_v9, %v1599_v10  ;;  %v2135_v14 = vpop.f32.mrf.mxu2  ;;  %v2344_v15 = vpop.f32.mrf.mxu3 }
 0x1ea   : > { %v2416_v16 = vmax.f32 %v2135_v14, %v2344_v15 }
 0x1eb   : > { %v1773_v17 = vadd.f32 %v4465_v62, %v1705_v13  ;;  %3689 = vmatmul.msk.f32.gmra.mxu0 %vm859_vm0, %v3561_v11  ;;  %3753 = vmatmul.msk.f32.gmra.mxu1 %vm859_vm0, %v3625_v12 }
 0x1ec   : > { %v2452_v18 = vadd.f32 %v4279_v43, %v2416_v16 }
 0x1ed   : > { %1837 = vst.msk [vmem:[#allocation2 + $0x158] sm:$0xff] %vm859_vm0, %v1773_v17 }
 0x1ee   : > { %2485 = vst.msk [vmem:[#allocation2 + $0x60] sm:$0xff] %vm2472_vm1, %v2452_v18 }
 0x1f0   : > { %v1201_v19 = vpop.f32.mrf.mxu0  ;;  %v1602_v20 = vpop.f32.mrf.mxu1 }
 0x1f1   : > { %v1706_v23 = vmax.f32 %v1201_v19, %v1602_v20 }
 0x1f3   : > { %v1774_v24 = vadd.f32 %v4465_v62, %v1706_v23  ;;  %3690 = vmatmul.msk.f32.gmra.mxu0 %vm859_vm0, %v3562_v21  ;;  %3754 = vmatmul.msk.f32.gmra.mxu1 %vm859_vm0, %v3626_v22 }
 0x1f4   : > { %v1900_v25 = vld [vmem:[#allocation2 + $0x150] ss:$2 sm:$0xff]  ;;  %v1964_v26 = vld [vmem:[#allocation2 + $0x151] ss:$2 sm:$0xff] }
 0x1f5   : > { %1838 = vst.msk [vmem:[#allocation2 + $0x160] sm:$0xff] %vm859_vm0, %v1774_v24  ;;  %3779 = vmatmul.msk.f32.gmra.mxu2 %vm859_vm0, %v1900_v25  ;;  %3811 = vmatmul.msk.f32.gmra.mxu3 %vm859_vm0, %v1964_v26 }
 0x1f8   : > { %v1204_v27 = vpop.f32.mrf.mxu0  ;;  %v1605_v28 = vpop.f32.mrf.mxu1 }
 0x1f9   : > { %v1707_v31 = vmax.f32 %v1204_v27, %v1605_v28  ;;  %v2138_v32 = vpop.f32.mrf.mxu2  ;;  %v2347_v33 = vpop.f32.mrf.mxu3 }
 0x1fa   : > { %v2417_v35 = vmax.f32 %v2138_v32, %v2347_v33 }
 0x1fb   : > { %v1775_v36 = vadd.f32 %v4465_v62, %v1707_v31  ;;  %3691 = vmatmul.msk.f32.gmra.mxu0 %vm859_vm0, %v3563_v29  ;;  %3755 = vmatmul.msk.f32.gmra.mxu1 %vm859_vm0, %v3627_v30 }
 0x1fc   : > { %v2453_v37 = vadd.f32 %v4279_v43, %v2417_v35 }
 0x1fd   : > { %1839 = vst.msk [vmem:[#allocation2 + $0x168] sm:$0xff] %vm859_vm0, %v1775_v36 }
 0x1fe   : > { %2486 = vst.msk [vmem:[#allocation2 + $0x68] sm:$0xff] %vm2472_vm1, %v2453_v37 }
 0x200   : > { %v1207_v38 = vpop.f32.mrf.mxu0  ;;  %v1608_v39 = vpop.f32.mrf.mxu1 }
 0x201   : > { %v1708_v42 = vmax.f32 %v1207_v38, %v1608_v39 }
 0x203   : > { %v1776_v44 = vadd.f32 %v4465_v62, %v1708_v42  ;;  %3692 = vmatmul.msk.f32.gmra.mxu0 %vm859_vm0, %v3564_v40  ;;  %3756 = vmatmul.msk.f32.gmra.mxu1 %vm859_vm0, %v3628_v41 }
 0x204   : > { %v1902_v45 = vld [vmem:[#allocation2 + $0x160] ss:$2 sm:$0xff]  ;;  %v1966_v46 = vld [vmem:[#allocation2 + $0x161] ss:$2 sm:$0xff] }
 0x205   : > { %1840 = vst.msk [vmem:[#allocation2 + $0x170] sm:$0xff] %vm859_vm0, %v1776_v44  ;;  %3780 = vmatmul.msk.f32.gmra.mxu2 %vm859_vm0, %v1902_v45  ;;  %3812 = vmatmul.msk.f32.gmra.mxu3 %vm859_vm0, %v1966_v46 }
 0x208   : > { %v1210_v47 = vpop.f32.mrf.mxu0  ;;  %v1611_v48 = vpop.f32.mrf.mxu1 }
 0x209   : > { %v1709_v51 = vmax.f32 %v1210_v47, %v1611_v48  ;;  %v2141_v52 = vpop.f32.mrf.mxu2  ;;  %v2350_v53 = vpop.f32.mrf.mxu3 }
 0x20a   : > { %v2418_v54 = vmax.f32 %v2141_v52, %v2350_v53 }
 0x20b   : > { %v1777_v55 = vadd.f32 %v4465_v62, %v1709_v51  ;;  %3693 = vmatmul.msk.f32.gmra.mxu0 %vm859_vm0, %v3565_v49  ;;  %3757 = vmatmul.msk.f32.gmra.mxu1 %vm859_vm0, %v3629_v50 }
 0x20c   : > { %v2454_v56 = vadd.f32 %v4279_v43, %v2418_v54 }
 0x20d   : > { %1841 = vst.msk [vmem:[#allocation2 + $0x178] sm:$0xff] %vm859_vm0, %v1777_v55 }
 0x20e   : > { %2487 = vst.msk [vmem:[#allocation2 + $0x70] sm:$0xff] %vm2472_vm1, %v2454_v56 }
 0x210   : > { %v1213_v58 = vpop.f32.mrf.mxu0  ;;  %v1614_v59 = vpop.f32.mrf.mxu1 }
 0x211   : > { %v1710_v34 = vmax.f32 %v1213_v58, %v1614_v59 }
 0x213   : > { %v1778_v60 = vadd.f32 %v4465_v62, %v1710_v34 }
 0x214   : > { %v1904_v61 = vld [vmem:[#allocation2 + $0x170] ss:$2 sm:$0xff]  ;;  %v1968_v63 = vld [vmem:[#allocation2 + $0x171] ss:$2 sm:$0xff] }
 0x215   : > { %1842 = vst.msk [vmem:[#allocation2 + $0x180] sm:$0xff] %vm859_vm0, %v1778_v60  ;;  %3781 = vmatmul.msk.f32.gmra.mxu2 %vm859_vm0, %v1904_v61  ;;  %3813 = vmatmul.msk.f32.gmra.mxu3 %vm859_vm0, %v1968_v63 }
 0x218   : > { %v1216_v0 = vpop.f32.mrf.mxu0  ;;  %v1617_v1 = vpop.f32.mrf.mxu1 }
 0x219   : > { %v1711_v2 = vmax.f32 %v1216_v0, %v1617_v1  ;;  %v2144_v3 = vpop.f32.mrf.mxu2  ;;  %v2353_v4 = vpop.f32.mrf.mxu3 }
 0x21a   : > { %v2419_v5 = vmax.f32 %v2144_v3, %v2353_v4 }
 0x21b   : > { %v1779_v6 = vadd.f32 %v4465_v62, %v1711_v2 }
 0x21c   : > { %v2455_v7 = vadd.f32 %v4279_v43, %v2419_v5 }
 0x21d   : > { %1843 = vst.msk [vmem:[#allocation2 + $0x188] sm:$0xff] %vm859_vm0, %v1779_v6 }
 0x21e   : > { %2488 = vst.msk [vmem:[#allocation2 + $0x78] sm:$0xff] %vm2472_vm1, %v2455_v7 }
 0x220   : > { %v1219_v8 = vpop.f32.mrf.mxu0  ;;  %v1620_v9 = vpop.f32.mrf.mxu1 }
 0x221   : > { %v1712_v10 = vmax.f32 %v1219_v8, %v1620_v9 }
 0x223   : > { %v1780_v11 = vadd.f32 %v4465_v62, %v1712_v10 }
 0x224   : > { %v1906_v12 = vld [vmem:[#allocation2 + $0x180] ss:$2 sm:$0xff]  ;;  %v1970_v13 = vld [vmem:[#allocation2 + $0x181] ss:$2 sm:$0xff] }
 0x225   : > { %1844 = vst.msk [vmem:[#allocation2 + $0x190] sm:$0xff] %vm859_vm0, %v1780_v11  ;;  %3782 = vmatmul.msk.f32.gmra.mxu2 %vm859_vm0, %v1906_v12  ;;  %3814 = vmatmul.msk.f32.gmra.mxu3 %vm859_vm0, %v1970_v13 }
 0x228   : > { %v1222_v14 = vpop.f32.mrf.mxu0  ;;  %v1623_v15 = vpop.f32.mrf.mxu1 }
 0x229   : > { %v1713_v16 = vmax.f32 %v1222_v14, %v1623_v15  ;;  %v2147_v17 = vpop.f32.mrf.mxu2  ;;  %v2356_v18 = vpop.f32.mrf.mxu3 }
 0x22a   : > { %v2420_v19 = vmax.f32 %v2147_v17, %v2356_v18 }
 0x22b   : > { %v1781_v20 = vadd.f32 %v4465_v62, %v1713_v16 }
 0x22c   : > { %v2456_v21 = vadd.f32 %v4279_v43, %v2420_v19 }
 0x22d   : > { %1845 = vst.msk [vmem:[#allocation2 + $0x198] sm:$0xff] %vm859_vm0, %v1781_v20 }
 0x22e   : > { %2489 = vst.msk [vmem:[#allocation2 + $0x80] sm:$0xff] %vm2472_vm1, %v2456_v21 }
 0x230   : > { %v1225_v22 = vpop.f32.mrf.mxu0  ;;  %v1626_v23 = vpop.f32.mrf.mxu1 }
 0x231   : > { %v1714_v24 = vmax.f32 %v1225_v22, %v1626_v23 }
 0x233   : > { %v1782_v25 = vadd.f32 %v4465_v62, %v1714_v24 }
 0x234   : > { %v1908_v26 = vld [vmem:[#allocation2 + $0x190] ss:$2 sm:$0xff]  ;;  %v1972_v27 = vld [vmem:[#allocation2 + $0x191] ss:$2 sm:$0xff] }
 0x235   : > { %1846 = vst.msk [vmem:[#allocation2 + $0x1a0] sm:$0xff] %vm859_vm0, %v1782_v25  ;;  %3783 = vmatmul.msk.f32.gmra.mxu2 %vm859_vm0, %v1908_v26  ;;  %3815 = vmatmul.msk.f32.gmra.mxu3 %vm859_vm0, %v1972_v27 }
 0x238   : > { %v1228_v28 = vpop.f32.mrf.mxu0  ;;  %v1629_v29 = vpop.f32.mrf.mxu1 }
 0x239   : > { %v1715_v30 = vmax.f32 %v1228_v28, %v1629_v29  ;;  %v2150_v31 = vpop.f32.mrf.mxu2  ;;  %v2359_v32 = vpop.f32.mrf.mxu3  ;;  %v4580_v28 = vld [vmem:[%s4941_s4] ss:$0 sm:$0xff] }
 0x23a   : > { %v2421_v33 = vmax.f32 %v2150_v31, %v2359_v32 }
 0x23b   : > { %v1783_v35 = vadd.f32 %v4465_v62, %v1715_v30 }
 0x23c   : > { %v2457_v36 = vadd.f32 %v4279_v43, %v2421_v33 }
 0x23d   : > { %1847 = vst.msk [vmem:[#allocation2 + $0x1a8] sm:$0xff] %vm859_vm0, %v1783_v35 }
 0x23e   : > { %2490 = vst.msk [vmem:[#allocation2 + $0x88] sm:$0xff] %vm2472_vm1, %v2457_v36 }
 0x240   : > { %v1231_v37 = vpop.f32.mrf.mxu0  ;;  %v1632_v38 = vpop.f32.mrf.mxu1 }
 0x241   : > { %v1716_v39 = vmax.f32 %v1231_v37, %v1632_v38 }
 0x243   : > { %v1784_v40 = vadd.f32 %v4465_v62, %v1716_v39 }
 0x244   : > { %v1910_v41 = vld [vmem:[#allocation2 + $0x1a0] ss:$2 sm:$0xff]  ;;  %v1974_v42 = vld [vmem:[#allocation2 + $0x1a1] ss:$2 sm:$0xff] }
 0x245   : > { %1848 = vst.msk [vmem:[#allocation2 + $0x1b0] sm:$0xff] %vm859_vm0, %v1784_v40  ;;  %3784 = vmatmul.msk.f32.gmra.mxu2 %vm859_vm0, %v1910_v41  ;;  %3816 = vmatmul.msk.f32.gmra.mxu3 %vm859_vm0, %v1974_v42 }
 0x248   : > { %v1234_v44 = vpop.f32.mrf.mxu0  ;;  %v1635_v45 = vpop.f32.mrf.mxu1 }
 0x249   : > { %v1717_v46 = vmax.f32 %v1234_v44, %v1635_v45  ;;  %v2153_v47 = vpop.f32.mrf.mxu2  ;;  %v2362_v48 = vpop.f32.mrf.mxu3 }
 0x24a   : > { %v2422_v49 = vmax.f32 %v2153_v47, %v2362_v48 }
 0x24b   : > { %v1785_v50 = vadd.f32 %v4465_v62, %v1717_v46 }
 0x24c   : > { %v2458_v51 = vadd.f32 %v4279_v43, %v2422_v49 }
 0x24d   : > { %1849 = vst.msk [vmem:[#allocation2 + $0x1b8] sm:$0xff] %vm859_vm0, %v1785_v50 }
 0x24e   : > { %2491 = vst.msk [vmem:[#allocation2 + $0x90] sm:$0xff] %vm2472_vm1, %v2458_v51 }
 0x250   : > { %v1237_v52 = vpop.f32.mrf.mxu0  ;;  %v1638_v53 = vpop.f32.mrf.mxu1 }
 0x251   : > { %v1718_v54 = vmax.f32 %v1237_v52, %v1638_v53  ;;  %v2505_v52 = vld [vmem:[#allocation2] ss:$2 sm:$0xff]  ;;  %v2521_v53 = vld [vmem:[#allocation2 + $0x1] ss:$2 sm:$0xff] }
 0x253   : > { %v1786_v55 = vadd.f32 %v4465_v62, %v1718_v54  ;;  %v2522_v54 = vld [vmem:[#allocation2 + $0x11] ss:$2 sm:$0xff] }
 0x254   : > { %v1912_v56 = vld [vmem:[#allocation2 + $0x1b0] ss:$2 sm:$0xff]  ;;  %v1976_v57 = vld [vmem:[#allocation2 + $0x1b1] ss:$2 sm:$0xff] }
 0x255   : > { %1850 = vst.msk [vmem:[#allocation2 + $0x1c0] sm:$0xff] %vm859_vm0, %v1786_v55  ;;  %3785 = vmatmul.msk.f32.gmra.mxu2 %vm859_vm0, %v1912_v56  ;;  %3817 = vmatmul.msk.f32.gmra.mxu3 %vm859_vm0, %v1976_v57 }
 0x258   : > { %v1240_v58 = vpop.f32.mrf.mxu0  ;;  %v1641_v59 = vpop.f32.mrf.mxu1 }
 0x259   : > { %v1719_v34 = vmax.f32 %v1240_v58, %v1641_v59  ;;  %v2156_v60 = vpop.f32.mrf.mxu2  ;;  %v2365_v61 = vpop.f32.mrf.mxu3  ;;  %v2507_v59 = vld [vmem:[#allocation2 + $0x20] ss:$2 sm:$0xff] }
 0x25a   : > { %v2423_v63 = vmax.f32 %v2156_v60, %v2365_v61  ;;  %v2508_v60 = vld [vmem:[#allocation2 + $0x30] ss:$2 sm:$0xff]  ;;  %v2524_v61 = vld [vmem:[#allocation2 + $0x31] ss:$2 sm:$0xff] }
 0x25b   : > { %v1787_v0 = vadd.f32 %v4465_v62, %v1719_v34  ;;  %v2523_v34 = vld [vmem:[#allocation2 + $0x21] ss:$2 sm:$0xff] }
 0x25c   : > { %v2459_v1 = vadd.f32 %v4279_v43, %v2423_v63 }
 0x25d   : > { %1851 = vst.msk [vmem:[#allocation2 + $0x1c8] sm:$0xff] %vm859_vm0, %v1787_v0 }
 0x25e   : > { %2492 = vst.msk [vmem:[#allocation2 + $0x98] sm:$0xff] %vm2472_vm1, %v2459_v1 }
 0x260   : > { %v1243_v2 = vpop.f32.mrf.mxu0  ;;  %v1644_v3 = vpop.f32.mrf.mxu1 }
 0x261   : > { %v1720_v4 = vmax.f32 %v1243_v2, %v1644_v3  ;;  %v2509_v3 = vld [vmem:[#allocation2 + $0x40] ss:$2 sm:$0xff] }
 0x263   : > { %v1788_v5 = vadd.f32 %v4465_v62, %v1720_v4  ;;  %v2525_v4 = vld [vmem:[#allocation2 + $0x41] ss:$2 sm:$0xff] }
 0x264   : > { %v1914_v6 = vld [vmem:[#allocation2 + $0x1c0] ss:$2 sm:$0xff]  ;;  %v1978_v7 = vld [vmem:[#allocation2 + $0x1c1] ss:$2 sm:$0xff] }
 0x265   : > { %1852 = vst.msk [vmem:[#allocation2 + $0x1d0] sm:$0xff] %vm859_vm0, %v1788_v5  ;;  %3786 = vmatmul.msk.f32.gmra.mxu2 %vm859_vm0, %v1914_v6  ;;  %3818 = vmatmul.msk.f32.gmra.mxu3 %vm859_vm0, %v1978_v7  ;;  %v2510_v5 = vld [vmem:[#allocation2 + $0x50] ss:$2 sm:$0xff]  ;;  %v2526_v6 = vld [vmem:[#allocation2 + $0x51] ss:$2 sm:$0xff] }
 0x268   : > { %v1246_v8 = vpop.f32.mrf.mxu0  ;;  %v1647_v9 = vpop.f32.mrf.mxu1 }
 0x269   : > { %v1721_v10 = vmax.f32 %v1246_v8, %v1647_v9  ;;  %v2159_v11 = vpop.f32.mrf.mxu2  ;;  %v2368_v12 = vpop.f32.mrf.mxu3 }
 0x26a   : > { %v2424_v13 = vmax.f32 %v2159_v11, %v2368_v12  ;;  %v2511_v11 = vld [vmem:[#allocation2 + $0x60] ss:$2 sm:$0xff]  ;;  %v2527_v12 = vld [vmem:[#allocation2 + $0x61] ss:$2 sm:$0xff] }
 0x26b   : > { %v1789_v14 = vadd.f32 %v4465_v62, %v1721_v10 }
 0x26c   : > { %v2460_v15 = vadd.f32 %v4279_v43, %v2424_v13  ;;  %v2512_v13 = vld [vmem:[#allocation2 + $0x70] ss:$2 sm:$0xff] }
 0x26d   : > { %1853 = vst.msk [vmem:[#allocation2 + $0x1d8] sm:$0xff] %vm859_vm0, %v1789_v14  ;;  %v2528_v14 = vld [vmem:[#allocation2 + $0x71] ss:$2 sm:$0xff] }
 0x26e   : > { %2493 = vst.msk [vmem:[#allocation2 + $0xa0] sm:$0xff] %vm2472_vm1, %v2460_v15 }
 0x270   : > { %v1249_v16 = vpop.f32.mrf.mxu0  ;;  %v1650_v17 = vpop.f32.mrf.mxu1 }
 0x271   : > { %v1722_v18 = vmax.f32 %v1249_v16, %v1650_v17 }
 0x273   : > { %v1790_v19 = vadd.f32 %v4465_v62, %v1722_v18 }
 0x274   : > { %v1916_v20 = vld [vmem:[#allocation2 + $0x1d0] ss:$2 sm:$0xff]  ;;  %v1980_v21 = vld [vmem:[#allocation2 + $0x1d1] ss:$2 sm:$0xff] }
 0x275   : > { %1854 = vst.msk [vmem:[#allocation2 + $0x1e0] sm:$0xff] %vm859_vm0, %v1790_v19  ;;  %3787 = vmatmul.msk.f32.gmra.mxu2 %vm859_vm0, %v1916_v20  ;;  %3819 = vmatmul.msk.f32.gmra.mxu3 %vm859_vm0, %v1980_v21  ;;  %v2513_v19 = vld [vmem:[#allocation2 + $0x80] ss:$2 sm:$0xff]  ;;  %v2529_v20 = vld [vmem:[#allocation2 + $0x81] ss:$2 sm:$0xff] }
 0x276   : > { %v2834_v21 = vld [vmem:[%s4944_s7 + $0x8] sm:$0xff] }
 0x277   : > { %2873 = vmatpush.msra.mxu2 %v2834_v21  ;;  %2938 = vmatpush.msra.mxu3 %v2834_v21 }
 0x278   : > { %v1252_v22 = vpop.f32.mrf.mxu0  ;;  %v1653_v23 = vpop.f32.mrf.mxu1 }
 0x279   : > { %v1723_v43 = vmax.f32 %v1252_v22, %v1653_v23  ;;  %v2162_v24 = vpop.f32.mrf.mxu2  ;;  %v2371_v25 = vpop.f32.mrf.mxu3  ;;  %v2514_v22 = vld [vmem:[#allocation2 + $0x90] ss:$2 sm:$0xff]  ;;  %v2530_v23 = vld [vmem:[#allocation2 + $0x91] ss:$2 sm:$0xff] }
 0x27a   : > { %v2425_v26 = vmax.f32 %v2162_v24, %v2371_v25 }
 0x27b   : > { %v1791_v27 = vadd.f32 %v4465_v62, %v1723_v43 }
 0x27c   : > { %v2461_v29 = vadd.f32 %v4580_v28, %v2425_v26 }
 0x27d   : > { %1855 = vst.msk [vmem:[#allocation2 + $0x1e8] sm:$0xff] %vm859_vm0, %v1791_v27 }
 0x27e   : > { %2494 = vst.msk [vmem:[#allocation2 + $0xa8] sm:$0xff] %vm2472_vm1, %v2461_v29 }
 0x280   : > { %v1255_v30 = vpop.f32.mrf.mxu0  ;;  %v1656_v31 = vpop.f32.mrf.mxu1 }
 0x281   : > { %v1724_v32 = vmax.f32 %v1255_v30, %v1656_v31 }
 0x283   : > { %v1792_v33 = vadd.f32 %v4465_v62, %v1724_v32 }
 0x284   : > { %v1918_v35 = vld [vmem:[#allocation2 + $0x1e0] ss:$2 sm:$0xff]  ;;  %v1982_v36 = vld [vmem:[#allocation2 + $0x1e1] ss:$2 sm:$0xff] }
 0x285   : > { %1856 = vst.msk [vmem:[#allocation2 + $0x1f0] sm:$0xff] %vm859_vm0, %v1792_v33  ;;  %3788 = vmatmul.msk.f32.gmra.mxu2 %vm859_vm0, %v1918_v35  ;;  %3820 = vmatmul.msk.f32.gmra.mxu3 %vm859_vm0, %v1982_v36  ;;  %v2515_v27 = vld [vmem:[#allocation2 + $0xa0] ss:$2 sm:$0xff]  ;;  %v2531_v29 = vld [vmem:[#allocation2 + $0xa1] ss:$2 sm:$0xff] }
 0x288   : > { %v1258_v37 = vpop.f32.mrf.mxu0  ;;  %v1659_v38 = vpop.f32.mrf.mxu1 }
 0x289   : > { %v1725_v39 = vmax.f32 %v1258_v37, %v1659_v38  ;;  %v2165_v40 = vpop.f32.mrf.mxu2  ;;  %v2374_v41 = vpop.f32.mrf.mxu3 }
 0x28a   : > { %v2426_v42 = vmax.f32 %v2165_v40, %v2374_v41 }
 0x28b   : > { %v1793_v44 = vadd.f32 %v4465_v62, %v1725_v39  ;;  %v2506_v62 = vld [vmem:[#allocation2 + $0x10] ss:$2 sm:$0xff] }
 0x28c   : > { %v2462_v45 = vadd.f32 %v4580_v28, %v2426_v42 }
 0x28d   : > { %1857 = vst.msk [vmem:[#allocation2 + $0x1f8] sm:$0xff] %vm859_vm0, %v1793_v44 }
 0x28e   : > { %2495 = vst.msk [vmem:[#allocation2 + $0xb0] sm:$0xff] %vm2472_vm1, %v2462_v45 }
 0x294   : > { %v1920_v46 = vld [vmem:[#allocation2 + $0x1f0] ss:$2 sm:$0xff]  ;;  %v1984_v47 = vld [vmem:[#allocation2 + $0x1f1] ss:$2 sm:$0xff] }
 0x295   : > { %3789 = vmatmul.msk.f32.gmra.mxu2 %vm859_vm0, %v1920_v46  ;;  %3821 = vmatmul.msk.f32.gmra.mxu3 %vm859_vm0, %v1984_v47 }
 0x298   : > { %v2168_v48 = vpop.f32.mrf.mxu2  ;;  %v2377_v49 = vpop.f32.mrf.mxu3 }
 0x299   : > { %v2427_v50 = vmax.f32 %v2168_v48, %v2377_v49  ;;  %v2833_v48 = vld [vmem:[%s4944_s7] sm:$0xff] }
 0x29a   : > { %2874 = vmatpush.msra.mxu2 %v2833_v48  ;;  %2939 = vmatpush.msra.mxu3 %v2833_v48 }
 0x29b   : > { %v2463_v51 = vadd.f32 %v4580_v28, %v2427_v50 }
 0x29d   : > { %2496 = vst.msk [vmem:[#allocation2 + $0xb8] sm:$0xff] %vm2472_vm1, %v2463_v51  ;;  %3822 = vmatmul.msk.f32.vlgmr.msrb.gmra.mxu2 %vm2472_vm1, %v2505_v52  ;;  %3838 = vmatmul.msk.f32.vlgmr.msrb.gmra.mxu3 %vm2472_vm1, %v2521_v53  ;;  %v4652_v53 = vld [vmem:[%s4943_s6] ss:$0 sm:$0xff] }
 0x2a4   : > { %v2516_v30 = vld [vmem:[#allocation2 + $0xb0] ss:$2 sm:$0xff]  ;;  %v2532_v31 = vld [vmem:[#allocation2 + $0xb1] ss:$2 sm:$0xff] }
 0x2a5   : > { %3823 = vmatmul.msk.f32.gmra.mxu2 %vm2472_vm1, %v2506_v62  ;;  %3839 = vmatmul.msk.f32.gmra.mxu3 %vm2472_vm1, %v2522_v54 }
 0x2a8   : > { %v2171_v55 = vpop.f32.mrf.mxu2  ;;  %v2380_v56 = vpop.f32.mrf.mxu3 }
 0x2a9   : > { %v2428_v57 = vmax.f32 %v2171_v55, %v2380_v56 }
 0x2ab   : > { %v2464_v58 = vadd.f32 %v4580_v28, %v2428_v57 }
 0x2ad   : > { %2497 = vst.msk [vmem:[#allocation2 + $0xc0] sm:$0xff] %vm2472_vm1, %v2464_v58  ;;  %3824 = vmatmul.msk.f32.gmra.mxu2 %vm2472_vm1, %v2507_v59  ;;  %3840 = vmatmul.msk.f32.gmra.mxu3 %vm2472_vm1, %v2523_v34 }
 0x2b5   : > { %3825 = vmatmul.msk.f32.gmra.mxu2 %vm2472_vm1, %v2508_v60  ;;  %3841 = vmatmul.msk.f32.gmra.mxu3 %vm2472_vm1, %v2524_v61 }
 0x2b8   : > { %v2174_v63 = vpop.f32.mrf.mxu2  ;;  %v2383_v0 = vpop.f32.mrf.mxu3 }
 0x2b9   : > { %v2429_v1 = vmax.f32 %v2174_v63, %v2383_v0 }
 0x2bb   : > { %v2465_v2 = vadd.f32 %v4580_v28, %v2429_v1 }
 0x2bd   : > { %2498 = vst.msk [vmem:[#allocation2 + $0xc8] sm:$0xff] %vm2472_vm1, %v2465_v2  ;;  %3826 = vmatmul.msk.f32.gmra.mxu2 %vm2472_vm1, %v2509_v3  ;;  %3842 = vmatmul.msk.f32.gmra.mxu3 %vm2472_vm1, %v2525_v4 }
 0x2c4   : > { %v2517_v37 = vld [vmem:[#allocation2 + $0xc0] ss:$2 sm:$0xff]  ;;  %v2533_v38 = vld [vmem:[#allocation2 + $0xc1] ss:$2 sm:$0xff] }
 0x2c5   : > { %3827 = vmatmul.msk.f32.gmra.mxu2 %vm2472_vm1, %v2510_v5  ;;  %3843 = vmatmul.msk.f32.gmra.mxu3 %vm2472_vm1, %v2526_v6 }
 0x2c8   : > { %v2177_v7 = vpop.f32.mrf.mxu2  ;;  %v2386_v8 = vpop.f32.mrf.mxu3 }
 0x2c9   : > { %v2430_v9 = vmax.f32 %v2177_v7, %v2386_v8 }
 0x2cb   : > { %v2466_v10 = vadd.f32 %v4580_v28, %v2430_v9 }
 0x2cd   : > { %2499 = vst.msk [vmem:[#allocation2 + $0xd0] sm:$0xff] %vm2472_vm1, %v2466_v10  ;;  %3828 = vmatmul.msk.f32.gmra.mxu2 %vm2472_vm1, %v2511_v11  ;;  %3844 = vmatmul.msk.f32.gmra.mxu3 %vm2472_vm1, %v2527_v12 }
 0x2d5   : > { %3829 = vmatmul.msk.f32.gmra.mxu2 %vm2472_vm1, %v2512_v13  ;;  %3845 = vmatmul.msk.f32.gmra.mxu3 %vm2472_vm1, %v2528_v14 }
 0x2d8   : > { %v2180_v15 = vpop.f32.mrf.mxu2  ;;  %v2389_v16 = vpop.f32.mrf.mxu3 }
 0x2d9   : > { %v2431_v17 = vmax.f32 %v2180_v15, %v2389_v16 }
 0x2db   : > { %v2467_v18 = vadd.f32 %v4580_v28, %v2431_v17 }
 0x2dd   : > { %2500 = vst.msk [vmem:[#allocation2 + $0xd8] sm:$0xff] %vm2472_vm1, %v2467_v18  ;;  %3830 = vmatmul.msk.f32.gmra.mxu2 %vm2472_vm1, %v2513_v19  ;;  %3846 = vmatmul.msk.f32.gmra.mxu3 %vm2472_vm1, %v2529_v20 }
 0x2e4   : > { %v2518_v39 = vld [vmem:[#allocation2 + $0xd0] ss:$2 sm:$0xff]  ;;  %v2534_v40 = vld [vmem:[#allocation2 + $0xd1] ss:$2 sm:$0xff] }
 0x2e5   : > { %3831 = vmatmul.msk.f32.gmra.mxu2 %vm2472_vm1, %v2514_v22  ;;  %3847 = vmatmul.msk.f32.gmra.mxu3 %vm2472_vm1, %v2530_v23 }
 0x2e8   : > { %v2183_v43 = vpop.f32.mrf.mxu2  ;;  %v2392_v24 = vpop.f32.mrf.mxu3 }
 0x2e9   : > { %v2432_v25 = vmax.f32 %v2183_v43, %v2392_v24 }
 0x2eb   : > { %v2468_v26 = vadd.f32 %v4580_v28, %v2432_v25 }
 0x2ed   : > { %2501 = vst.msk [vmem:[#allocation2 + $0xe0] sm:$0xff] %vm2472_vm1, %v2468_v26  ;;  %3832 = vmatmul.msk.f32.gmra.mxu2 %vm2472_vm1, %v2515_v27  ;;  %3848 = vmatmul.msk.f32.gmra.mxu3 %vm2472_vm1, %v2531_v29 }
 0x2f5   : > { %3833 = vmatmul.msk.f32.gmra.mxu2 %vm2472_vm1, %v2516_v30  ;;  %3849 = vmatmul.msk.f32.gmra.mxu3 %vm2472_vm1, %v2532_v31 }
 0x2f8   : > { %v2186_v32 = vpop.f32.mrf.mxu2  ;;  %v2395_v33 = vpop.f32.mrf.mxu3 }
 0x2f9   : > { %v2433_v35 = vmax.f32 %v2186_v32, %v2395_v33 }
 0x2fb   : > { %v2469_v36 = vadd.f32 %v4580_v28, %v2433_v35 }
 0x2fd   : > { %2502 = vst.msk [vmem:[#allocation2 + $0xe8] sm:$0xff] %vm2472_vm1, %v2469_v36  ;;  %3834 = vmatmul.msk.f32.gmra.mxu2 %vm2472_vm1, %v2517_v37  ;;  %3850 = vmatmul.msk.f32.gmra.mxu3 %vm2472_vm1, %v2533_v38 }
 0x304   : > { %v2519_v46 = vld [vmem:[#allocation2 + $0xe0] ss:$2 sm:$0xff]  ;;  %v2535_v47 = vld [vmem:[#allocation2 + $0xe1] ss:$2 sm:$0xff] }
 0x305   : > { %3835 = vmatmul.msk.f32.gmra.mxu2 %vm2472_vm1, %v2518_v39  ;;  %3851 = vmatmul.msk.f32.gmra.mxu3 %vm2472_vm1, %v2534_v40 }
 0x308   : > { %v2189_v41 = vpop.f32.mrf.mxu2  ;;  %v2398_v42 = vpop.f32.mrf.mxu3 }
 0x309   : > { %v2434_v44 = vmax.f32 %v2189_v41, %v2398_v42 }
 0x30b   : > { %v2470_v45 = vadd.f32 %v4580_v28, %v2434_v44 }
 0x30d   : > { %2503 = vst.msk [vmem:[#allocation2 + $0xf0] sm:$0xff] %vm2472_vm1, %v2470_v45  ;;  %3836 = vmatmul.msk.f32.gmra.mxu2 %vm2472_vm1, %v2519_v46  ;;  %3852 = vmatmul.msk.f32.gmra.mxu3 %vm2472_vm1, %v2535_v47 }
 0x318   : > { %v2192_v49 = vpop.f32.mrf.mxu2  ;;  %v2401_v50 = vpop.f32.mrf.mxu3 }
 0x319   : > { %v2435_v51 = vmax.f32 %v2192_v49, %v2401_v50 }
 0x31b   : > { %v2471_v52 = vadd.f32 %v4580_v28, %v2435_v51 }
 0x31d   : > { %2504 = vst.msk [vmem:[#allocation2 + $0xf8] sm:$0xff] %vm2472_vm1, %v2471_v52 }
 0x320   : > { %v2604_v62 = vpop.f32.mrf.mxu2  ;;  %v2717_v54 = vpop.f32.mrf.mxu3 }
 0x321   : > { %v2765_v55 = vmax.f32 %v2604_v62, %v2717_v54 }
 0x323   : > { %v2785_v56 = vadd.f32 %v4652_v53, %v2765_v55 }
 0x324   : > { %v2520_v57 = vld [vmem:[#allocation2 + $0xf0] ss:$2 sm:$0xff]  ;;  %v2536_v58 = vld [vmem:[#allocation2 + $0xf1] ss:$2 sm:$0xff] }
 0x325   : > { %2801 = vst.msk [vmem:[#allocation2] sm:$0xff] %vm2472_vm1, %v2785_v56  ;;  %3837 = vmatmul.msk.f32.gmra.mxu2 %vm2472_vm1, %v2520_v57  ;;  %3853 = vmatmul.msk.f32.gmra.mxu3 %vm2472_vm1, %v2536_v58 }
 0x328   : > { %v2607_v28 = vpop.f32.mrf.mxu2  ;;  %v2720_v59 = vpop.f32.mrf.mxu3 }
 0x329   : > { %v2766_v34 = vmax.f32 %v2607_v28, %v2720_v59 }
 0x32b   : > { %v2786_v60 = vadd.f32 %v4652_v53, %v2766_v34 }
 0x32d   : > { %2802 = vst.msk [vmem:[#allocation2 + $0x8] sm:$0xff] %vm2472_vm1, %v2786_v60 }
 0x330   : > { %v2610_v61 = vpop.f32.mrf.mxu2  ;;  %v2723_v63 = vpop.f32.mrf.mxu3 }
 0x331   : > { %v2767_v0 = vmax.f32 %v2610_v61, %v2723_v63 }
 0x333   : > { %v2787_v1 = vadd.f32 %v4652_v53, %v2767_v0 }
 0x334   : > { %v2817_v2 = vld [vmem:[#allocation2] ss:$2 sm:$0xff]  ;;  %v2825_v3 = vld [vmem:[#allocation2 + $0x1] ss:$2 sm:$0xff] }
 0x335   : > { %2803 = vst.msk [vmem:[#allocation2 + $0x10] sm:$0xff] %vm2472_vm1, %v2787_v1  ;;  %3854 = vmatmul.msk.f32.vlgmr.msra.gmra.mxu2 %vm2472_vm1, %v2817_v2  ;;  %3862 = vmatmul.msk.f32.vlgmr.msra.gmra.mxu3 %vm2472_vm1, %v2825_v3 }
 0x338   : > { %v2613_v4 = vpop.f32.mrf.mxu2  ;;  %v2726_v5 = vpop.f32.mrf.mxu3 }
 0x339   : > { %v2768_v6 = vmax.f32 %v2613_v4, %v2726_v5  ;;  %v3005_v5 = vld [vmem:[%s4946_s9 + $0x18] sm:$0xff] }
 0x33a   : > { %3030 = vmatpush.msrb.mxu2 %v3005_v5  ;;  %3071 = vmatpush.msrb.mxu3 %v3005_v5  ;;  %v3258_v5 = vld [vmem:[%s4952_s15 + $0x20] sm:$0xff] }
 0x33b   : > { %v2788_v7 = vadd.f32 %v4652_v53, %v2768_v6  ;;  %v3004_v6 = vld [vmem:[%s4946_s9 + $0x10] sm:$0xff] }
 0x33c   : > { %3031 = vmatpush.msrb.mxu2 %v3004_v6  ;;  %3072 = vmatpush.msrb.mxu3 %v3004_v6  ;;  %v3895_v6 = vld [vmem:[%s4952_s15 + $0x70] sm:$0xff] }
 0x33d   : > { %2804 = vst.msk [vmem:[#allocation2 + $0x18] sm:$0xff] %vm2472_vm1, %v2788_v7  ;;  %v3003_v7 = vld [vmem:[%s4946_s9 + $0x8] sm:$0xff] }
 0x33e   : > { %3032 = vmatpush.msrb.mxu2 %v3003_v7  ;;  %3073 = vmatpush.msrb.mxu3 %v3003_v7 }
 0x340   : > { %v2616_v8 = vpop.f32.mrf.mxu2  ;;  %v2729_v9 = vpop.f32.mrf.mxu3 }
 0x341   : > { %v2769_v10 = vmax.f32 %v2616_v8, %v2729_v9 }
 0x343   : > { %v2789_v11 = vadd.f32 %v4652_v53, %v2769_v10  ;;  %v3927_v10 = vld [vmem:[%s4945_s8] ss:$0 sm:$0xff] }
 0x344   : > { %v2818_v12 = vld [vmem:[#allocation2 + $0x10] ss:$2 sm:$0xff]  ;;  %v2826_v13 = vld [vmem:[#allocation2 + $0x11] ss:$2 sm:$0xff] }
 0x345   : > { %2805 = vst.msk [vmem:[#allocation2 + $0x20] sm:$0xff] %vm2472_vm1, %v2789_v11  ;;  %3855 = vmatmul.msk.f32.gmra.mxu2 %vm2472_vm1, %v2818_v12  ;;  %3863 = vmatmul.msk.f32.gmra.mxu3 %vm2472_vm1, %v2826_v13 }
 0x348   : > { %v2619_v14 = vpop.f32.mrf.mxu2  ;;  %v2732_v15 = vpop.f32.mrf.mxu3 }
 0x349   : > { %v2770_v16 = vmax.f32 %v2619_v14, %v2732_v15 }
 0x34b   : > { %v2790_v17 = vadd.f32 %v4652_v53, %v2770_v16 }
 0x34d   : > { %2806 = vst.msk [vmem:[#allocation2 + $0x28] sm:$0xff] %vm2472_vm1, %v2790_v17 }
 0x350   : > { %v2622_v18 = vpop.f32.mrf.mxu2  ;;  %v2735_v19 = vpop.f32.mrf.mxu3 }
 0x351   : > { %v2771_v20 = vmax.f32 %v2622_v18, %v2735_v19  ;;  %v3261_v19 = vld [vmem:[%s4952_s15 + $0x38] sm:$0xff] }
 0x352   : > { %3294 = vmatpush.msrb.mxu0 %v3261_v19 }
 0x353   : > { %v2791_v21 = vadd.f32 %v4652_v53, %v2771_v20 }
 0x354   : > { %v2819_v22 = vld [vmem:[#allocation2 + $0x20] ss:$2 sm:$0xff]  ;;  %v2827_v23 = vld [vmem:[#allocation2 + $0x21] ss:$2 sm:$0xff] }
 0x355   : > { %2807 = vst.msk [vmem:[#allocation2 + $0x30] sm:$0xff] %vm2472_vm1, %v2791_v21  ;;  %3856 = vmatmul.msk.f32.gmra.mxu2 %vm2472_vm1, %v2819_v22  ;;  %3864 = vmatmul.msk.f32.gmra.mxu3 %vm2472_vm1, %v2827_v23 }
 0x358   : > { %v2625_v43 = vpop.f32.mrf.mxu2  ;;  %v2738_v24 = vpop.f32.mrf.mxu3 }
 0x359   : > { %v2772_v25 = vmax.f32 %v2625_v43, %v2738_v24 }
 0x35b   : > { %v2792_v26 = vadd.f32 %v4652_v53, %v2772_v25 }
 0x35d   : > { %2808 = vst.msk [vmem:[#allocation2 + $0x38] sm:$0xff] %vm2472_vm1, %v2792_v26 }
 0x360   : > { %v2628_v27 = vpop.f32.mrf.mxu2  ;;  %v2741_v29 = vpop.f32.mrf.mxu3 }
 0x361   : > { %v2773_v30 = vmax.f32 %v2628_v27, %v2741_v29 }
 0x363   : > { %v2793_v31 = vadd.f32 %v4652_v53, %v2773_v30 }
 0x364   : > { %v2820_v32 = vld [vmem:[#allocation2 + $0x30] ss:$2 sm:$0xff]  ;;  %v2828_v33 = vld [vmem:[#allocation2 + $0x31] ss:$2 sm:$0xff] }
 0x365   : > { %2809 = vst.msk [vmem:[#allocation2 + $0x40] sm:$0xff] %vm2472_vm1, %v2793_v31  ;;  %3857 = vmatmul.msk.f32.gmra.mxu2 %vm2472_vm1, %v2820_v32  ;;  %3865 = vmatmul.msk.f32.gmra.mxu3 %vm2472_vm1, %v2828_v33 }
 0x368   : > { %v2631_v35 = vpop.f32.mrf.mxu2  ;;  %v2744_v36 = vpop.f32.mrf.mxu3 }
 0x369   : > { %v2774_v37 = vmax.f32 %v2631_v35, %v2744_v36 }
 0x36b   : > { %v2794_v38 = vadd.f32 %v4652_v53, %v2774_v37  ;;  %v3260_v37 = vld [vmem:[%s4952_s15 + $0x30] sm:$0xff] }
 0x36c   : > { %3295 = vmatpush.msrb.mxu0 %v3260_v37  ;;  %v3892_v37 = vld [vmem:[%s4952_s15 + $0x58] sm:$0xff] }
 0x36d   : > { %2810 = vst.msk [vmem:[#allocation2 + $0x48] sm:$0xff] %vm2472_vm1, %v2794_v38 }
 0x370   : > { %v2634_v39 = vpop.f32.mrf.mxu2  ;;  %v2747_v40 = vpop.f32.mrf.mxu3 }
 0x371   : > { %v2775_v41 = vmax.f32 %v2634_v39, %v2747_v40 }
 0x373   : > { %v2795_v42 = vadd.f32 %v4652_v53, %v2775_v41 }
 0x374   : > { %v2821_v44 = vld [vmem:[#allocation2 + $0x40] ss:$2 sm:$0xff]  ;;  %v2829_v45 = vld [vmem:[#allocation2 + $0x41] ss:$2 sm:$0xff] }
 0x375   : > { %2811 = vst.msk [vmem:[#allocation2 + $0x50] sm:$0xff] %vm2472_vm1, %v2795_v42  ;;  %3858 = vmatmul.msk.f32.gmra.mxu2 %vm2472_vm1, %v2821_v44  ;;  %3866 = vmatmul.msk.f32.gmra.mxu3 %vm2472_vm1, %v2829_v45 }
 0x378   : > { %v2637_v46 = vpop.f32.mrf.mxu2  ;;  %v2750_v47 = vpop.f32.mrf.mxu3 }
 0x379   : > { %v2776_v48 = vmax.f32 %v2637_v46, %v2750_v47 }
 0x37b   : > { %v2796_v49 = vadd.f32 %v4652_v53, %v2776_v48 }
 0x37d   : > { %2812 = vst.msk [vmem:[#allocation2 + $0x58] sm:$0xff] %vm2472_vm1, %v2796_v49 }
 0x380   : > { %v2640_v50 = vpop.f32.mrf.mxu2  ;;  %v2753_v51 = vpop.f32.mrf.mxu3 }
 0x381   : > { %v2777_v52 = vmax.f32 %v2640_v50, %v2753_v51 }
 0x383   : > { %v2797_v62 = vadd.f32 %v4652_v53, %v2777_v52 }
 0x384   : > { %v2822_v54 = vld [vmem:[#allocation2 + $0x50] ss:$2 sm:$0xff]  ;;  %v2830_v55 = vld [vmem:[#allocation2 + $0x51] ss:$2 sm:$0xff] }
 0x385   : > { %2813 = vst.msk [vmem:[#allocation2 + $0x60] sm:$0xff] %vm2472_vm1, %v2797_v62  ;;  %3859 = vmatmul.msk.f32.gmra.mxu2 %vm2472_vm1, %v2822_v54  ;;  %3867 = vmatmul.msk.f32.gmra.mxu3 %vm2472_vm1, %v2830_v55  ;;  %v3259_v62 = vld [vmem:[%s4952_s15 + $0x28] sm:$0xff] }
 0x386   : > { %3296 = vmatpush.msrb.mxu0 %v3259_v62  ;;  %v3931_v62 = vld [vmem:[%s4953_s16] ss:$0 sm:$0xff] }
 0x388   : > { %v2643_v56 = vpop.f32.mrf.mxu2  ;;  %v2756_v57 = vpop.f32.mrf.mxu3  ;;  %3297 = vmatpush.msrb.mxu0 %v3258_v5  ;;  %v3357_v5 = vld [vmem:[%s4954_s17 + $0x20] sm:$0xff] }
 0x389   : > { %v2778_v58 = vmax.f32 %v2643_v56, %v2756_v57  ;;  %v3928_v56 = vld [vmem:[%s4947_s10] ss:$0 sm:$0xff] }
 0x38b   : > { %v2798_v28 = vadd.f32 %v4652_v53, %v2778_v58 }
 0x38d   : > { %2814 = vst.msk [vmem:[#allocation2 + $0x68] sm:$0xff] %vm2472_vm1, %v2798_v28 }
 0x390   : > { %v2646_v59 = vpop.f32.mrf.mxu2  ;;  %v2759_v34 = vpop.f32.mrf.mxu3 }
 0x391   : > { %v2779_v60 = vmax.f32 %v2646_v59, %v2759_v34  ;;  %v3896_v34 = vld [vmem:[%s4952_s15 + $0x78] sm:$0xff] }
 0x392   : > { %3329 = vmatpush.msrb.mxu1 %v3896_v34  ;;  %v3933_v34 = vld [vmem:[%s4953_s16 + $0x2] ss:$0 sm:$0xff] }
 0x393   : > { %v2799_v61 = vadd.f32 %v4652_v53, %v2779_v60  ;;  %v3111_v60 = vld [vmem:[%s4948_s11 + $0x18] sm:$0xff] }
 0x394   : > { %v2823_v63 = vld [vmem:[#allocation2 + $0x60] ss:$2 sm:$0xff]  ;;  %v2831_v0 = vld [vmem:[#allocation2 + $0x61] ss:$2 sm:$0xff]  ;;  %3330 = vmatpush.msrb.mxu1 %v3895_v6  ;;  %v3356_v6 = vld [vmem:[%s4954_s17 + $0x18] sm:$0xff] }
 0x395   : > { %2815 = vst.msk [vmem:[#allocation2 + $0x70] sm:$0xff] %vm2472_vm1, %v2799_v61  ;;  %3860 = vmatmul.msk.f32.gmra.mxu2 %vm2472_vm1, %v2823_v63  ;;  %3868 = vmatmul.msk.f32.gmra.mxu3 %vm2472_vm1, %v2831_v0  ;;  %v3110_v61 = vld [vmem:[%s4948_s11 + $0x10] sm:$0xff]  ;;  %v3109_v63 = vld [vmem:[%s4948_s11 + $0x8] sm:$0xff]  ;;  %v3108_v0 = vld [vmem:[%s4948_s11] sm:$0xff] }
 0x3a8   : > { %v2649_v1 = vpop.f32.mrf.mxu2  ;;  %v2762_v2 = vpop.f32.mrf.mxu3 }
 0x3a9   : > { %v2780_v3 = vmax.f32 %v2649_v1, %v2762_v2 }
 0x3ab   : > { %v2800_v4 = vadd.f32 %v4652_v53, %v2780_v3  ;;  %v3002_v53 = vld [vmem:[%s4946_s9] sm:$0xff] }
 0x3ac   : > { %3033 = vmatpush.msrb.mxu2 %v3002_v53  ;;  %3074 = vmatpush.msrb.mxu3 %v3002_v53 }
 0x3ad   : > { %2816 = vst.msk [vmem:[#allocation2 + $0x78] sm:$0xff] %vm2472_vm1, %v2800_v4 }
 0x3ae   : > { %3130 = vmatpush.msra.mxu2 %v3111_v60  ;;  %3159 = vmatpush.msra.mxu3 %v3111_v60  ;;  %v3934_v60 = vld [vmem:[%s4953_s16 + $0x3] ss:$0 sm:$0xff] }
 0x3b0   : > { %3131 = vmatpush.msra.mxu2 %v3110_v61  ;;  %3160 = vmatpush.msra.mxu3 %v3110_v61 }
 0x3b2   : > { %3132 = vmatpush.msra.mxu2 %v3109_v63  ;;  %3161 = vmatpush.msra.mxu3 %v3109_v63 }
 0x3b4   : > { %v2824_v8 = vld [vmem:[#allocation2 + $0x70] ss:$2 sm:$0xff]  ;;  %v2832_v9 = vld [vmem:[#allocation2 + $0x71] ss:$2 sm:$0xff]  ;;  %3133 = vmatpush.msra.mxu2 %v3108_v0  ;;  %3162 = vmatpush.msra.mxu3 %v3108_v0  ;;  %v3935_v0 = vld [vmem:[%s4953_s16 + $0x4] ss:$0 sm:$0xff] }
 0x3b5   : > { %3861 = vmatmul.msk.f32.gmra.mxu2 %vm2472_vm1, %v2824_v8  ;;  %3869 = vmatmul.msk.f32.gmra.mxu3 %vm2472_vm1, %v2832_v9 }
 0x3b8   : > { %v2876_v11 = vpop.f32.mrf.mxu2  ;;  %v2941_v12 = vpop.f32.mrf.mxu3 }
 0x3b9   : > { %v2965_v13 = vmax.f32 %v2876_v11, %v2941_v12  ;;  %v3257_v12 = vld [vmem:[%s4952_s15 + $0x18] sm:$0xff] }
 0x3ba   : > { %3298 = vmatpush.msrb.mxu0 %v3257_v12  ;;  %v3936_v12 = vld [vmem:[%s4953_s16 + $0x5] ss:$0 sm:$0xff] }
 0x3bb   : > { %v2977_v14 = vadd.f32 %v3927_v10, %v2965_v13  ;;  %v3894_v13 = vld [vmem:[%s4952_s15 + $0x68] sm:$0xff] }
 0x3bc   : > { %3331 = vmatpush.msrb.mxu1 %v3894_v13 }
 0x3bd   : > { %2986 = vst.msk [vmem:[#allocation2] sm:$0xff] %vm2985_vm2, %v2977_v14 }
 0x3c8   : > { %v2879_v15 = vpop.f32.mrf.mxu2  ;;  %v2944_v16 = vpop.f32.mrf.mxu3 }
 0x3c9   : > { %v2966_v17 = vmax.f32 %v2879_v15, %v2944_v16 }
 0x3cb   : > { %v2978_v18 = vadd.f32 %v3927_v10, %v2966_v17 }
 0x3cd   : > { %2987 = vst.msk [vmem:[#allocation2 + $0x8] sm:$0xff] %vm2985_vm2, %v2978_v18 }
 0x3d4   : > { %v2994_v20 = vld [vmem:[#allocation2] ss:$2 sm:$0xff]  ;;  %v2998_v21 = vld [vmem:[#allocation2 + $0x1] ss:$2 sm:$0xff] }
 0x3d5   : > { %3870 = vmatmul.msk.f32.vlgmr.msrb.gmra.mxu2 %vm2985_vm2, %v2994_v20  ;;  %3874 = vmatmul.msk.f32.vlgmr.msrb.gmra.mxu3 %vm2985_vm2, %v2998_v21  ;;  %v3256_v20 = vld [vmem:[%s4952_s15 + $0x10] sm:$0xff]  ;;  %v3893_v21 = vld [vmem:[%s4952_s15 + $0x60] sm:$0xff] }
 0x3d6   : > { %3299 = vmatpush.msrb.mxu0 %v3256_v20  ;;  %3332 = vmatpush.msrb.mxu1 %v3893_v21  ;;  %v3908_v21 = vld [vmem:[%s4954_s17 + $0x60] sm:$0xff] }
 0x3d8   : > { %v2882_v22 = vpop.f32.mrf.mxu2  ;;  %v2947_v23 = vpop.f32.mrf.mxu3  ;;  %3333 = vmatpush.msrb.mxu1 %v3892_v37 }
 0x3d9   : > { %v2967_v43 = vmax.f32 %v2882_v22, %v2947_v23  ;;  %v3190_v22 = vld [vmem:[%s4950_s13 + $0x38] sm:$0xff]  ;;  %v3189_v23 = vld [vmem:[%s4950_s13 + $0x30] sm:$0xff] }
 0x3da   : > { %3202 = vmatpush.msrb.mxu2 %v3190_v22  ;;  %3225 = vmatpush.msrb.mxu3 %v3190_v22  ;;  %v3907_v22 = vld [vmem:[%s4954_s17 + $0x58] sm:$0xff] }
 0x3db   : > { %v2979_v24 = vadd.f32 %v3927_v10, %v2967_v43  ;;  %v3929_v43 = vld [vmem:[%s4949_s12] ss:$0 sm:$0xff] }
 0x3dc   : > { %3203 = vmatpush.msrb.mxu2 %v3189_v23  ;;  %3226 = vmatpush.msrb.mxu3 %v3189_v23  ;;  %v3906_v23 = vld [vmem:[%s4954_s17 + $0x50] sm:$0xff] }
 0x3dd   : > { %2988 = vst.msk [vmem:[#allocation2 + $0x10] sm:$0xff] %vm2985_vm2, %v2979_v24 }
 0x3e8   : > { %v2885_v25 = vpop.f32.mrf.mxu2  ;;  %v2950_v26 = vpop.f32.mrf.mxu3 }
 0x3e9   : > { %v2968_v27 = vmax.f32 %v2885_v25, %v2950_v26 }
 0x3eb   : > { %v2980_v29 = vadd.f32 %v3927_v10, %v2968_v27 }
 0x3ed   : > { %2989 = vst.msk [vmem:[#allocation2 + $0x18] sm:$0xff] %vm2985_vm2, %v2980_v29  ;;  %v3188_v29 = vld [vmem:[%s4950_s13 + $0x28] sm:$0xff] }
 0x3ee   : > { %3204 = vmatpush.msrb.mxu2 %v3188_v29  ;;  %3227 = vmatpush.msrb.mxu3 %v3188_v29 }
 0x3f4   : > { %v2995_v30 = vld [vmem:[#allocation2 + $0x10] ss:$2 sm:$0xff]  ;;  %v2999_v31 = vld [vmem:[#allocation2 + $0x11] ss:$2 sm:$0xff] }
 0x3f5   : > { %3871 = vmatmul.msk.f32.gmra.mxu2 %vm2985_vm2, %v2995_v30  ;;  %3875 = vmatmul.msk.f32.gmra.mxu3 %vm2985_vm2, %v2999_v31  ;;  %v3187_v30 = vld [vmem:[%s4950_s13 + $0x20] sm:$0xff]  ;;  %v3186_v31 = vld [vmem:[%s4950_s13 + $0x18] sm:$0xff] }
 0x3f6   : > { %3205 = vmatpush.msrb.mxu2 %v3187_v30  ;;  %3228 = vmatpush.msrb.mxu3 %v3187_v30  ;;  %v3941_v30 = vld [vmem:[%s4955_s18 + $0x4] ss:$0 sm:$0xff] }
 0x3f8   : > { %v2888_v32 = vpop.f32.mrf.mxu2  ;;  %v2953_v33 = vpop.f32.mrf.mxu3  ;;  %3206 = vmatpush.msrb.mxu2 %v3186_v31  ;;  %3229 = vmatpush.msrb.mxu3 %v3186_v31 }
 0x3f9   : > { %v2969_v35 = vmax.f32 %v2888_v32, %v2953_v33  ;;  %v3185_v32 = vld [vmem:[%s4950_s13 + $0x10] sm:$0xff]  ;;  %v3184_v33 = vld [vmem:[%s4950_s13 + $0x8] sm:$0xff] }
 0x3fa   : > { %3207 = vmatpush.msrb.mxu2 %v3185_v32  ;;  %3230 = vmatpush.msrb.mxu3 %v3185_v32 }
 0x3fb   : > { %v2981_v36 = vadd.f32 %v3927_v10, %v2969_v35  ;;  %v3183_v35 = vld [vmem:[%s4950_s13] sm:$0xff] }
 0x3fc   : > { %3208 = vmatpush.msrb.mxu2 %v3184_v33  ;;  %3231 = vmatpush.msrb.mxu3 %v3184_v33 }
 0x3fd   : > { %2990 = vst.msk [vmem:[#allocation2 + $0x20] sm:$0xff] %vm2985_vm2, %v2981_v36  ;;  %v3255_v36 = vld [vmem:[%s4952_s15 + $0x8] sm:$0xff] }
 0x3fe   : > { %3209 = vmatpush.msrb.mxu2 %v3183_v35  ;;  %3232 = vmatpush.msrb.mxu3 %v3183_v35  ;;  %v3942_v35 = vld [vmem:[%s4955_s18 + $0x5] ss:$0 sm:$0xff] }
 0x3ff   : > { %3300 = vmatpush.msrb.mxu0 %v3255_v36 }
 0x408   : > { %v2891_v38 = vpop.f32.mrf.mxu2  ;;  %v2956_v39 = vpop.f32.mrf.mxu3 }
 0x409   : > { %v2970_v40 = vmax.f32 %v2891_v38, %v2956_v39  ;;  %v3254_v38 = vld [vmem:[%s4952_s15] sm:$0xff]  ;;  %v3891_v39 = vld [vmem:[%s4952_s15 + $0x50] sm:$0xff] }
 0x40a   : > { %3301 = vmatpush.msrb.mxu0 %v3254_v38  ;;  %3334 = vmatpush.msrb.mxu1 %v3891_v39 }
 0x40b   : > { %v2982_v41 = vadd.f32 %v3927_v10, %v2970_v40 }
 0x40d   : > { %2991 = vst.msk [vmem:[#allocation2 + $0x28] sm:$0xff] %vm2985_vm2, %v2982_v41 }
 0x414   : > { %v2996_v42 = vld [vmem:[#allocation2 + $0x20] ss:$2 sm:$0xff]  ;;  %v3000_v44 = vld [vmem:[#allocation2 + $0x21] ss:$2 sm:$0xff] }
 0x415   : > { %3872 = vmatmul.msk.f32.gmra.mxu2 %vm2985_vm2, %v2996_v42  ;;  %3876 = vmatmul.msk.f32.gmra.mxu3 %vm2985_vm2, %v3000_v44 }
 0x418   : > { %v2894_v45 = vpop.f32.mrf.mxu2  ;;  %v2959_v46 = vpop.f32.mrf.mxu3 }
 0x419   : > { %v2971_v47 = vmax.f32 %v2894_v45, %v2959_v46 }
 0x41b   : > { %v2983_v48 = vadd.f32 %v3927_v10, %v2971_v47  ;;  %v3890_v47 = vld [vmem:[%s4952_s15 + $0x48] sm:$0xff] }
 0x41c   : > { %3335 = vmatpush.msrb.mxu1 %v3890_v47 }
 0x41d   : > { %2992 = vst.msk [vmem:[#allocation2 + $0x30] sm:$0xff] %vm2985_vm2, %v2983_v48  ;;  %v3889_v48 = vld [vmem:[%s4952_s15 + $0x40] sm:$0xff] }
 0x41e   : > { %3336 = vmatpush.msrb.mxu1 %v3889_v48 }
 0x438   : > { %v2897_v49 = vpop.f32.mrf.mxu2  ;;  %v2962_v50 = vpop.f32.mrf.mxu3 }
 0x439   : > { %v2972_v51 = vmax.f32 %v2897_v49, %v2962_v50  ;;  %v3930_v49 = vld [vmem:[%s4951_s14] ss:$0 sm:$0xff] }
 0x43b   : > { %v2984_v52 = vadd.f32 %v3927_v10, %v2972_v51 }
 0x43d   : > { %2993 = vst.msk [vmem:[#allocation2 + $0x38] sm:$0xff] %vm2985_vm2, %v2984_v52 }
 0x444   : > { %v2997_v54 = vld [vmem:[#allocation2 + $0x30] ss:$2 sm:$0xff]  ;;  %v3001_v55 = vld [vmem:[#allocation2 + $0x31] ss:$2 sm:$0xff] }
 0x445   : > { %3873 = vmatmul.msk.f32.gmra.mxu2 %vm2985_vm2, %v2997_v54  ;;  %3877 = vmatmul.msk.f32.gmra.mxu3 %vm2985_vm2, %v3001_v55  ;;  %v3932_v55 = vld [vmem:[%s4953_s16 + $0x1] ss:$0 sm:$0xff] }
 0x458   : > { %v3035_v57 = vpop.f32.mrf.mxu2  ;;  %v3076_v58 = vpop.f32.mrf.mxu3 }
 0x459   : > { %v3088_v28 = vmax.f32 %v3035_v57, %v3076_v58 }
 0x45b   : > { %v3096_v59 = vadd.f32 %v3928_v56, %v3088_v28  ;;  %v3360_v28 = vld [vmem:[%s4954_s17 + $0x38] sm:$0xff] }
 0x45d   : > { %3100 = vst.msk [vmem:[#allocation2] sm:$0xff] %vm2985_vm2, %v3096_v59  ;;  %v3359_v59 = vld [vmem:[%s4954_s17 + $0x30] sm:$0xff] }
 0x478   : > { %v3038_v1 = vpop.f32.mrf.mxu2  ;;  %v3079_v2 = vpop.f32.mrf.mxu3 }
 0x479   : > { %v3089_v3 = vmax.f32 %v3038_v1, %v3079_v2 }
 0x47b   : > { %v3097_v4 = vadd.f32 %v3928_v56, %v3089_v3 }
 0x47d   : > { %3101 = vst.msk [vmem:[#allocation2 + $0x8] sm:$0xff] %vm2985_vm2, %v3097_v4  ;;  %v3358_v4 = vld [vmem:[%s4954_s17 + $0x28] sm:$0xff] }
 0x484   : > { %v3104_v7 = vld [vmem:[#allocation2] ss:$2 sm:$0xff]  ;;  %v3106_v53 = vld [vmem:[#allocation2 + $0x1] ss:$2 sm:$0xff] }
 0x485   : > { %3878 = vmatmul.msk.f32.vlgmr.msra.gmra.mxu2 %vm2985_vm2, %v3104_v7  ;;  %3880 = vmatmul.msk.f32.vlgmr.msra.gmra.mxu3 %vm2985_vm2, %v3106_v53  ;;  %v3355_v7 = vld [vmem:[%s4954_s17 + $0x10] sm:$0xff]  ;;  %v3354_v53 = vld [vmem:[%s4954_s17 + $0x8] sm:$0xff] }
 0x486   : > { %3393 = vmatpush.msra.mxu2 %v3360_v28 }
 0x488   : > { %3394 = vmatpush.msra.mxu2 %v3359_v59 }
 0x48a   : > { %3395 = vmatpush.msra.mxu2 %v3358_v4 }
 0x48c   : > { %3396 = vmatpush.msra.mxu2 %v3357_v5 }
 0x48e   : > { %3397 = vmatpush.msra.mxu2 %v3356_v6 }
 0x490   : > { %3398 = vmatpush.msra.mxu2 %v3355_v7 }
 0x492   : > { %3399 = vmatpush.msra.mxu2 %v3354_v53 }
 0x498   : > { %v3041_v8 = vpop.f32.mrf.mxu2  ;;  %v3082_v9 = vpop.f32.mrf.mxu3 }
 0x499   : > { %v3090_v10 = vmax.f32 %v3041_v8, %v3082_v9  ;;  %v3353_v8 = vld [vmem:[%s4954_s17] sm:$0xff]  ;;  %v3911_v9 = vld [vmem:[%s4954_s17 + $0x78] sm:$0xff] }
 0x49a   : > { %3400 = vmatpush.msra.mxu2 %v3353_v8  ;;  %3428 = vmatpush.msra.mxu3 %v3911_v9 }
 0x49b   : > { %v3098_v11 = vadd.f32 %v3928_v56, %v3090_v10  ;;  %v3910_v10 = vld [vmem:[%s4954_s17 + $0x70] sm:$0xff] }
 0x49c   : > { %3429 = vmatpush.msra.mxu3 %v3910_v10 }
 0x49d   : > { %3102 = vst.msk [vmem:[#allocation2 + $0x10] sm:$0xff] %vm2985_vm2, %v3098_v11  ;;  %v3909_v11 = vld [vmem:[%s4954_s17 + $0x68] sm:$0xff] }
 0x49e   : > { %3430 = vmatpush.msra.mxu3 %v3909_v11 }
 0x4a0   : > { %3431 = vmatpush.msra.mxu3 %v3908_v21 }
 0x4a2   : > { %3432 = vmatpush.msra.mxu3 %v3907_v22 }
 0x4a4   : > { %3433 = vmatpush.msra.mxu3 %v3906_v23 }
 0x4c8   : > { %v3044_v14 = vpop.f32.mrf.mxu2  ;;  %v3085_v15 = vpop.f32.mrf.mxu3 }
 0x4c9   : > { %v3091_v16 = vmax.f32 %v3044_v14, %v3085_v15  ;;  %v3937_v15 = vld [vmem:[%s4955_s18] ss:$0 sm:$0xff] }
 0x4cb   : > { %v3099_v17 = vadd.f32 %v3928_v56, %v3091_v16 }
 0x4cd   : > { %3103 = vst.msk [vmem:[#allocation2 + $0x18] sm:$0xff] %vm2985_vm2, %v3099_v17  ;;  %v3938_v17 = vld [vmem:[%s4955_s18 + $0x1] ss:$0 sm:$0xff] }
 0x4d4   : > { %v3105_v18 = vld [vmem:[#allocation2 + $0x10] ss:$2 sm:$0xff]  ;;  %v3107_v19 = vld [vmem:[#allocation2 + $0x11] ss:$2 sm:$0xff] }
 0x4d5   : > { %3879 = vmatmul.msk.f32.gmra.mxu2 %vm2985_vm2, %v3105_v18  ;;  %3881 = vmatmul.msk.f32.gmra.mxu3 %vm2985_vm2, %v3107_v19 }
 0x508   : > { %v3135_v24 = vpop.f32.mrf.mxu2  ;;  %v3164_v25 = vpop.f32.mrf.mxu3 }
 0x509   : > { %v3170_v26 = vmax.f32 %v3135_v24, %v3164_v25  ;;  %v3904_v24 = vld [vmem:[%s4954_s17 + $0x40] sm:$0xff] }
 0x50a   : > { %v3939_v25 = vld [vmem:[%s4955_s18 + $0x2] ss:$0 sm:$0xff] }
 0x50b   : > { %v3176_v27 = vadd.f32 %v3929_v43, %v3170_v26  ;;  %v3940_v26 = vld [vmem:[%s4955_s18 + $0x3] ss:$0 sm:$0xff] }
 0x50d   : > { %3179 = vst.msk [vmem:[#allocation2] sm:$0xff] %vm3178_vm3, %v3176_v27 }
 0x558   : > { %v3138_v40 = vpop.f32.mrf.mxu2  ;;  %v3167_v41 = vpop.f32.mrf.mxu3 }
 0x559   : > { %v3171_v42 = vmax.f32 %v3138_v40, %v3167_v41 }
 0x55b   : > { %v3177_v44 = vadd.f32 %v3929_v43, %v3171_v42  ;;  %v3905_v43 = vld [vmem:[%s4954_s17 + $0x48] sm:$0xff] }
 0x55c   : > { %3434 = vmatpush.msra.mxu3 %v3905_v43 }
 0x55d   : > { %3180 = vst.msk [vmem:[#allocation2 + $0x8] sm:$0xff] %vm3178_vm3, %v3177_v44 }
 0x55e   : > { %3435 = vmatpush.msra.mxu3 %v3904_v24 }
 0x564   : > { %v3181_v45 = vld [vmem:[#allocation2] ss:$2 sm:$0xff]  ;;  %v3182_v46 = vld [vmem:[#allocation2 + $0x1] ss:$2 sm:$0xff] }
 0x565   : > { %3882 = vmatmul.msk.f32.vlgmr.msrb.gmra.mxu2 %vm3178_vm3, %v3181_v45  ;;  %3883 = vmatmul.msk.f32.vlgmr.msrb.gmra.mxu3 %vm3178_vm3, %v3182_v46 }
 0x5e8   : > { %v3211_v50 = vpop.f32.mrf.mxu2  ;;  %v3234_v51 = vpop.f32.mrf.mxu3 }
 0x5e9   : > { %v3237_v52 = vmax.f32 %v3211_v50, %v3234_v51 }
 0x5eb   : > { %v3242_v54 = vadd.f32 %v3930_v49, %v3237_v52 }
 0x5ed   : > { %v3274_v56 = vmul.f32 %v3931_v62, %v3242_v54 }
 0x5ef   : > { %v3278_v57 = vadd.f32 %v3932_v55, %v3274_v56 }
 0x5f1   : > { %v3279_v58 = vmax.f32 %v3278_v57, 0.0 }
 0x5f3   : > { %3897 = vmatmul.msk.f32.vlgmr.msrb.gmra.mxu0 %vm3178_vm3, %v3279_v58 }
 0x670   : > { %v3303_v61 = vpop.f32.mrf.mxu0 }
 0x671   : > { %v3304_v63 = vadd.f32 %v3933_v34, %v3303_v61 }
 0x673   : > { %v3309_v1 = vmul.f32 %v3934_v60, %v3304_v63 }
 0x675   : > { %v3313_v2 = vadd.f32 %v3935_v0, %v3309_v1 }
 0x677   : > { %v3314_v3 = vmax.f32 %v3313_v2, 0.0 }
 0x679   : > { %3898 = vmatmul.msk.f32.vlgmr.msrb.gmra.mxu1 %vm3178_vm3, %v3314_v3 }
 0x6f6   : > { %v3338_v13 = vpop.f32.mrf.mxu1 }
 0x6f7   : > { %v3339_v14 = vadd.f32 %v3936_v12, %v3338_v13 }
 0x6f9   : > { %v3341_v16 = vadd.f32 %v3339_v14, %v3242_v54 }
 0x6fb   : > { %v3373_v18 = vmul.f32 %v3937_v15, %v3341_v16 }
 0x6fd   : > { %v3377_v19 = vadd.f32 %v3938_v17, %v3373_v18 }
 0x6ff   : > { %v3378_v20 = vmax.f32 %v3377_v19, 0.0 }
 0x701   : > { %3912 = vmatmul.msk.f32.vlgmr.msra.gmra.mxu2 %vm3178_vm3, %v3378_v20 }
 0x784   : > { %v3402_v27 = vpop.f32.mrf.mxu2 }
 0x785   : > { %v3403_v29 = vadd.f32 %v3939_v25, %v3402_v27 }
 0x787   : > { %v3408_v31 = vmul.f32 %v3940_v26, %v3403_v29 }
 0x789   : > { %v3412_v32 = vadd.f32 %v3941_v30, %v3408_v31 }
 0x78b   : > { %v3413_v33 = vmax.f32 %v3412_v32, 0.0 }
 0x78d   : > { %3913 = vmatmul.msk.f32.vlgmr.msra.gmra.mxu3 %vm3178_vm3, %v3413_v33 }
 0x810   : > { %v3437_v36 = vpop.f32.mrf.mxu3 }
 0x811   : > { %v3438_v37 = vadd.f32 %v3942_v35, %v3437_v36 }
 0x813   : > { %v3440_v38 = vadd.f32 %v3438_v37, %v3341_v16 }
 0x815   : > { %3441 = vst.msk [vmem:[%s602_s23] sm:$0xff] %vm3178_vm3, %v3440_v38 }
 0x816 PF: > { %s29_s0 = sadd.s32 1, %s3951_s0  }
 0x817   : > { %p26_p5 = scmp.ge.s32.totalorder %s29_s0, 4  }
 0x819   :  { %28 = sbr.rel (!%p26_p5) target bundleno = 5 (0x5), region = 328 }

</bundles_post_ra>
